<compile_context>
chip_gen: v6e
topology: v6e:2x2x1
jax: 0.10.0
libtpu: 0.0.40
codegen_flags: <defaults>
</compile_context>

<pallas_src>
import math
import numpy as np
import jax
import jax.numpy as jnp
from jax.experimental import pallas as pl
from jax.experimental.pallas import tpu as pltpu

# ----------------------------- config ---------------------------------------
BATCH       = 64          # effective batch = states x candidate actions
ACTION_DIM  = 8
STATE_DIM   = 16
GOAL_DIM    = 8
HIDDEN      = 64
T_EMB_DIM   = 16
N_TIMESTEPS = 8
MIN_ACTION  = -1.0
MAX_ACTION  = 1.0

A, H, T = ACTION_DIM, HIDDEN, N_TIMESTEPS

# weight-slab row layout (bf16, boundaries on multiples of 16 sublanes)
_W2_R0,  _W2_R1  = 0, H                # w2     (H, H)
_W3_R0,  _W3_R1  = H, 2 * H            # w3_pad (H, H)  cols >= A are zero
_W1X_R0, _W1X_R1 = 2 * H, 2 * H + A    # w1x    (A, H)
W_SLAB_ROWS = 2 * H + A                # 136


# ----------------------------- schedule (host-side numpy) -------------------
def linear_beta_schedule(n_timesteps, beta_start=1e-4, beta_end=2e-2):
    return np.linspace(beta_start, beta_end, n_timesteps, dtype=np.float64)


def build_diffusion_coefs(n_timesteps):
    betas = linear_beta_schedule(n_timesteps)
    alphas = 1.0 - betas
    acp = np.cumprod(alphas)
    acp_prev = np.concatenate([np.ones(1), acp[:-1]])
    sqrt_recip_acp = np.sqrt(1.0 / acp)
    sqrt_recipm1_acp = np.sqrt(1.0 / acp - 1.0)
    post_var = betas * (1.0 - acp_prev) / (1.0 - acp)
    post_log_var = np.log(np.clip(post_var, 1e-20, None))
    c1 = betas * np.sqrt(acp_prev) / (1.0 - acp)
    c2 = (1.0 - acp_prev) * np.sqrt(alphas) / (1.0 - acp)
    nonzero_mask = (np.arange(n_timesteps) != 0).astype(np.float64)
    sigma = nonzero_mask * np.exp(0.5 * post_log_var)      # 0.0 exactly at t=0
    # columns: [sqrt_recip, sqrt_recipm1, c1, c2, sigma]
    return np.stack([sqrt_recip_acp, sqrt_recipm1_acp, c1, c2, sigma], axis=1)


def sinusoidal_time_emb(n_timesteps, dim):
    half = dim // 2
    freqs = np.exp(np.arange(half) * -(math.log(10000.0) / (half - 1)))
    args = np.arange(n_timesteps)[:, None] * freqs[None, :]
    return np.concatenate([np.sin(args), np.cos(args)], axis=1).astype(np.float32)


_COEFS = build_diffusion_coefs(N_TIMESTEPS)          # numpy (T, 5) float64
_TEMB  = sinusoidal_time_emb(N_TIMESTEPS, T_EMB_DIM)  # numpy (T, T_EMB) float32


# ----------------------------- fused Pallas kernel --------------------------
def fused_p_sample_loop_kernel(x_ref,      # VMEM (Bc, A)   f32   x_T ~ N(0, I)
                               noise_ref,  # VMEM (Bc, T*A) f32   lane-packed noise
                               h1_ref,     # VMEM (T, Bc, H) f32  layer-1 pre-acts
                               w_ref,      # VMEM (136, H)  bf16  weight slab
                               b_ref,      # VMEM (2, H)    f32   [b2; b3_pad]
                               out_ref):   # VMEM (Bc, A)   f32
    # ---- hoist weights out of the unrolled loop (one VMEM load each) -------
    w   = w_ref[...]                         # (136, H) bf16
    w2  = w[_W2_R0:_W2_R1]                   # (H, H)
    w3  = w[_W3_R0:_W3_R1]                   # (H, H)   cols >= A are zero
    w1x = w[_W1X_R0:_W1X_R1]                 # (A, H)
    b   = b_ref[...]                         # (2, H) f32
    b2  = b[0:1]                             # (1, H)
    b3  = b[1:2]                             # (1, H)   cols >= A are zero

    def mish(h):
        # mish(h) = h * tanh(softplus(h)).  With z = 1 + exp(h):
        #   tanh(log(z)) = (z*z - 1) / (z*z + 1)
        # h is clamped before exp so z*z never overflows; for h >= 20 the
        # ratio is 1.0 to f32 precision (i.e. mish(h) == h), as required.
        z = 1.0 + jnp.exp(jnp.minimum(h, 20.0))
        z2 = z * z
        return h * (z2 - 1.0) * pl.reciprocal(z2 + 1.0, approx=True)

    x = x_ref[...]                           # (Bc, A) f32, vreg-resident carrier

    # Fully unrolled reverse-diffusion loop.  `t` is a Python int, so every
    # slice below is static and every schedule coefficient folds into the
    # vector ops as an immediate.
    for t in range(N_TIMESTEPS - 1, -1, -1):
        sqrt_recip   = float(_COEFS[t, 0])
        sqrt_recipm1 = float(_COEFS[t, 1])
        c1           = float(_COEFS[t, 2])   # > 0 for all t
        c2           = float(_COEFS[t, 3])
        sigma        = float(_COEFS[t, 4])   # == 0.0 at t == 0

        h1_pre = h1_ref[t]                          # (Bc, H) static slice
        noise  = noise_ref[:, t * A:(t + 1) * A]    # (Bc, A) static lane slice

        # ---- noise-prediction MLP: eps = model(x, t, state, goal) ----------
        # bf16 operands -> single-pass MXU matmuls; f32 accumulation.
        h1 = jnp.dot(x.astype(jnp.bfloat16), w1x,
                     preferred_element_type=jnp.float32) + h1_pre
        h1 = mish(h1)
        h2 = mish(jnp.dot(h1.astype(jnp.bfloat16), w2,
                          preferred_element_type=jnp.float32) + b2)
        eps = (jnp.dot(h2.astype(jnp.bfloat16), w3,
                       preferred_element_type=jnp.float32) + b3)[:, :A]

        # ---- predict_start_from_noise + clip_denoised + q_posterior mean ---
        # c1 * clip(v, lo, hi) == clip(c1*v, c1*lo, c1*hi) for c1 > 0, so c1
        # is folded into the clip bounds (one fewer vector mul per step).
        x_recon_c1 = jnp.clip((c1 * sqrt_recip) * x - (c1 * sqrt_recipm1) * eps,
                              c1 * MIN_ACTION, c1 * MAX_ACTION)
        x = x_recon_c1 + c2 * x
        if sigma != 0.0:                     # t == 0: skip the noise FMA
            x = x + sigma * noise

    # sample(): final clamp to action bounds; single store at the end.
    out_ref[...] = jnp.clip(x, MIN_ACTION, MAX_ACTION)


def _default_num_chunks():
    """2 batch chunks on v7x (2 TensorCores/chip), 1 elsewhere (v5e/v6e)."""
    try:
        kind = jax.devices()[0].device_kind.lower()
    except Exception:
        return 1
    return 2 if ("v7" in kind or "7x" in kind) else 1


def _build_fused_sampler(num_chunks):
    assert BATCH % num_chunks == 0
    bc = BATCH // num_chunks
    assert bc % 8 == 0
    return pl.pallas_call(
        fused_p_sample_loop_kernel,
        out_shape=jax.ShapeDtypeStruct((BATCH, ACTION_DIM), jnp.float32),
        grid=(num_chunks,),
        in_specs=[
            pl.BlockSpec((bc, ACTION_DIM),       lambda i: (i, 0)),     # x_init
            pl.BlockSpec((bc, T * ACTION_DIM),   lambda i: (i, 0)),     # noise
            pl.BlockSpec((T, bc, HIDDEN),        lambda i: (0, i, 0)),  # h1 table
            pl.BlockSpec((W_SLAB_ROWS, HIDDEN),  lambda i: (0, 0)),     # weight slab
            pl.BlockSpec((2, HIDDEN),            lambda i: (0, 0)),     # bias slab
        ],
        out_specs=pl.BlockSpec((bc, ACTION_DIM), lambda i: (i, 0)),
        compiler_params=pltpu.CompilerParams(
            dimension_semantics=("parallel",)),
    )


NUM_CHUNKS = _default_num_chunks()
_fused_sampler = _build_fused_sampler(NUM_CHUNKS)


# ----------------------------- params / host-side packing -------------------
def init_mlp_params(key):
    ks = jax.random.split(key, 8)
    in_dim = ACTION_DIM + T_EMB_DIM + STATE_DIM + GOAL_DIM

    def dense(k, fan_in, shape):
        return jax.random.normal(k, shape, jnp.float32) / np.sqrt(fan_in)

    return dict(
        w1x=dense(ks[0], in_dim, (ACTION_DIM, HIDDEN)),
        w1t=dense(ks[1], in_dim, (T_EMB_DIM, HIDDEN)),
        w1s=dense(ks[2], in_dim, (STATE_DIM, HIDDEN)),
        w1g=dense(ks[3], in_dim, (GOAL_DIM, HIDDEN)),
        b1=jnp.zeros((1, HIDDEN), jnp.float32),
        w2=dense(ks[4], HIDDEN, (HIDDEN, HIDDEN)),
        b2=jnp.zeros((1, HIDDEN), jnp.float32),
        w3=dense(ks[5], HIDDEN, (HIDDEN, ACTION_DIM)),
        b3=jnp.zeros((1, ACTION_DIM), jnp.float32),
    )


def prepare_inference_params(params):
    """One-time host-side packing into lane-dense slabs (done once, not per call)."""
    w3_pad = jnp.zeros((HIDDEN, HIDDEN), jnp.float32).at[:, :ACTION_DIM].set(params["w3"])
    w_slab = jnp.concatenate([params["w2"], w3_pad, params["w1x"]],
                             axis=0).astype(jnp.bfloat16)            # (136, H) bf16
    b3_pad = jnp.zeros((1, HIDDEN), jnp.float32).at[:, :ACTION_DIM].set(params["b3"])
    b_slab = jnp.concatenate([params["b2"], b3_pad], axis=0)         # (2, H) f32
    # Per-timestep contribution of the time embedding to layer 1 (state-free).
    temb_contrib = jnp.dot(jnp.asarray(_TEMB), params["w1t"])        # (T, H) f32
    return dict(w_slab=w_slab, b_slab=b_slab, temb_contrib=temb_contrib,
                w1s=params["w1s"], w1g=params["w1g"], b1=params["b1"])


# ----------------------------- forward (== sample) --------------------------
@jax.jit
def guided_diffusion_forward(x_init, noise_all, state, goal, prep):
    """p_sample_loop fused into one Pallas kernel call."""
    # Hoisted time-invariant layer-1 term, merged with the per-timestep
    # time-embedding term into a single (T, B, H) table (includes b1).
    h1_const = (jnp.dot(state, prep["w1s"])
                + jnp.dot(goal, prep["w1g"])
                + prep["b1"])                                        # (B, H)
    h1_table = prep["temb_contrib"][:, None, :] + h1_const[None, :, :]  # (T, B, H)

    # Lane-dense noise packing: (T, B, A) -> (B, T*A).
    noise_packed = jnp.transpose(noise_all, (1, 0, 2)).reshape(BATCH, T * ACTION_DIM)

    return _fused_sampler(x_init, noise_packed, h1_table,
                          prep["w_slab"], prep["b_slab"])


# ----------------------------- float64 numpy reference ----------------------
def reference_sample_np(x_init, noise_all, state, goal, params):
    p = {k: np.asarray(v, np.float64) for k, v in params.items()}
    st = np.asarray(state, np.float64)
    gl = np.asarray(goal, np.float64)
    temb = np.asarray(_TEMB, np.float64)
    x = np.asarray(x_init, np.float64)
    noise = np.asarray(noise_all, np.float64)

    def mish(h):
        return h * np.tanh(np.logaddexp(0.0, h))

    for t in reversed(range(N_TIMESTEPS)):
        h1 = mish(x @ p["w1x"] + temb[t][None, :] @ p["w1t"]
                  + st @ p["w1s"] + gl @ p["w1g"] + p["b1"])
        h2 = mish(h1 @ p["w2"] + p["b2"])
        eps = h2 @ p["w3"] + p["b3"]
        x_recon = np.clip(_COEFS[t, 0] * x - _COEFS[t, 1] * eps,
                          MIN_ACTION, MAX_ACTION)
        x = _COEFS[t, 2] * x_recon + _COEFS[t, 3] * x + _COEFS[t, 4] * noise[t]
    return np.clip(x, MIN_ACTION, MAX_ACTION)


# ----------------------------- main ------------------------------------------
if __name__ == "__main__":
    root = jax.random.PRNGKey(0)
    k_param, k_state, k_goal, k_x, k_noise = jax.random.split(root, 5)

    params = init_mlp_params(k_param)
    prep = prepare_inference_params(params)

    state = jax.random.normal(k_state, (BATCH, STATE_DIM), jnp.float32)
    goal = jax.random.normal(k_goal, (BATCH, GOAL_DIM), jnp.float32)

    # x_T ~ N(0, I) and all per-step noise generated up-front (one dispatch).
    x_init = jax.random.normal(k_x, (BATCH, ACTION_DIM), jnp.float32)
    noise_all = jax.random.normal(k_noise, (N_TIMESTEPS, BATCH, ACTION_DIM),
                                  jnp.float32)

    action = guided_diffusion_forward(x_init, noise_all, state, goal, prep)
    action = jax.block_until_ready(action)

    a_np = np.asarray(action)
    ref = reference_sample_np(x_init, noise_all, state, goal, params)

    assert a_np.shape == (BATCH, ACTION_DIM)
    assert np.all(np.isfinite(a_np))
    assert np.all((a_np >= MIN_ACTION - 1e-6) & (a_np <= MAX_ACTION + 1e-6))
    # bf16 matmul operands + approx reciprocal over 8 clipped steps: loose tol.
    assert np.max(np.abs(a_np - ref)) < 0.2
    print("KERNEL_OK")
</pallas_src>

<mosaic_0001>
module attributes {stable_mosaic.version = 11 : i64} {
  func.func @fused_p_sample_loop_kernel(%arg0: i32, %arg1: memref<64x8xf32, #tpu.memory_space<vmem>>, %arg2: memref<64x64xf32, #tpu.memory_space<vmem>>, %arg3: memref<8x64x64xf32, #tpu.memory_space<vmem>>, %arg4: memref<136x64xbf16, #tpu.memory_space<vmem>>, %arg5: memref<2x64xf32, #tpu.memory_space<vmem>>, %arg6: memref<64x8xf32, #tpu.memory_space<vmem>>) attributes {dimension_semantics = [#tpu.dimension_semantics<parallel>], iteration_bounds = array<i64: 1>, scalar_prefetch = 0 : i64, scratch_operands = 0 : i64, tpu.core_type = #tpu.core_type<tc>, window_params = [{transform_indices = @transform_0, window_bounds = array<i64: 64, 8>}, {transform_indices = @transform_1, window_bounds = array<i64: 64, 64>}, {transform_indices = @transform_2, window_bounds = array<i64: 8, 64, 64>}, {pipeline_mode = #tpu.pipeline_mode<synchronous>, transform_indices = @transform_3, window_bounds = array<i64: 136, 64>}, {pipeline_mode = #tpu.pipeline_mode<synchronous>, transform_indices = @transform_4, window_bounds = array<i64: 2, 64>}, {transform_indices = @transform_5, window_bounds = array<i64: 64, 8>}]} {
    %c0 = arith.constant 0 : index
    %c0_0 = arith.constant 0 : index
    %0 = vector.load %arg4[%c0, %c0_0] : memref<136x64xbf16, #tpu.memory_space<vmem>>, vector<136x64xbf16>
    %1 = vector.extract_strided_slice %0 {offsets = [0, 0], sizes = [64, 64], strides = [1, 1]} : vector<136x64xbf16> to vector<64x64xbf16>
    %2 = vector.extract_strided_slice %0 {offsets = [64, 0], sizes = [64, 64], strides = [1, 1]} : vector<136x64xbf16> to vector<64x64xbf16>
    %3 = vector.extract_strided_slice %0 {offsets = [128, 0], sizes = [8, 64], strides = [1, 1]} : vector<136x64xbf16> to vector<8x64xbf16>
    %c0_1 = arith.constant 0 : index
    %c0_2 = arith.constant 0 : index
    %4 = vector.load %arg5[%c0_1, %c0_2] : memref<2x64xf32, #tpu.memory_space<vmem>>, vector<2x64xf32>
    %5 = vector.extract_strided_slice %4 {offsets = [0, 0], sizes = [1, 64], strides = [1, 1]} : vector<2x64xf32> to vector<1x64xf32>
    %6 = vector.extract_strided_slice %4 {offsets = [1, 0], sizes = [1, 64], strides = [1, 1]} : vector<2x64xf32> to vector<1x64xf32>
    %c0_3 = arith.constant 0 : index
    %c0_4 = arith.constant 0 : index
    %7 = vector.load %arg1[%c0_3, %c0_4] : memref<64x8xf32, #tpu.memory_space<vmem>>, vector<64x8xf32>
    %c7 = arith.constant 7 : index
    %c0_5 = arith.constant 0 : index
    %c0_6 = arith.constant 0 : index
    %8 = vector.load %arg3[%c7, %c0_5, %c0_6] : memref<8x64x64xf32, #tpu.memory_space<vmem>>, vector<1x64x64xf32>
    %9 = vector.shape_cast %8 : vector<1x64x64xf32> to vector<64x64xf32>
    %c0_7 = arith.constant 0 : index
    %c56 = arith.constant 56 : index
    %10 = vector.load %arg2[%c0_7, %c56] : memref<64x64xf32, #tpu.memory_space<vmem>>, vector<64x8xf32>
    %11 = arith.truncf %7 : vector<64x8xf32> to vector<64x8xbf16>
    %cst = arith.constant dense<0.000000e+00> : vector<64x64xf32>
    %12 = tpu.matmul %11, %3, %cst {dimension_numbers = #tpu.dot_dimension_numbers<[1], [0], [0], [1], [0, 0, 1, 1], [], []>} : vector<64x8xbf16>, vector<8x64xbf16>, vector<64x64xf32> -> vector<64x64xf32>
    %13 = arith.addf %12, %9 : vector<64x64xf32>
    %cst_8 = arith.constant 2.000000e+01 : f32
    %14 = vector.broadcast %cst_8 : f32 to vector<64x64xf32>
    %15 = arith.minimumf %13, %14 : vector<64x64xf32>
    %16 = math.exp %15 : vector<64x64xf32>
    %cst_9 = arith.constant 1.000000e+00 : f32
    %17 = vector.broadcast %cst_9 : f32 to vector<64x64xf32>
    %18 = arith.addf %17, %16 : vector<64x64xf32>
    %19 = arith.mulf %18, %18 : vector<64x64xf32>
    %cst_10 = arith.constant 1.000000e+00 : f32
    %20 = vector.broadcast %cst_10 : f32 to vector<64x64xf32>
    %21 = arith.subf %19, %20 : vector<64x64xf32>
    %22 = arith.mulf %13, %21 : vector<64x64xf32>
    %cst_11 = arith.constant 1.000000e+00 : f32
    %23 = vector.broadcast %cst_11 : f32 to vector<64x64xf32>
    %24 = arith.addf %19, %23 : vector<64x64xf32>
    %25 = tpu.reciprocal %24 {approx = true} : vector<64x64xf32> -> vector<64x64xf32>
    %26 = arith.mulf %22, %25 : vector<64x64xf32>
    %27 = arith.truncf %26 : vector<64x64xf32> to vector<64x64xbf16>
    %cst_12 = arith.constant dense<0.000000e+00> : vector<64x64xf32>
    %28 = tpu.matmul %27, %1, %cst_12 {dimension_numbers = #tpu.dot_dimension_numbers<[1], [0], [0], [1], [0, 0, 1, 1], [], []>} : vector<64x64xbf16>, vector<64x64xbf16>, vector<64x64xf32> -> vector<64x64xf32>
    %29 = vector.broadcast %5 : vector<1x64xf32> to vector<64x64xf32>
    %30 = arith.addf %28, %29 : vector<64x64xf32>
    %cst_13 = arith.constant 2.000000e+01 : f32
    %31 = vector.broadcast %cst_13 : f32 to vector<64x64xf32>
    %32 = arith.minimumf %30, %31 : vector<64x64xf32>
    %33 = math.exp %32 : vector<64x64xf32>
    %cst_14 = arith.constant 1.000000e+00 : f32
    %34 = vector.broadcast %cst_14 : f32 to vector<64x64xf32>
    %35 = arith.addf %34, %33 : vector<64x64xf32>
    %36 = arith.mulf %35, %35 : vector<64x64xf32>
    %cst_15 = arith.constant 1.000000e+00 : f32
    %37 = vector.broadcast %cst_15 : f32 to vector<64x64xf32>
    %38 = arith.subf %36, %37 : vector<64x64xf32>
    %39 = arith.mulf %30, %38 : vector<64x64xf32>
    %cst_16 = arith.constant 1.000000e+00 : f32
    %40 = vector.broadcast %cst_16 : f32 to vector<64x64xf32>
    %41 = arith.addf %36, %40 : vector<64x64xf32>
    %42 = tpu.reciprocal %41 {approx = true} : vector<64x64xf32> -> vector<64x64xf32>
    %43 = arith.mulf %39, %42 : vector<64x64xf32>
    %44 = arith.truncf %43 : vector<64x64xf32> to vector<64x64xbf16>
    %cst_17 = arith.constant dense<0.000000e+00> : vector<64x64xf32>
    %45 = tpu.matmul %44, %2, %cst_17 {dimension_numbers = #tpu.dot_dimension_numbers<[1], [0], [0], [1], [0, 0, 1, 1], [], []>} : vector<64x64xbf16>, vector<64x64xbf16>, vector<64x64xf32> -> vector<64x64xf32>
    %46 = vector.broadcast %6 : vector<1x64xf32> to vector<64x64xf32>
    %47 = arith.addf %45, %46 : vector<64x64xf32>
    %48 = vector.extract_strided_slice %47 {offsets = [0, 0], sizes = [64, 8], strides = [1, 1]} : vector<64x64xf32> to vector<64x8xf32>
    %cst_18 = arith.constant 0.259720057 : f32
    %49 = vector.broadcast %cst_18 : f32 to vector<64x8xf32>
    %50 = arith.mulf %49, %7 : vector<64x8xf32>
    %cst_19 = arith.constant 0.0724371299 : f32
    %51 = vector.broadcast %cst_19 : f32 to vector<64x8xf32>
    %52 = arith.mulf %51, %48 : vector<64x8xf32>
    %53 = arith.subf %50, %52 : vector<64x8xf32>
    %cst_20 = arith.constant -0.249414057 : f32
    %cst_21 = arith.constant 0.249414057 : f32
    %54 = vector.broadcast %cst_20 : f32 to vector<64x8xf32>
    %55 = arith.maximumf %54, %53 : vector<64x8xf32>
    %56 = vector.broadcast %cst_21 : f32 to vector<64x8xf32>
    %57 = arith.minimumf %56, %55 : vector<64x8xf32>
    %cst_22 = arith.constant 0.750432491 : f32
    %58 = vector.broadcast %cst_22 : f32 to vector<64x8xf32>
    %59 = arith.mulf %58, %7 : vector<64x8xf32>
    %60 = arith.addf %57, %59 : vector<64x8xf32>
    %cst_23 = arith.constant 0.12313012 : f32
    %61 = vector.broadcast %cst_23 : f32 to vector<64x8xf32>
    %62 = arith.mulf %61, %10 : vector<64x8xf32>
    %63 = arith.addf %60, %62 : vector<64x8xf32>
    %c6 = arith.constant 6 : index
    %c0_24 = arith.constant 0 : index
    %c0_25 = arith.constant 0 : index
    %64 = vector.load %arg3[%c6, %c0_24, %c0_25] : memref<8x64x64xf32, #tpu.memory_space<vmem>>, vector<1x64x64xf32>
    %65 = vector.shape_cast %64 : vector<1x64x64xf32> to vector<64x64xf32>
    %c0_26 = arith.constant 0 : index
    %c48 = arith.constant 48 : index
    %66 = vector.load %arg2[%c0_26, %c48] : memref<64x64xf32, #tpu.memory_space<vmem>>, vector<64x8xf32>
    %67 = arith.truncf %63 : vector<64x8xf32> to vector<64x8xbf16>
    %cst_27 = arith.constant dense<0.000000e+00> : vector<64x64xf32>
    %68 = tpu.matmul %67, %3, %cst_27 {dimension_numbers = #tpu.dot_dimension_numbers<[1], [0], [0], [1], [0, 0, 1, 1], [], []>} : vector<64x8xbf16>, vector<8x64xbf16>, vector<64x64xf32> -> vector<64x64xf32>
    %69 = arith.addf %68, %65 : vector<64x64xf32>
    %cst_28 = arith.constant 2.000000e+01 : f32
    %70 = vector.broadcast %cst_28 : f32 to vector<64x64xf32>
    %71 = arith.minimumf %69, %70 : vector<64x64xf32>
    %72 = math.exp %71 : vector<64x64xf32>
    %cst_29 = arith.constant 1.000000e+00 : f32
    %73 = vector.broadcast %cst_29 : f32 to vector<64x64xf32>
    %74 = arith.addf %73, %72 : vector<64x64xf32>
    %75 = arith.mulf %74, %74 : vector<64x64xf32>
    %cst_30 = arith.constant 1.000000e+00 : f32
    %76 = vector.broadcast %cst_30 : f32 to vector<64x64xf32>
    %77 = arith.subf %75, %76 : vector<64x64xf32>
    %78 = arith.mulf %69, %77 : vector<64x64xf32>
    %cst_31 = arith.constant 1.000000e+00 : f32
    %79 = vector.broadcast %cst_31 : f32 to vector<64x64xf32>
    %80 = arith.addf %75, %79 : vector<64x64xf32>
    %81 = tpu.reciprocal %80 {approx = true} : vector<64x64xf32> -> vector<64x64xf32>
    %82 = arith.mulf %78, %81 : vector<64x64xf32>
    %83 = arith.truncf %82 : vector<64x64xf32> to vector<64x64xbf16>
    %cst_32 = arith.constant dense<0.000000e+00> : vector<64x64xf32>
    %84 = tpu.matmul %83, %1, %cst_32 {dimension_numbers = #tpu.dot_dimension_numbers<[1], [0], [0], [1], [0, 0, 1, 1], [], []>} : vector<64x64xbf16>, vector<64x64xbf16>, vector<64x64xf32> -> vector<64x64xf32>
    %85 = vector.broadcast %5 : vector<1x64xf32> to vector<64x64xf32>
    %86 = arith.addf %84, %85 : vector<64x64xf32>
    %cst_33 = arith.constant 2.000000e+01 : f32
    %87 = vector.broadcast %cst_33 : f32 to vector<64x64xf32>
    %88 = arith.minimumf %86, %87 : vector<64x64xf32>
    %89 = math.exp %88 : vector<64x64xf32>
    %cst_34 = arith.constant 1.000000e+00 : f32
    %90 = vector.broadcast %cst_34 : f32 to vector<64x64xf32>
    %91 = arith.addf %90, %89 : vector<64x64xf32>
    %92 = arith.mulf %91, %91 : vector<64x64xf32>
    %cst_35 = arith.constant 1.000000e+00 : f32
    %93 = vector.broadcast %cst_35 : f32 to vector<64x64xf32>
    %94 = arith.subf %92, %93 : vector<64x64xf32>
    %95 = arith.mulf %86, %94 : vector<64x64xf32>
    %cst_36 = arith.constant 1.000000e+00 : f32
    %96 = vector.broadcast %cst_36 : f32 to vector<64x64xf32>
    %97 = arith.addf %92, %96 : vector<64x64xf32>
    %98 = tpu.reciprocal %97 {approx = true} : vector<64x64xf32> -> vector<64x64xf32>
    %99 = arith.mulf %95, %98 : vector<64x64xf32>
    %100 = arith.truncf %99 : vector<64x64xf32> to vector<64x64xbf16>
    %cst_37 = arith.constant dense<0.000000e+00> : vector<64x64xf32>
    %101 = tpu.matmul %100, %2, %cst_37 {dimension_numbers = #tpu.dot_dimension_numbers<[1], [0], [0], [1], [0, 0, 1, 1], [], []>} : vector<64x64xbf16>, vector<64x64xbf16>, vector<64x64xf32> -> vector<64x64xf32>
    %102 = vector.broadcast %6 : vector<1x64xf32> to vector<64x64xf32>
    %103 = arith.addf %101, %102 : vector<64x64xf32>
    %104 = vector.extract_strided_slice %103 {offsets = [0, 0], sizes = [64, 8], strides = [1, 1]} : vector<64x64xf32> to vector<64x8xf32>
    %cst_38 = arith.constant 0.293489695 : f32
    %105 = vector.broadcast %cst_38 : f32 to vector<64x8xf32>
    %106 = arith.mulf %105, %63 : vector<64x8xf32>
    %cst_39 = arith.constant 0.0712685436 : f32
    %107 = vector.broadcast %cst_39 : f32 to vector<64x8xf32>
    %108 = arith.mulf %107, %104 : vector<64x8xf32>
    %109 = arith.subf %106, %108 : vector<64x8xf32>
    %cst_40 = arith.constant -0.284705102 : f32
    %cst_41 = arith.constant 0.284705102 : f32
    %110 = vector.broadcast %cst_40 : f32 to vector<64x8xf32>
    %111 = arith.maximumf %110, %109 : vector<64x8xf32>
    %112 = vector.broadcast %cst_41 : f32 to vector<64x8xf32>
    %113 = arith.minimumf %112, %111 : vector<64x8xf32>
    %cst_42 = arith.constant 0.715200841 : f32
    %114 = vector.broadcast %cst_42 : f32 to vector<64x8xf32>
    %115 = arith.mulf %114, %63 : vector<64x8xf32>
    %116 = arith.addf %113, %115 : vector<64x8xf32>
    %cst_43 = arith.constant 0.111253962 : f32
    %117 = vector.broadcast %cst_43 : f32 to vector<64x8xf32>
    %118 = arith.mulf %117, %66 : vector<64x8xf32>
    %119 = arith.addf %116, %118 : vector<64x8xf32>
    %c5 = arith.constant 5 : index
    %c0_44 = arith.constant 0 : index
    %c0_45 = arith.constant 0 : index
    %120 = vector.load %arg3[%c5, %c0_44, %c0_45] : memref<8x64x64xf32, #tpu.memory_space<vmem>>, vector<1x64x64xf32>
    %121 = vector.shape_cast %120 : vector<1x64x64xf32> to vector<64x64xf32>
    %c0_46 = arith.constant 0 : index
    %c40 = arith.constant 40 : index
    %122 = vector.load %arg2[%c0_46, %c40] : memref<64x64xf32, #tpu.memory_space<vmem>>, vector<64x8xf32>
    %123 = arith.truncf %119 : vector<64x8xf32> to vector<64x8xbf16>
    %cst_47 = arith.constant dense<0.000000e+00> : vector<64x64xf32>
    %124 = tpu.matmul %123, %3, %cst_47 {dimension_numbers = #tpu.dot_dimension_numbers<[1], [0], [0], [1], [0, 0, 1, 1], [], []>} : vector<64x8xbf16>, vector<8x64xbf16>, vector<64x64xf32> -> vector<64x64xf32>
    %125 = arith.addf %124, %121 : vector<64x64xf32>
    %cst_48 = arith.constant 2.000000e+01 : f32
    %126 = vector.broadcast %cst_48 : f32 to vector<64x64xf32>
    %127 = arith.minimumf %125, %126 : vector<64x64xf32>
    %128 = math.exp %127 : vector<64x64xf32>
    %cst_49 = arith.constant 1.000000e+00 : f32
    %129 = vector.broadcast %cst_49 : f32 to vector<64x64xf32>
    %130 = arith.addf %129, %128 : vector<64x64xf32>
    %131 = arith.mulf %130, %130 : vector<64x64xf32>
    %cst_50 = arith.constant 1.000000e+00 : f32
    %132 = vector.broadcast %cst_50 : f32 to vector<64x64xf32>
    %133 = arith.subf %131, %132 : vector<64x64xf32>
    %134 = arith.mulf %125, %133 : vector<64x64xf32>
    %cst_51 = arith.constant 1.000000e+00 : f32
    %135 = vector.broadcast %cst_51 : f32 to vector<64x64xf32>
    %136 = arith.addf %131, %135 : vector<64x64xf32>
    %137 = tpu.reciprocal %136 {approx = true} : vector<64x64xf32> -> vector<64x64xf32>
    %138 = arith.mulf %134, %137 : vector<64x64xf32>
    %139 = arith.truncf %138 : vector<64x64xf32> to vector<64x64xbf16>
    %cst_52 = arith.constant dense<0.000000e+00> : vector<64x64xf32>
    %140 = tpu.matmul %139, %1, %cst_52 {dimension_numbers = #tpu.dot_dimension_numbers<[1], [0], [0], [1], [0, 0, 1, 1], [], []>} : vector<64x64xbf16>, vector<64x64xbf16>, vector<64x64xf32> -> vector<64x64xf32>
    %141 = vector.broadcast %5 : vector<1x64xf32> to vector<64x64xf32>
    %142 = arith.addf %140, %141 : vector<64x64xf32>
    %cst_53 = arith.constant 2.000000e+01 : f32
    %143 = vector.broadcast %cst_53 : f32 to vector<64x64xf32>
    %144 = arith.minimumf %142, %143 : vector<64x64xf32>
    %145 = math.exp %144 : vector<64x64xf32>
    %cst_54 = arith.constant 1.000000e+00 : f32
    %146 = vector.broadcast %cst_54 : f32 to vector<64x64xf32>
    %147 = arith.addf %146, %145 : vector<64x64xf32>
    %148 = arith.mulf %147, %147 : vector<64x64xf32>
    %cst_55 = arith.constant 1.000000e+00 : f32
    %149 = vector.broadcast %cst_55 : f32 to vector<64x64xf32>
    %150 = arith.subf %148, %149 : vector<64x64xf32>
    %151 = arith.mulf %142, %150 : vector<64x64xf32>
    %cst_56 = arith.constant 1.000000e+00 : f32
    %152 = vector.broadcast %cst_56 : f32 to vector<64x64xf32>
    %153 = arith.addf %148, %152 : vector<64x64xf32>
    %154 = tpu.reciprocal %153 {approx = true} : vector<64x64xf32> -> vector<64x64xf32>
    %155 = arith.mulf %151, %154 : vector<64x64xf32>
    %156 = arith.truncf %155 : vector<64x64xf32> to vector<64x64xbf16>
    %cst_57 = arith.constant dense<0.000000e+00> : vector<64x64xf32>
    %157 = tpu.matmul %156, %2, %cst_57 {dimension_numbers = #tpu.dot_dimension_numbers<[1], [0], [0], [1], [0, 0, 1, 1], [], []>} : vector<64x64xbf16>, vector<64x64xbf16>, vector<64x64xf32> -> vector<64x64xf32>
    %158 = vector.broadcast %6 : vector<1x64xf32> to vector<64x64xf32>
    %159 = arith.addf %157, %158 : vector<64x64xf32>
    %160 = vector.extract_strided_slice %159 {offsets = [0, 0], sizes = [64, 8], strides = [1, 1]} : vector<64x64xf32> to vector<64x8xf32>
    %cst_58 = arith.constant 0.33892563 : f32
    %161 = vector.broadcast %cst_58 : f32 to vector<64x8xf32>
    %162 = arith.mulf %161, %119 : vector<64x8xf32>
    %cst_59 = arith.constant 0.0699040666 : f32
    %163 = vector.broadcast %cst_59 : f32 to vector<64x8xf32>
    %164 = arith.mulf %163, %160 : vector<64x8xf32>
    %165 = arith.subf %162, %164 : vector<64x8xf32>
    %cst_60 = arith.constant -0.331638366 : f32
    %cst_61 = arith.constant 0.331638366 : f32
    %166 = vector.broadcast %cst_60 : f32 to vector<64x8xf32>
    %167 = arith.maximumf %166, %165 : vector<64x8xf32>
    %168 = vector.broadcast %cst_61 : f32 to vector<64x8xf32>
    %169 = arith.minimumf %168, %167 : vector<64x8xf32>
    %cst_62 = arith.constant 0.668309271 : f32
    %170 = vector.broadcast %cst_62 : f32 to vector<64x8xf32>
    %171 = arith.mulf %170, %119 : vector<64x8xf32>
    %172 = arith.addf %169, %171 : vector<64x8xf32>
    %cst_63 = arith.constant 0.098160997 : f32
    %173 = vector.broadcast %cst_63 : f32 to vector<64x8xf32>
    %174 = arith.mulf %173, %122 : vector<64x8xf32>
    %175 = arith.addf %172, %174 : vector<64x8xf32>
    %c4 = arith.constant 4 : index
    %c0_64 = arith.constant 0 : index
    %c0_65 = arith.constant 0 : index
    %176 = vector.load %arg3[%c4, %c0_64, %c0_65] : memref<8x64x64xf32, #tpu.memory_space<vmem>>, vector<1x64x64xf32>
    %177 = vector.shape_cast %176 : vector<1x64x64xf32> to vector<64x64xf32>
    %c0_66 = arith.constant 0 : index
    %c32 = arith.constant 32 : index
    %178 = vector.load %arg2[%c0_66, %c32] : memref<64x64xf32, #tpu.memory_space<vmem>>, vector<64x8xf32>
    %179 = arith.truncf %175 : vector<64x8xf32> to vector<64x8xbf16>
    %cst_67 = arith.constant dense<0.000000e+00> : vector<64x64xf32>
    %180 = tpu.matmul %179, %3, %cst_67 {dimension_numbers = #tpu.dot_dimension_numbers<[1], [0], [0], [1], [0, 0, 1, 1], [], []>} : vector<64x8xbf16>, vector<8x64xbf16>, vector<64x64xf32> -> vector<64x64xf32>
    %181 = arith.addf %180, %177 : vector<64x64xf32>
    %cst_68 = arith.constant 2.000000e+01 : f32
    %182 = vector.broadcast %cst_68 : f32 to vector<64x64xf32>
    %183 = arith.minimumf %181, %182 : vector<64x64xf32>
    %184 = math.exp %183 : vector<64x64xf32>
    %cst_69 = arith.constant 1.000000e+00 : f32
    %185 = vector.broadcast %cst_69 : f32 to vector<64x64xf32>
    %186 = arith.addf %185, %184 : vector<64x64xf32>
    %187 = arith.mulf %186, %186 : vector<64x64xf32>
    %cst_70 = arith.constant 1.000000e+00 : f32
    %188 = vector.broadcast %cst_70 : f32 to vector<64x64xf32>
    %189 = arith.subf %187, %188 : vector<64x64xf32>
    %190 = arith.mulf %181, %189 : vector<64x64xf32>
    %cst_71 = arith.constant 1.000000e+00 : f32
    %191 = vector.broadcast %cst_71 : f32 to vector<64x64xf32>
    %192 = arith.addf %187, %191 : vector<64x64xf32>
    %193 = tpu.reciprocal %192 {approx = true} : vector<64x64xf32> -> vector<64x64xf32>
    %194 = arith.mulf %190, %193 : vector<64x64xf32>
    %195 = arith.truncf %194 : vector<64x64xf32> to vector<64x64xbf16>
    %cst_72 = arith.constant dense<0.000000e+00> : vector<64x64xf32>
    %196 = tpu.matmul %195, %1, %cst_72 {dimension_numbers = #tpu.dot_dimension_numbers<[1], [0], [0], [1], [0, 0, 1, 1], [], []>} : vector<64x64xbf16>, vector<64x64xbf16>, vector<64x64xf32> -> vector<64x64xf32>
    %197 = vector.broadcast %5 : vector<1x64xf32> to vector<64x64xf32>
    %198 = arith.addf %196, %197 : vector<64x64xf32>
    %cst_73 = arith.constant 2.000000e+01 : f32
    %199 = vector.broadcast %cst_73 : f32 to vector<64x64xf32>
    %200 = arith.minimumf %198, %199 : vector<64x64xf32>
    %201 = math.exp %200 : vector<64x64xf32>
    %cst_74 = arith.constant 1.000000e+00 : f32
    %202 = vector.broadcast %cst_74 : f32 to vector<64x64xf32>
    %203 = arith.addf %202, %201 : vector<64x64xf32>
    %204 = arith.mulf %203, %203 : vector<64x64xf32>
    %cst_75 = arith.constant 1.000000e+00 : f32
    %205 = vector.broadcast %cst_75 : f32 to vector<64x64xf32>
    %206 = arith.subf %204, %205 : vector<64x64xf32>
    %207 = arith.mulf %198, %206 : vector<64x64xf32>
    %cst_76 = arith.constant 1.000000e+00 : f32
    %208 = vector.broadcast %cst_76 : f32 to vector<64x64xf32>
    %209 = arith.addf %204, %208 : vector<64x64xf32>
    %210 = tpu.reciprocal %209 {approx = true} : vector<64x64xf32> -> vector<64x64xf32>
    %211 = arith.mulf %207, %210 : vector<64x64xf32>
    %212 = arith.truncf %211 : vector<64x64xf32> to vector<64x64xbf16>
    %cst_77 = arith.constant dense<0.000000e+00> : vector<64x64xf32>
    %213 = tpu.matmul %212, %2, %cst_77 {dimension_numbers = #tpu.dot_dimension_numbers<[1], [0], [0], [1], [0, 0, 1, 1], [], []>} : vector<64x64xbf16>, vector<64x64xbf16>, vector<64x64xf32> -> vector<64x64xf32>
    %214 = vector.broadcast %6 : vector<1x64xf32> to vector<64x64xf32>
    %215 = arith.addf %213, %214 : vector<64x64xf32>
    %216 = vector.extract_strided_slice %215 {offsets = [0, 0], sizes = [64, 8], strides = [1, 1]} : vector<64x64xf32> to vector<64x8xf32>
    %cst_78 = arith.constant 0.402919769 : f32
    %217 = vector.broadcast %cst_78 : f32 to vector<64x8xf32>
    %218 = arith.mulf %217, %175 : vector<64x8xf32>
    %cst_79 = arith.constant 0.0681821555 : f32
    %219 = vector.broadcast %cst_79 : f32 to vector<64x8xf32>
    %220 = arith.mulf %219, %216 : vector<64x8xf32>
    %221 = arith.subf %218, %220 : vector<64x8xf32>
    %cst_80 = arith.constant -0.397108972 : f32
    %cst_81 = arith.constant 0.397108972 : f32
    %222 = vector.broadcast %cst_80 : f32 to vector<64x8xf32>
    %223 = arith.maximumf %222, %221 : vector<64x8xf32>
    %224 = vector.broadcast %cst_81 : f32 to vector<64x8xf32>
    %225 = arith.minimumf %224, %223 : vector<64x8xf32>
    %cst_82 = arith.constant 0.602865756 : f32
    %226 = vector.broadcast %cst_82 : f32 to vector<64x8xf32>
    %227 = arith.mulf %226, %175 : vector<64x8xf32>
    %228 = arith.addf %225, %227 : vector<64x8xf32>
    %cst_83 = arith.constant 8.340110e-02 : f32
    %229 = vector.broadcast %cst_83 : f32 to vector<64x8xf32>
    %230 = arith.mulf %229, %178 : vector<64x8xf32>
    %231 = arith.addf %228, %230 : vector<64x8xf32>
    %c3 = arith.constant 3 : index
    %c0_84 = arith.constant 0 : index
    %c0_85 = arith.constant 0 : index
    %232 = vector.load %arg3[%c3, %c0_84, %c0_85] : memref<8x64x64xf32, #tpu.memory_space<vmem>>, vector<1x64x64xf32>
    %233 = vector.shape_cast %232 : vector<1x64x64xf32> to vector<64x64xf32>
    %c0_86 = arith.constant 0 : index
    %c24 = arith.constant 24 : index
    %234 = vector.load %arg2[%c0_86, %c24] : memref<64x64xf32, #tpu.memory_space<vmem>>, vector<64x8xf32>
    %235 = arith.truncf %231 : vector<64x8xf32> to vector<64x8xbf16>
    %cst_87 = arith.constant dense<0.000000e+00> : vector<64x64xf32>
    %236 = tpu.matmul %235, %3, %cst_87 {dimension_numbers = #tpu.dot_dimension_numbers<[1], [0], [0], [1], [0, 0, 1, 1], [], []>} : vector<64x8xbf16>, vector<8x64xbf16>, vector<64x64xf32> -> vector<64x64xf32>
    %237 = arith.addf %236, %233 : vector<64x64xf32>
    %cst_88 = arith.constant 2.000000e+01 : f32
    %238 = vector.broadcast %cst_88 : f32 to vector<64x64xf32>
    %239 = arith.minimumf %237, %238 : vector<64x64xf32>
    %240 = math.exp %239 : vector<64x64xf32>
    %cst_89 = arith.constant 1.000000e+00 : f32
    %241 = vector.broadcast %cst_89 : f32 to vector<64x64xf32>
    %242 = arith.addf %241, %240 : vector<64x64xf32>
    %243 = arith.mulf %242, %242 : vector<64x64xf32>
    %cst_90 = arith.constant 1.000000e+00 : f32
    %244 = vector.broadcast %cst_90 : f32 to vector<64x64xf32>
    %245 = arith.subf %243, %244 : vector<64x64xf32>
    %246 = arith.mulf %237, %245 : vector<64x64xf32>
    %cst_91 = arith.constant 1.000000e+00 : f32
    %247 = vector.broadcast %cst_91 : f32 to vector<64x64xf32>
    %248 = arith.addf %243, %247 : vector<64x64xf32>
    %249 = tpu.reciprocal %248 {approx = true} : vector<64x64xf32> -> vector<64x64xf32>
    %250 = arith.mulf %246, %249 : vector<64x64xf32>
    %251 = arith.truncf %250 : vector<64x64xf32> to vector<64x64xbf16>
    %cst_92 = arith.constant dense<0.000000e+00> : vector<64x64xf32>
    %252 = tpu.matmul %251, %1, %cst_92 {dimension_numbers = #tpu.dot_dimension_numbers<[1], [0], [0], [1], [0, 0, 1, 1], [], []>} : vector<64x64xbf16>, vector<64x64xbf16>, vector<64x64xf32> -> vector<64x64xf32>
    %253 = vector.broadcast %5 : vector<1x64xf32> to vector<64x64xf32>
    %254 = arith.addf %252, %253 : vector<64x64xf32>
    %cst_93 = arith.constant 2.000000e+01 : f32
    %255 = vector.broadcast %cst_93 : f32 to vector<64x64xf32>
    %256 = arith.minimumf %254, %255 : vector<64x64xf32>
    %257 = math.exp %256 : vector<64x64xf32>
    %cst_94 = arith.constant 1.000000e+00 : f32
    %258 = vector.broadcast %cst_94 : f32 to vector<64x64xf32>
    %259 = arith.addf %258, %257 : vector<64x64xf32>
    %260 = arith.mulf %259, %259 : vector<64x64xf32>
    %cst_95 = arith.constant 1.000000e+00 : f32
    %261 = vector.broadcast %cst_95 : f32 to vector<64x64xf32>
    %262 = arith.subf %260, %261 : vector<64x64xf32>
    %263 = arith.mulf %254, %262 : vector<64x64xf32>
    %cst_96 = arith.constant 1.000000e+00 : f32
    %264 = vector.broadcast %cst_96 : f32 to vector<64x64xf32>
    %265 = arith.addf %260, %264 : vector<64x64xf32>
    %266 = tpu.reciprocal %265 {approx = true} : vector<64x64xf32> -> vector<64x64xf32>
    %267 = arith.mulf %263, %266 : vector<64x64xf32>
    %268 = arith.truncf %267 : vector<64x64xf32> to vector<64x64xbf16>
    %cst_97 = arith.constant dense<0.000000e+00> : vector<64x64xf32>
    %269 = tpu.matmul %268, %2, %cst_97 {dimension_numbers = #tpu.dot_dimension_numbers<[1], [0], [0], [1], [0, 0, 1, 1], [], []>} : vector<64x64xbf16>, vector<64x64xbf16>, vector<64x64xf32> -> vector<64x64xf32>
    %270 = vector.broadcast %6 : vector<1x64xf32> to vector<64x64xf32>
    %271 = arith.addf %269, %270 : vector<64x64xf32>
    %272 = vector.extract_strided_slice %271 {offsets = [0, 0], sizes = [64, 8], strides = [1, 1]} : vector<64x64xf32> to vector<64x8xf32>
    %cst_98 = arith.constant 0.499103248 : f32
    %273 = vector.broadcast %cst_98 : f32 to vector<64x8xf32>
    %274 = arith.mulf %273, %231 : vector<64x8xf32>
    %cst_99 = arith.constant 0.0657666251 : f32
    %275 = vector.broadcast %cst_99 : f32 to vector<64x8xf32>
    %276 = arith.mulf %275, %272 : vector<64x8xf32>
    %277 = arith.subf %274, %276 : vector<64x8xf32>
    %cst_100 = arith.constant -0.494751245 : f32
    %cst_101 = arith.constant 0.494751245 : f32
    %278 = vector.broadcast %cst_100 : f32 to vector<64x8xf32>
    %279 = arith.maximumf %278, %277 : vector<64x8xf32>
    %280 = vector.broadcast %cst_101 : f32 to vector<64x8xf32>
    %281 = arith.minimumf %280, %279 : vector<64x8xf32>
    %cst_102 = arith.constant 0.505239189 : f32
    %282 = vector.broadcast %cst_102 : f32 to vector<64x8xf32>
    %283 = arith.mulf %282, %231 : vector<64x8xf32>
    %284 = arith.addf %281, %283 : vector<64x8xf32>
    %cst_103 = arith.constant 0.0661696493 : f32
    %285 = vector.broadcast %cst_103 : f32 to vector<64x8xf32>
    %286 = arith.mulf %285, %234 : vector<64x8xf32>
    %287 = arith.addf %284, %286 : vector<64x8xf32>
    %c2 = arith.constant 2 : index
    %c0_104 = arith.constant 0 : index
    %c0_105 = arith.constant 0 : index
    %288 = vector.load %arg3[%c2, %c0_104, %c0_105] : memref<8x64x64xf32, #tpu.memory_space<vmem>>, vector<1x64x64xf32>
    %289 = vector.shape_cast %288 : vector<1x64x64xf32> to vector<64x64xf32>
    %c0_106 = arith.constant 0 : index
    %c16 = arith.constant 16 : index
    %290 = vector.load %arg2[%c0_106, %c16] : memref<64x64xf32, #tpu.memory_space<vmem>>, vector<64x8xf32>
    %291 = arith.truncf %287 : vector<64x8xf32> to vector<64x8xbf16>
    %cst_107 = arith.constant dense<0.000000e+00> : vector<64x64xf32>
    %292 = tpu.matmul %291, %3, %cst_107 {dimension_numbers = #tpu.dot_dimension_numbers<[1], [0], [0], [1], [0, 0, 1, 1], [], []>} : vector<64x8xbf16>, vector<8x64xbf16>, vector<64x64xf32> -> vector<64x64xf32>
    %293 = arith.addf %292, %289 : vector<64x64xf32>
    %cst_108 = arith.constant 2.000000e+01 : f32
    %294 = vector.broadcast %cst_108 : f32 to vector<64x64xf32>
    %295 = arith.minimumf %293, %294 : vector<64x64xf32>
    %296 = math.exp %295 : vector<64x64xf32>
    %cst_109 = arith.constant 1.000000e+00 : f32
    %297 = vector.broadcast %cst_109 : f32 to vector<64x64xf32>
    %298 = arith.addf %297, %296 : vector<64x64xf32>
    %299 = arith.mulf %298, %298 : vector<64x64xf32>
    %cst_110 = arith.constant 1.000000e+00 : f32
    %300 = vector.broadcast %cst_110 : f32 to vector<64x64xf32>
    %301 = arith.subf %299, %300 : vector<64x64xf32>
    %302 = arith.mulf %293, %301 : vector<64x64xf32>
    %cst_111 = arith.constant 1.000000e+00 : f32
    %303 = vector.broadcast %cst_111 : f32 to vector<64x64xf32>
    %304 = arith.addf %299, %303 : vector<64x64xf32>
    %305 = tpu.reciprocal %304 {approx = true} : vector<64x64xf32> -> vector<64x64xf32>
    %306 = arith.mulf %302, %305 : vector<64x64xf32>
    %307 = arith.truncf %306 : vector<64x64xf32> to vector<64x64xbf16>
    %cst_112 = arith.constant dense<0.000000e+00> : vector<64x64xf32>
    %308 = tpu.matmul %307, %1, %cst_112 {dimension_numbers = #tpu.dot_dimension_numbers<[1], [0], [0], [1], [0, 0, 1, 1], [], []>} : vector<64x64xbf16>, vector<64x64xbf16>, vector<64x64xf32> -> vector<64x64xf32>
    %309 = vector.broadcast %5 : vector<1x64xf32> to vector<64x64xf32>
    %310 = arith.addf %308, %309 : vector<64x64xf32>
    %cst_113 = arith.constant 2.000000e+01 : f32
    %311 = vector.broadcast %cst_113 : f32 to vector<64x64xf32>
    %312 = arith.minimumf %310, %311 : vector<64x64xf32>
    %313 = math.exp %312 : vector<64x64xf32>
    %cst_114 = arith.constant 1.000000e+00 : f32
    %314 = vector.broadcast %cst_114 : f32 to vector<64x64xf32>
    %315 = arith.addf %314, %313 : vector<64x64xf32>
    %316 = arith.mulf %315, %315 : vector<64x64xf32>
    %cst_115 = arith.constant 1.000000e+00 : f32
    %317 = vector.broadcast %cst_115 : f32 to vector<64x64xf32>
    %318 = arith.subf %316, %317 : vector<64x64xf32>
    %319 = arith.mulf %310, %318 : vector<64x64xf32>
    %cst_116 = arith.constant 1.000000e+00 : f32
    %320 = vector.broadcast %cst_116 : f32 to vector<64x64xf32>
    %321 = arith.addf %316, %320 : vector<64x64xf32>
    %322 = tpu.reciprocal %321 {approx = true} : vector<64x64xf32> -> vector<64x64xf32>
    %323 = arith.mulf %319, %322 : vector<64x64xf32>
    %324 = arith.truncf %323 : vector<64x64xf32> to vector<64x64xbf16>
    %cst_117 = arith.constant dense<0.000000e+00> : vector<64x64xf32>
    %325 = tpu.matmul %324, %2, %cst_117 {dimension_numbers = #tpu.dot_dimension_numbers<[1], [0], [0], [1], [0, 0, 1, 1], [], []>} : vector<64x64xbf16>, vector<64x64xbf16>, vector<64x64xf32> -> vector<64x64xf32>
    %326 = vector.broadcast %6 : vector<1x64xf32> to vector<64x64xf32>
    %327 = arith.addf %325, %326 : vector<64x64xf32>
    %328 = vector.extract_strided_slice %327 {offsets = [0, 0], sizes = [64, 8], strides = [1, 1]} : vector<64x64xf32> to vector<64x8xf32>
    %cst_118 = arith.constant 6.585790e-01 : f32
    %329 = vector.broadcast %cst_118 : f32 to vector<64x8xf32>
    %330 = arith.mulf %329, %287 : vector<64x8xf32>
    %cst_119 = arith.constant 0.0618176386 : f32
    %331 = vector.broadcast %cst_119 : f32 to vector<64x8xf32>
    %332 = arith.mulf %331, %328 : vector<64x8xf32>
    %333 = arith.subf %330, %332 : vector<64x8xf32>
    %cst_120 = arith.constant -0.655671298 : f32
    %cst_121 = arith.constant 0.655671298 : f32
    %334 = vector.broadcast %cst_120 : f32 to vector<64x8xf32>
    %335 = arith.maximumf %334, %333 : vector<64x8xf32>
    %336 = vector.broadcast %cst_121 : f32 to vector<64x8xf32>
    %337 = arith.minimumf %336, %335 : vector<64x8xf32>
    %cst_122 = arith.constant 0.344326496 : f32
    %338 = vector.broadcast %cst_122 : f32 to vector<64x8xf32>
    %339 = arith.mulf %338, %287 : vector<64x8xf32>
    %340 = arith.addf %337, %339 : vector<64x8xf32>
    %cst_123 = arith.constant 0.0446985774 : f32
    %341 = vector.broadcast %cst_123 : f32 to vector<64x8xf32>
    %342 = arith.mulf %341, %290 : vector<64x8xf32>
    %343 = arith.addf %340, %342 : vector<64x8xf32>
    %c1 = arith.constant 1 : index
    %c0_124 = arith.constant 0 : index
    %c0_125 = arith.constant 0 : index
    %344 = vector.load %arg3[%c1, %c0_124, %c0_125] : memref<8x64x64xf32, #tpu.memory_space<vmem>>, vector<1x64x64xf32>
    %345 = vector.shape_cast %344 : vector<1x64x64xf32> to vector<64x64xf32>
    %c0_126 = arith.constant 0 : index
    %c8 = arith.constant 8 : index
    %346 = vector.load %arg2[%c0_126, %c8] : memref<64x64xf32, #tpu.memory_space<vmem>>, vector<64x8xf32>
    %347 = arith.truncf %343 : vector<64x8xf32> to vector<64x8xbf16>
    %cst_127 = arith.constant dense<0.000000e+00> : vector<64x64xf32>
    %348 = tpu.matmul %347, %3, %cst_127 {dimension_numbers = #tpu.dot_dimension_numbers<[1], [0], [0], [1], [0, 0, 1, 1], [], []>} : vector<64x8xbf16>, vector<8x64xbf16>, vector<64x64xf32> -> vector<64x64xf32>
    %349 = arith.addf %348, %345 : vector<64x64xf32>
    %cst_128 = arith.constant 2.000000e+01 : f32
    %350 = vector.broadcast %cst_128 : f32 to vector<64x64xf32>
    %351 = arith.minimumf %349, %350 : vector<64x64xf32>
    %352 = math.exp %351 : vector<64x64xf32>
    %cst_129 = arith.constant 1.000000e+00 : f32
    %353 = vector.broadcast %cst_129 : f32 to vector<64x64xf32>
    %354 = arith.addf %353, %352 : vector<64x64xf32>
    %355 = arith.mulf %354, %354 : vector<64x64xf32>
    %cst_130 = arith.constant 1.000000e+00 : f32
    %356 = vector.broadcast %cst_130 : f32 to vector<64x64xf32>
    %357 = arith.subf %355, %356 : vector<64x64xf32>
    %358 = arith.mulf %349, %357 : vector<64x64xf32>
    %cst_131 = arith.constant 1.000000e+00 : f32
    %359 = vector.broadcast %cst_131 : f32 to vector<64x64xf32>
    %360 = arith.addf %355, %359 : vector<64x64xf32>
    %361 = tpu.reciprocal %360 {approx = true} : vector<64x64xf32> -> vector<64x64xf32>
    %362 = arith.mulf %358, %361 : vector<64x64xf32>
    %363 = arith.truncf %362 : vector<64x64xf32> to vector<64x64xbf16>
    %cst_132 = arith.constant dense<0.000000e+00> : vector<64x64xf32>
    %364 = tpu.matmul %363, %1, %cst_132 {dimension_numbers = #tpu.dot_dimension_numbers<[1], [0], [0], [1], [0, 0, 1, 1], [], []>} : vector<64x64xbf16>, vector<64x64xbf16>, vector<64x64xf32> -> vector<64x64xf32>
    %365 = vector.broadcast %5 : vector<1x64xf32> to vector<64x64xf32>
    %366 = arith.addf %364, %365 : vector<64x64xf32>
    %cst_133 = arith.constant 2.000000e+01 : f32
    %367 = vector.broadcast %cst_133 : f32 to vector<64x64xf32>
    %368 = arith.minimumf %366, %367 : vector<64x64xf32>
    %369 = math.exp %368 : vector<64x64xf32>
    %cst_134 = arith.constant 1.000000e+00 : f32
    %370 = vector.broadcast %cst_134 : f32 to vector<64x64xf32>
    %371 = arith.addf %370, %369 : vector<64x64xf32>
    %372 = arith.mulf %371, %371 : vector<64x64xf32>
    %cst_135 = arith.constant 1.000000e+00 : f32
    %373 = vector.broadcast %cst_135 : f32 to vector<64x64xf32>
    %374 = arith.subf %372, %373 : vector<64x64xf32>
    %375 = arith.mulf %366, %374 : vector<64x64xf32>
    %cst_136 = arith.constant 1.000000e+00 : f32
    %376 = vector.broadcast %cst_136 : f32 to vector<64x64xf32>
    %377 = arith.addf %372, %376 : vector<64x64xf32>
    %378 = tpu.reciprocal %377 {approx = true} : vector<64x64xf32> -> vector<64x64xf32>
    %379 = arith.mulf %375, %378 : vector<64x64xf32>
    %380 = arith.truncf %379 : vector<64x64xf32> to vector<64x64xbf16>
    %cst_137 = arith.constant dense<0.000000e+00> : vector<64x64xf32>
    %381 = tpu.matmul %380, %2, %cst_137 {dimension_numbers = #tpu.dot_dimension_numbers<[1], [0], [0], [1], [0, 0, 1, 1], [], []>} : vector<64x64xbf16>, vector<64x64xbf16>, vector<64x64xf32> -> vector<64x64xf32>
    %382 = vector.broadcast %6 : vector<1x64xf32> to vector<64x64xf32>
    %383 = arith.addf %381, %382 : vector<64x64xf32>
    %384 = vector.extract_strided_slice %383 {offsets = [0, 0], sizes = [64, 8], strides = [1, 1]} : vector<64x64xf32> to vector<64x8xf32>
    %cst_138 = arith.constant 0.968656063 : f32
    %385 = vector.broadcast %cst_138 : f32 to vector<64x8xf32>
    %386 = arith.mulf %385, %343 : vector<64x8xf32>
    %cst_139 = arith.constant 0.0534305163 : f32
    %387 = vector.broadcast %cst_139 : f32 to vector<64x8xf32>
    %388 = arith.mulf %387, %384 : vector<64x8xf32>
    %389 = arith.subf %386, %388 : vector<64x8xf32>
    %cst_140 = arith.constant -0.967181324 : f32
    %cst_141 = arith.constant 0.967181324 : f32
    %390 = vector.broadcast %cst_140 : f32 to vector<64x8xf32>
    %391 = arith.maximumf %390, %389 : vector<64x8xf32>
    %392 = vector.broadcast %cst_141 : f32 to vector<64x8xf32>
    %393 = arith.minimumf %392, %391 : vector<64x8xf32>
    %cst_142 = arith.constant 0.0328186303 : f32
    %394 = vector.broadcast %cst_142 : f32 to vector<64x8xf32>
    %395 = arith.mulf %394, %343 : vector<64x8xf32>
    %396 = arith.addf %393, %395 : vector<64x8xf32>
    %cst_143 = arith.constant 0.00983478408 : f32
    %397 = vector.broadcast %cst_143 : f32 to vector<64x8xf32>
    %398 = arith.mulf %397, %346 : vector<64x8xf32>
    %399 = arith.addf %396, %398 : vector<64x8xf32>
    %c0_144 = arith.constant 0 : index
    %c0_145 = arith.constant 0 : index
    %c0_146 = arith.constant 0 : index
    %400 = vector.load %arg3[%c0_144, %c0_145, %c0_146] : memref<8x64x64xf32, #tpu.memory_space<vmem>>, vector<1x64x64xf32>
    %401 = vector.shape_cast %400 : vector<1x64x64xf32> to vector<64x64xf32>
    %402 = arith.truncf %399 : vector<64x8xf32> to vector<64x8xbf16>
    %cst_147 = arith.constant dense<0.000000e+00> : vector<64x64xf32>
    %403 = tpu.matmul %402, %3, %cst_147 {dimension_numbers = #tpu.dot_dimension_numbers<[1], [0], [0], [1], [0, 0, 1, 1], [], []>} : vector<64x8xbf16>, vector<8x64xbf16>, vector<64x64xf32> -> vector<64x64xf32>
    %404 = arith.addf %403, %401 : vector<64x64xf32>
    %cst_148 = arith.constant 2.000000e+01 : f32
    %405 = vector.broadcast %cst_148 : f32 to vector<64x64xf32>
    %406 = arith.minimumf %404, %405 : vector<64x64xf32>
    %407 = math.exp %406 : vector<64x64xf32>
    %cst_149 = arith.constant 1.000000e+00 : f32
    %408 = vector.broadcast %cst_149 : f32 to vector<64x64xf32>
    %409 = arith.addf %408, %407 : vector<64x64xf32>
    %410 = arith.mulf %409, %409 : vector<64x64xf32>
    %cst_150 = arith.constant 1.000000e+00 : f32
    %411 = vector.broadcast %cst_150 : f32 to vector<64x64xf32>
    %412 = arith.subf %410, %411 : vector<64x64xf32>
    %413 = arith.mulf %404, %412 : vector<64x64xf32>
    %cst_151 = arith.constant 1.000000e+00 : f32
    %414 = vector.broadcast %cst_151 : f32 to vector<64x64xf32>
    %415 = arith.addf %410, %414 : vector<64x64xf32>
    %416 = tpu.reciprocal %415 {approx = true} : vector<64x64xf32> -> vector<64x64xf32>
    %417 = arith.mulf %413, %416 : vector<64x64xf32>
    %418 = arith.truncf %417 : vector<64x64xf32> to vector<64x64xbf16>
    %cst_152 = arith.constant dense<0.000000e+00> : vector<64x64xf32>
    %419 = tpu.matmul %418, %1, %cst_152 {dimension_numbers = #tpu.dot_dimension_numbers<[1], [0], [0], [1], [0, 0, 1, 1], [], []>} : vector<64x64xbf16>, vector<64x64xbf16>, vector<64x64xf32> -> vector<64x64xf32>
    %420 = vector.broadcast %5 : vector<1x64xf32> to vector<64x64xf32>
    %421 = arith.addf %419, %420 : vector<64x64xf32>
    %cst_153 = arith.constant 2.000000e+01 : f32
    %422 = vector.broadcast %cst_153 : f32 to vector<64x64xf32>
    %423 = arith.minimumf %421, %422 : vector<64x64xf32>
    %424 = math.exp %423 : vector<64x64xf32>
    %cst_154 = arith.constant 1.000000e+00 : f32
    %425 = vector.broadcast %cst_154 : f32 to vector<64x64xf32>
    %426 = arith.addf %425, %424 : vector<64x64xf32>
    %427 = arith.mulf %426, %426 : vector<64x64xf32>
    %cst_155 = arith.constant 1.000000e+00 : f32
    %428 = vector.broadcast %cst_155 : f32 to vector<64x64xf32>
    %429 = arith.subf %427, %428 : vector<64x64xf32>
    %430 = arith.mulf %421, %429 : vector<64x64xf32>
    %cst_156 = arith.constant 1.000000e+00 : f32
    %431 = vector.broadcast %cst_156 : f32 to vector<64x64xf32>
    %432 = arith.addf %427, %431 : vector<64x64xf32>
    %433 = tpu.reciprocal %432 {approx = true} : vector<64x64xf32> -> vector<64x64xf32>
    %434 = arith.mulf %430, %433 : vector<64x64xf32>
    %435 = arith.truncf %434 : vector<64x64xf32> to vector<64x64xbf16>
    %cst_157 = arith.constant dense<0.000000e+00> : vector<64x64xf32>
    %436 = tpu.matmul %435, %2, %cst_157 {dimension_numbers = #tpu.dot_dimension_numbers<[1], [0], [0], [1], [0, 0, 1, 1], [], []>} : vector<64x64xbf16>, vector<64x64xbf16>, vector<64x64xf32> -> vector<64x64xf32>
    %437 = vector.broadcast %6 : vector<1x64xf32> to vector<64x64xf32>
    %438 = arith.addf %436, %437 : vector<64x64xf32>
    %439 = vector.extract_strided_slice %438 {offsets = [0, 0], sizes = [64, 8], strides = [1, 1]} : vector<64x64xf32> to vector<64x8xf32>
    %cst_158 = arith.constant 1.000050e+00 : f32
    %440 = vector.broadcast %cst_158 : f32 to vector<64x8xf32>
    %441 = arith.mulf %440, %399 : vector<64x8xf32>
    %cst_159 = arith.constant 1.000050e-02 : f32
    %442 = vector.broadcast %cst_159 : f32 to vector<64x8xf32>
    %443 = arith.mulf %442, %439 : vector<64x8xf32>
    %444 = arith.subf %441, %443 : vector<64x8xf32>
    %cst_160 = arith.constant -1.000000e+00 : f32
    %cst_161 = arith.constant 1.000000e+00 : f32
    %445 = vector.broadcast %cst_160 : f32 to vector<64x8xf32>
    %446 = arith.maximumf %445, %444 : vector<64x8xf32>
    %447 = vector.broadcast %cst_161 : f32 to vector<64x8xf32>
    %448 = arith.minimumf %447, %446 : vector<64x8xf32>
    %cst_162 = arith.constant 0.000000e+00 : f32
    %449 = vector.broadcast %cst_162 : f32 to vector<64x8xf32>
    %450 = arith.mulf %449, %399 : vector<64x8xf32>
    %451 = arith.addf %448, %450 : vector<64x8xf32>
    %cst_163 = arith.constant -1.000000e+00 : f32
    %cst_164 = arith.constant 1.000000e+00 : f32
    %452 = vector.broadcast %cst_163 : f32 to vector<64x8xf32>
    %453 = arith.maximumf %452, %451 : vector<64x8xf32>
    %454 = vector.broadcast %cst_164 : f32 to vector<64x8xf32>
    %455 = arith.minimumf %454, %453 : vector<64x8xf32>
    %c0_165 = arith.constant 0 : index
    %c0_166 = arith.constant 0 : index
    %456 = vector.load %arg6[%c0_165, %c0_166] : memref<64x8xf32, #tpu.memory_space<vmem>>, vector<64x8xf32>
    tpu.vector_store %arg6[%c0_165, %c0_166], %455 {strides = array<i32>} : memref<64x8xf32, #tpu.memory_space<vmem>>, vector<64x8xf32>,
    return
  }
  func.func @transform_0(%arg0: i32) -> (i32, i32) {
    %c0_i32 = arith.constant 0 : i32
    %c0_i32_0 = arith.constant 0 : i32
    return %arg0, %c0_i32 : i32, i32
  }
  func.func @transform_1(%arg0: i32) -> (i32, i32) {
    %c0_i32 = arith.constant 0 : i32
    %c0_i32_0 = arith.constant 0 : i32
    return %arg0, %c0_i32 : i32, i32
  }
  func.func @transform_2(%arg0: i32) -> (i32, i32, i32) {
    %c0_i32 = arith.constant 0 : i32
    %c0_i32_0 = arith.constant 0 : i32
    %c0_i32_1 = arith.constant 0 : i32
    return %c0_i32, %arg0, %c0_i32_0 : i32, i32, i32
  }
  func.func @transform_3(%arg0: i32) -> (i32, i32) {
    %c0_i32 = arith.constant 0 : i32
    %c0_i32_0 = arith.constant 0 : i32
    %c0_i32_1 = arith.constant 0 : i32
    return %c0_i32, %c0_i32_0 : i32, i32
  }
  func.func @transform_4(%arg0: i32) -> (i32, i32) {
    %c0_i32 = arith.constant 0 : i32
    %c0_i32_0 = arith.constant 0 : i32
    %c0_i32_1 = arith.constant 0 : i32
    return %c0_i32, %c0_i32_0 : i32, i32
  }
  func.func @transform_5(%arg0: i32) -> (i32, i32) {
    %c0_i32 = arith.constant 0 : i32
    %c0_i32_0 = arith.constant 0 : i32
    return %arg0, %c0_i32 : i32, i32
  }
}

</mosaic_0001>

<bundles_post_ra>
// kernel: guided_diffusion_forward.1
= control target key start
LH: loop header
LB: loop body
LE: loop exit
PB: predicated region body
PF: predicated region fallthrough
CT: control target
= control target key end

     0   :  { %vm81_vm0 = vcmask 1043456   ;;  %vm68_vm1 = vcmask 64512   ;;  %vm262_vm2 = vcmask 523264   ;;  %s5682_s24 = smov 72   ;;  %s5684_s10 = smov 88   ;;  %s7571_s3 = inlined_call_operand.vmem [shape: bf16[136,64], index: 3, kind: input, shape index: {}]   ;;  %s7572_s0 = inlined_call_operand.vmem [shape: f32[64,8], index: 0, kind: input, shape index: {}]   ;;  %s7573_s2 = inlined_call_operand.vmem [shape: f32[8,64,64], index: 2, kind: input, shape index: {}]   ;;  %s7574_s1 = inlined_call_operand.vmem [shape: f32[64,64], index: 1, kind: input, shape index: {}]   ;;  %s7575_s4 = inlined_call_operand.vmem [shape: f32[2,64], index: 4, kind: input, shape index: {}]   ;;  %s7576_s5 = inlined_call_operand.vmem [shape: f32[64,8], index: 5, kind: output, shape index: {}]  }
   0x1   :  { %v5722_v0 = vld [vmem:[%s7571_s3 + $0x40] sm:$0xf]  ;;  %v5732_v2 = vld [vmem:[%s7572_s0 + $0x8] sm:$0xff]  ;;  %v5745_v5 = vld [vmem:[%s7572_s0 + $0x10] sm:$0xff]  ;;  %s5685_s12 = smov 96   ;;  %s5686_s23 = smov 104  }
   0x2   :  { %v5727_v1 = vld [vmem:[%s7572_s0] sm:$0xff]  ;;  %5096 = vmatprep.subr.msk.bf16.mxu0 %vm81_vm0, %v5722_v0  ;;  %v5738_v3 = vsel %vm81_vm0, %v5722_v0, 0  ;;  %v5750_v6 = vld [vmem:[%s7572_s0 + $0x18] sm:$0xff]  ;;  %v5763_v9 = vld [vmem:[%s7572_s0 + $0x28] sm:$0xff]  ;;  %s5687_s25 = smov 112  }
   0x3   :  { %v64_v4 = vpack.c.bf16 %v5732_v2, %v5727_v1  ;;  %v5755_v7 = vld [vmem:[%s7572_s0 + $0x20] sm:$0xff]  ;;  %4753 = vmatpush3.bf16.msra.mxu0 %v5738_v3  ;;  %v65_v8 = vpack.c.bf16 %v5750_v6, %v5745_v5  ;;  %v5771_v11 = vld [vmem:[%s7572_s0 + $0x30] sm:$0xff]  ;;  %v5776_v12 = vld [vmem:[%s7572_s0 + $0x38] sm:$0xff] }
   0x4   :  { %v66_v10 = vpack.c.bf16 %v5763_v9, %v5755_v7  ;;  %v67_v13 = vpack.c.bf16 %v5776_v12, %v5771_v11  ;;  %v5786_v14 = vld [vmem:[%s7571_s3 + $0x18] sm:$0xff]   ;;  %v5793_v15 = vld [vmem:[%s7571_s3 + $0x10] sm:$0xff]   ;;  %v5800_v16 = vld [vmem:[%s7571_s3 + $0x8] sm:$0xff]  }
   0x5   :  { %4754 = vmatprep.mubr.msk.bf16.mxu0 %vm68_vm1, %v64_v4  ;;  %4762 = vmatprep.subr.bf16.mxu1 %v5786_v14  ;;  %v5807_v17 = vld [vmem:[%s7571_s3] sm:$0xff]   ;;  %v4226_v18 = vld [vmem:[%s7573_s2 + $0x1d0] sm:$0xff]  ;;  %v4227_v23 = vld [vmem:[%s7573_s2 + $0x1d8] sm:$0xff] }
   0x6   :  { %4755 = vmatmul.mubr.msk.bf16.vlgmr.msra.gmra.mxu0 %vm68_vm1, %v65_v8  ;;  %4763 = vmatpush3.bf16.msra.mxu1 %v5786_v14  ;;  %v4224_v20 = vld [vmem:[%s7573_s2 + $0x1c0] sm:$0xff]  ;;  %v4225_v27 = vld [vmem:[%s7573_s2 + $0x1c8] sm:$0xff]  ;;  %v4230_v32 = vld [vmem:[%s7573_s2 + $0x1f0] sm:$0xff] }
   0x7   :  { %4758 = vmatprep.mubr.msk.bf16.mxu0 %vm68_vm1, %v66_v10  ;;  %4764 = vmatprep.subr.bf16.mxu1 %v5793_v15  ;;  %v4228_v37 = vld [vmem:[%s7573_s2 + $0x1e0] sm:$0xff]  ;;  %v4231_v42 = vld [vmem:[%s7573_s2 + $0x1f8] sm:$0xff]  ;;  %v4229_v47 = vld [vmem:[%s7573_s2 + $0x1e8] sm:$0xff] }
   0xa   :  { %4765 = vmatpush3.bf16.msra.mxu1 %v5793_v15 }
   0xb   :  { %4766 = vmatprep.subr.bf16.mxu1 %v5800_v16 }
   0xe   :  { %4759 = vmatmul.mubr.msk.bf16.gmra.mxu0 %vm68_vm1, %v67_v13  ;;  %4767 = vmatpush3.bf16.msra.mxu1 %v5800_v16 }
   0xf   :  { %4768 = vmatprep.subr.bf16.mxu1 %v5807_v17 }
  0x12   :  { %4769 = vmatpush3.bf16.msra.mxu1 %v5807_v17 }
  0x13   :  { %5097 = vmatprep.subr.msk.bf16.mxu1 %vm81_vm0, %v5722_v0 }
  0xc6   :  { %v4756_v19 = vpop.f32.mrf.mxu0 }
  0xc7   :  { %v5819_v21 = vadd.f32 %v4756_v19, %v4226_v18 }
  0xc8   :  { %v119_v22 = vpop.f32.mrf.mxu0 }
  0xc9   :  { %v152_v24 = vmin.f32 %v5819_v21, 20.0  ;;  %v5825_v25 = vadd.f32 %v4224_v20, %v119_v22 }
  0xca   :  { %v4757_v26 = vpop.f32.mrf.mxu0 }
  0xcb   :  { %v162_v28 = vmul.f32 1.442695, %v152_v24  ;;  %v150_v29 = vmin.f32 %v5825_v25, 20.0  ;;  %v5831_v30 = vadd.f32 %v4757_v26, %v4227_v23 }
  0xcc   :  { %v122_v31 = vpop.f32.mrf.mxu0 }
  0xcd   :  { %5119 = vpow2.f32 %v162_v28  ;;  %v158_v33 = vmul.f32 1.442695, %v150_v29  ;;  %v153_v34 = vmin.f32 %v5831_v30, 20.0  ;;  %v5837_v35 = vadd.f32 %v4225_v27, %v122_v31 }
  0xce   :  { %v4760_v36 = vpop.f32.mrf.mxu0 }
  0xcf   :  { %5121 = vpow2.f32 %v158_v33  ;;  %v164_v38 = vmul.f32 1.442695, %v153_v34  ;;  %v151_v39 = vmin.f32 %v5837_v35, 20.0  ;;  %v5843_v40 = vadd.f32 %v4760_v36, %v4230_v32 }
  0xd0   :  { %v135_v41 = vpop.f32.mrf.mxu0 }
  0xd1   :  { %5123 = vpow2.f32 %v164_v38  ;;  %v160_v43 = vmul.f32 1.442695, %v151_v39  ;;  %v156_v44 = vmin.f32 %v5843_v40, 20.0  ;;  %v5849_v45 = vadd.f32 %v4228_v37, %v135_v41 }
  0xd2   :  { %v4761_v46 = vpop.f32.mrf.mxu0 }
  0xd3   :  { %5125 = vpow2.f32 %v160_v43  ;;  %v170_v48 = vmul.f32 1.442695, %v156_v44  ;;  %v154_v49 = vmin.f32 %v5849_v45, 20.0  ;;  %v5855_v50 = vadd.f32 %v4761_v46, %v4231_v42 }
  0xd4   :  { %v138_v51 = vpop.f32.mrf.mxu0 }
  0xd5   :  { %5127 = vpow2.f32 %v170_v48  ;;  %v166_v52 = vmul.f32 1.442695, %v154_v49  ;;  %v157_v53 = vmin.f32 %v5855_v50, 20.0  ;;  %v5858_v54 = vadd.f32 %v4229_v47, %v138_v51 }
  0xd7   :  { %5129 = vpow2.f32 %v166_v52  ;;  %v172_v55 = vmul.f32 1.442695, %v157_v53  ;;  %v155_v56 = vmin.f32 %v5858_v54, 20.0 }
  0xd9   :  { %5131 = vpow2.f32 %v172_v55  ;;  %v168_v57 = vmul.f32 1.442695, %v155_v56 }
  0xda   :  { %v5120_v58 = vpop.eup %5119 }
  0xdb   :  { %v176_v59 = vadd.f32 1.0, %v5120_v58  ;;  %5133 = vpow2.f32 %v168_v57 }
  0xdc   :  { %v5122_v60 = vpop.eup %5121 }
  0xdd   :  { %v174_v61 = vadd.f32 1.0, %v5122_v60  ;;  %v184_v63 = vmul.f32 %v176_v59, %v176_v59 }
  0xde   :  { %v5124_v62 = vpop.eup %5123 }
  0xdf   :  { %v182_v4 = vmul.f32 %v174_v61, %v174_v61  ;;  %v177_v8 = vadd.f32 1.0, %v5124_v62  ;;  %v208_v22 = vadd.f32 1.0, %v184_v63  ;;  %v4238_v49 = vadd.f32 -1.0, %v184_v63 }
  0xe0   :  { %v5126_v10 = vpop.eup %5125 }
  0xe1   :  { %v206_v13 = vadd.f32 1.0, %v182_v4  ;;  %v185_v19 = vmul.f32 %v177_v8, %v177_v8  ;;  %v175_v20 = vadd.f32 1.0, %v5126_v10  ;;  %v4236_v47 = vadd.f32 -1.0, %v182_v4 }
  0xe2   :  { %v5128_v18 = vpop.eup %5127  ;;  %v200_v59 = vmul.f32 %v4238_v49, %v5819_v21  ;;  %v5948_v49 = vld [vmem:[%s7574_s1 + $0x38] sm:$0xff] }
  0xe3   :  { %v180_v23 = vadd.f32 1.0, %v5128_v18  ;;  %v209_v26 = vadd.f32 1.0, %v185_v19  ;;  %v183_v27 = vmul.f32 %v175_v20, %v175_v20  ;;  %5135 = vrcp.f32 %v206_v13 }
  0xe4   :  { %v5130_v24 = vpop.eup %5129  ;;  %v4239_v46 = vadd.f32 -1.0, %v185_v19  ;;  %v198_v56 = vmul.f32 %v4236_v47, %v5825_v25 }
  0xe5   :  { %v178_v28 = vadd.f32 1.0, %v5130_v24  ;;  %5137 = vrcp.f32 %v209_v26  ;;  %v207_v31 = vadd.f32 1.0, %v183_v27  ;;  %v188_v32 = vmul.f32 %v180_v23, %v180_v23 }
  0xe6   :  { %v5132_v29 = vpop.eup %5131  ;;  %5139 = vrcp.f32 %v208_v22  ;;  %v4237_v48 = vadd.f32 -1.0, %v183_v27  ;;  %v201_v53 = vmul.f32 %v4239_v46, %v5831_v30 }
  0xe7   :  { %v186_v33 = vmul.f32 %v178_v28, %v178_v28  ;;  %v181_v34 = vadd.f32 1.0, %v5132_v29  ;;  %5141 = vrcp.f32 %v207_v31  ;;  %v212_v41 = vadd.f32 1.0, %v188_v32 }
  0xe8   :  { %v5134_v36 = vpop.eup %5133  ;;  %v199_v57 = vmul.f32 %v4237_v48, %v5837_v35  ;;  %v4242_v19 = vadd.f32 -1.0, %v188_v32  ;;  %v5943_v48 = vld [vmem:[%s7574_s1 + $0x30] sm:$0xff] }
  0xe9   :  { %v210_v37 = vadd.f32 1.0, %v186_v33  ;;  %v189_v38 = vmul.f32 %v181_v34, %v181_v34  ;;  %v179_v39 = vadd.f32 1.0, %v5134_v36  ;;  %v4240_v10 = vadd.f32 -1.0, %v186_v33  ;;  %v5907_v33 = vld [vmem:[%s7574_s1] sm:$0xff]  ;;  %v5912_v34 = vld [vmem:[%s7574_s1 + $0x10] sm:$0xff]  ;;  %v5917_v36 = vld [vmem:[%s7574_s1 + $0x8] sm:$0xff] }
  0xea   :  { %v204_v24 = vmul.f32 %v4242_v19, %v5843_v40  ;;  %v5885_v40 = vld [vmem:[%s7571_s3 + $0x30] sm:$0xff]  }
  0xeb   :  { %v213_v42 = vadd.f32 1.0, %v189_v38  ;;  %v187_v43 = vmul.f32 %v179_v39, %v179_v39  ;;  %5143 = vrcp.f32 %v210_v37  ;;  %v4243_v4 = vadd.f32 -1.0, %v189_v38  ;;  %v5924_v39 = vld [vmem:[%s7574_s1 + $0x18] sm:$0xff] }
  0xec   :  { %v202_v20 = vmul.f32 %v4240_v10, %v5849_v45  ;;  %v5877_v45 = vld [vmem:[%s7571_s3 + $0x38] sm:$0xff]   ;;  %v585_v37 = vmul.f32 0.12313012, %v5907_v33  ;;  %v587_v38 = vmul.f32 0.12313012, %v5912_v34 }
  0xed   :  { %5145 = vrcp.f32 %v213_v42  ;;  %v211_v44 = vadd.f32 1.0, %v187_v43  ;;  %v4241_v63 = vadd.f32 -1.0, %v187_v43  ;;  %v205_v35 = vmul.f32 %v4243_v4, %v5855_v50  ;;  %4778 = vmatprep.subr.bf16.mxu0 %v5877_v45  ;;  %v5892_v50 = vld [vmem:[%s7571_s3 + $0x28] sm:$0xff]   ;;  %v5931_v43 = vld [vmem:[%s7574_s1 + $0x20] sm:$0xff] }
  0xee   :  { %5147 = vrcp.f32 %v212_v41  ;;  %4779 = vmatpush3.bf16.msra.mxu0 %v5877_v45  ;;  %601 = vrot.lane.b32.xlu0 %v585_v37, %s5682_s24  ;;  %v586_v41 = vmul.f32 0.12313012, %v5917_v36  ;;  %v588_v42 = vmul.f32 0.12313012, %v5924_v39  ;;  %v589_v46 = vmul.f32 0.12313012, %v5931_v43 }
  0xef   :  { %5149 = vrcp.f32 %v211_v44  ;;  %v203_v22 = vmul.f32 %v4241_v63, %v5858_v54  ;;  %4780 = vmatprep.subr.bf16.mxu0 %v5885_v40  ;;  %v5899_v54 = vld [vmem:[%s7571_s3 + $0x20] sm:$0xff]   ;;  %605 = vrot.lane.b32.xlu1 %v587_v38, %s5682_s24  ;;  %v5936_v44 = vld [vmem:[%s7574_s1 + $0x28] sm:$0xff] }
  0xf0   :  { %v5136_v51 = vpop.eup %5135  ;;  %v590_v47 = vmul.f32 0.12313012, %v5936_v44 }
  0xf1   :  { %v222_v61 = vmul.f32 %v5136_v51, %v198_v56  ;;  %v591_v51 = vmul.f32 0.12313012, %v5943_v48 }
  0xf2   :  { %v5138_v52 = vpop.eup %5137  ;;  %4781 = vmatpush3.bf16.msra.mxu0 %v5885_v40  ;;  %603 = vrot.lane.b32.xlu0 %v586_v41, %s5682_s24 }
  0xf3   :  { %v5140_v55 = vpop.eup %5139  ;;  %v225_v60 = vmul.f32 %v5138_v52, %v201_v53  ;;  %4782 = vmatprep.subr.bf16.mxu0 %v5892_v50  ;;  %607 = vrot.lane.b32.xlu1 %v588_v42, %s5682_s24  ;;  %v592_v52 = vmul.f32 0.12313012, %v5948_v49  ;;  %v234_v53 = vlaneseq }
  0xf4   :  { %v5142_v58 = vpop.eup %5141  ;;  %v224_v8 = vmul.f32 %v5140_v55, %v200_v59 }
  0xf5   :  { %v223_v62 = vmul.f32 %v5142_v58, %v199_v57  ;;  %v5952_v55 = vshrl.u32 %v234_v53, 7  ;;  %v5958_v57 = vld [vmem:[%s7575_s4] sm:$0x3] }
  0xf6   :  { %v231_v18 = vpack.c.bf16 %v225_v60, %v224_v8  ;;  %4783 = vmatpush3.bf16.msra.mxu0 %v5892_v50  ;;  %609 = vrot.lane.b32.xlu0 %v589_v46, %s5682_s24 }
  0xf7   :  { %v230_v13 = vpack.c.bf16 %v223_v62, %v222_v61  ;;  %4784 = vmatprep.subr.bf16.mxu0 %v5899_v54  ;;  %611 = vrot.lane.b32.xlu1 %v590_v47, %s5682_s24  ;;  %v236_v56 = vsub.s32 0, %v5952_v55 }
  0xf8   :  { %v5144_v30 = vpop.eup %5143 }
  0xf9   :  { %4770 = vmatprep.mubr.msk.bf16.mxu1 %vm262_vm2, %v230_v13  ;;  %v226_v27 = vmul.f32 %v5144_v30, %v202_v20  ;;  %v5961_v58 = vrot.slane %v5958_v57, %v236_v56 }
  0xfa   :  { %v5146_v25 = vpop.eup %5145  ;;  %4771 = vmatmul.mubr.msk.bf16.vlgmr.msra.gmra.mxu1 %vm262_vm2, %v231_v18  ;;  %4785 = vmatpush3.bf16.msra.mxu0 %v5899_v54 }
  0xfb   :  { %v5148_v21 = vpop.eup %5147  ;;  %4795 = vmatpush3.bf16.msra.mxu1 %v5738_v3  ;;  %v229_v26 = vmul.f32 %v5146_v25, %v205_v35  ;;  %4804 = vmatprep.subr.bf16.mxu0 %v5786_v14 }
  0xfc   :  { %v5150_v23 = vpop.eup %5149  ;;  %v228_v29 = vmul.f32 %v5148_v21, %v204_v24  ;;  %4820 = vmatprep.subr.bf16.mxu1 %v5877_v45  ;;  %613 = vrot.lane.b32.xlu0 %v591_v51, %s5682_s24 }
  0xfd   :  { %v227_v28 = vmul.f32 %v5150_v23, %v203_v22  ;;  %615 = vrot.lane.b32.xlu1 %v592_v52, %s5682_s24  ;;  %s5683_s24 = smov 80  }
  0xfe   :  { %v233_v32 = vpack.c.bf16 %v229_v26, %v228_v29 }
  0xff   :  { %v232_v31 = vpack.c.bf16 %v227_v28, %v226_v27 }
 0x101   :  { %4774 = vmatprep.mubr.msk.bf16.mxu1 %vm262_vm2, %v232_v31 }
 0x102   :  { %4775 = vmatmul.mubr.msk.bf16.gmra.mxu1 %vm262_vm2, %v233_v32 }
 0x1ba   :  { %v4772_v59 = vpop.f32.mrf.mxu1 }
 0x1bb   :  { %v5964_v60 = vadd.f32 %v4772_v59, %v5961_v58 }
 0x1bc   :  { %v309_v61 = vpop.f32.mrf.mxu1 }
 0x1bd   :  { %v342_v62 = vmin.f32 %v5964_v60, 20.0  ;;  %v5968_v8 = vadd.f32 %v309_v61, %v5961_v58 }
 0x1be   :  { %v4773_v4 = vpop.f32.mrf.mxu1 }
 0x1bf   :  { %v352_v10 = vmul.f32 1.442695, %v342_v62  ;;  %v340_v63 = vmin.f32 %v5968_v8, 20.0  ;;  %v5972_v13 = vadd.f32 %v4773_v4, %v5961_v58 }
 0x1c0   :  { %v312_v18 = vpop.f32.mrf.mxu1 }
 0x1c1   :  { %5151 = vpow2.f32 %v352_v10  ;;  %v348_v19 = vmul.f32 1.442695, %v340_v63  ;;  %v343_v30 = vmin.f32 %v5972_v13, 20.0  ;;  %v5976_v25 = vadd.f32 %v312_v18, %v5961_v58 }
 0x1c2   :  { %v4776_v35 = vpop.f32.mrf.mxu1 }
 0x1c3   :  { %5153 = vpow2.f32 %v348_v19  ;;  %v354_v21 = vmul.f32 1.442695, %v343_v30  ;;  %v341_v20 = vmin.f32 %v5976_v25, 20.0  ;;  %v5980_v22 = vadd.f32 %v4776_v35, %v5961_v58 }
 0x1c4   :  { %v325_v23 = vpop.f32.mrf.mxu1 }
 0x1c5   :  { %5155 = vpow2.f32 %v354_v21  ;;  %v350_v24 = vmul.f32 1.442695, %v341_v20  ;;  %v346_v26 = vmin.f32 %v5980_v22, 20.0  ;;  %v5984_v27 = vadd.f32 %v325_v23, %v5961_v58 }
 0x1c6   :  { %v4777_v28 = vpop.f32.mrf.mxu1 }
 0x1c7   :  { %5157 = vpow2.f32 %v350_v24  ;;  %v360_v29 = vmul.f32 1.442695, %v346_v26  ;;  %v344_v31 = vmin.f32 %v5984_v27, 20.0  ;;  %v5988_v32 = vadd.f32 %v4777_v28, %v5961_v58 }
 0x1c8   :  { %v328_v37 = vpop.f32.mrf.mxu1 }
 0x1c9   :  { %5159 = vpow2.f32 %v360_v29  ;;  %v356_v38 = vmul.f32 1.442695, %v344_v31  ;;  %v347_v41 = vmin.f32 %v5988_v32, 20.0  ;;  %v5992_v42 = vadd.f32 %v328_v37, %v5961_v58 }
 0x1cb   :  { %5161 = vpow2.f32 %v356_v38  ;;  %v362_v46 = vmul.f32 1.442695, %v347_v41  ;;  %v345_v47 = vmin.f32 %v5992_v42, 20.0 }
 0x1cd   :  { %5163 = vpow2.f32 %v362_v46  ;;  %v358_v51 = vmul.f32 1.442695, %v345_v47 }
 0x1ce   :  { %v5152_v52 = vpop.eup %5151 }
 0x1cf   :  { %v366_v53 = vadd.f32 1.0, %v5152_v52  ;;  %5165 = vpow2.f32 %v358_v51 }
 0x1d0   :  { %v5154_v56 = vpop.eup %5153 }
 0x1d1   :  { %v364_v59 = vadd.f32 1.0, %v5154_v56  ;;  %v374_v62 = vmul.f32 %v366_v53, %v366_v53 }
 0x1d2   :  { %v5156_v61 = vpop.eup %5155 }
 0x1d3   :  { %v372_v4 = vmul.f32 %v364_v59, %v364_v59  ;;  %v367_v10 = vadd.f32 1.0, %v5156_v61  ;;  %v398_v21 = vadd.f32 1.0, %v374_v62 }
 0x1d4   :  { %v5158_v63 = vpop.eup %5157 }
 0x1d5   :  { %v396_v18 = vadd.f32 1.0, %v372_v4  ;;  %v375_v30 = vmul.f32 %v367_v10, %v367_v10  ;;  %v365_v35 = vadd.f32 1.0, %v5158_v63  ;;  %v4252_v63 = vadd.f32 -1.0, %v372_v4 }
 0x1d6   :  { %v5160_v19 = vpop.eup %5159 }
 0x1d7   :  { %v370_v20 = vadd.f32 1.0, %v5160_v19  ;;  %v399_v24 = vadd.f32 1.0, %v375_v30  ;;  %v373_v26 = vmul.f32 %v365_v35, %v365_v35  ;;  %5167 = vrcp.f32 %v396_v18 }
 0x1d8   :  { %v5162_v23 = vpop.eup %5161  ;;  %v4255_v10 = vadd.f32 -1.0, %v375_v30  ;;  %v4254_v19 = vadd.f32 -1.0, %v374_v62 }
 0x1d9   :  { %v368_v28 = vadd.f32 1.0, %v5162_v23  ;;  %5169 = vrcp.f32 %v399_v24  ;;  %v397_v31 = vadd.f32 1.0, %v373_v26  ;;  %v378_v37 = vmul.f32 %v370_v20, %v370_v20 }
 0x1da   :  { %v5164_v29 = vpop.eup %5163  ;;  %5171 = vrcp.f32 %v398_v21  ;;  %v4253_v18 = vadd.f32 -1.0, %v373_v26  ;;  %v391_v20 = vmul.f32 %v4255_v10, %v5972_v13  ;;  %v388_v24 = vmul.f32 %v4252_v63, %v5968_v8 }
 0x1db   :  { %v376_v38 = vmul.f32 %v368_v28, %v368_v28  ;;  %v371_v41 = vadd.f32 1.0, %v5164_v29  ;;  %5173 = vrcp.f32 %v397_v31  ;;  %v402_v53 = vadd.f32 1.0, %v378_v37 }
 0x1dc   :  { %v5166_v46 = vpop.eup %5165  ;;  %v389_v28 = vmul.f32 %v4253_v18, %v5976_v25  ;;  %v390_v31 = vmul.f32 %v4254_v19, %v5964_v60 }
 0x1dd   :  { %v400_v47 = vadd.f32 1.0, %v376_v38  ;;  %v379_v51 = vmul.f32 %v371_v41, %v371_v41  ;;  %v369_v52 = vadd.f32 1.0, %v5166_v46 }
 0x1df   :  { %v403_v56 = vadd.f32 1.0, %v379_v51  ;;  %v377_v59 = vmul.f32 %v369_v52, %v369_v52  ;;  %5175 = vrcp.f32 %v400_v47  ;;  %v4259_v4 = vadd.f32 -1.0, %v379_v51 }
 0x1e0   :  { %v4256_v52 = vadd.f32 -1.0, %v376_v38 }
 0x1e1   :  { %5177 = vrcp.f32 %v403_v56  ;;  %v401_v61 = vadd.f32 1.0, %v377_v59  ;;  %v4257_v62 = vadd.f32 -1.0, %v377_v59  ;;  %v4258_v56 = vadd.f32 -1.0, %v378_v37 }
 0x1e2   :  { %5179 = vrcp.f32 %v402_v53  ;;  %v395_v8 = vmul.f32 %v4259_v4, %v5988_v32  ;;  %v392_v60 = vmul.f32 %v4256_v52, %v5984_v27  ;;  %v569_v4 = vmul.f32 0.7504325, %v5727_v1 }
 0x1e3   :  { %5181 = vrcp.f32 %v401_v61  ;;  %v393_v10 = vmul.f32 %v4257_v62, %v5992_v42  ;;  %v394_v38 = vmul.f32 %v4258_v56, %v5980_v22  ;;  %v426_v22 = vsub.s32 1, %v5952_v55 }
 0x1e4   :  { %v5168_v35 = vpop.eup %5167  ;;  %v532_v55 = vmul.f32 0.25972006, %v5750_v6  ;;  %v571_v52 = vmul.f32 0.7504325, %v5745_v5 }
 0x1e5   :  { %v412_v46 = vmul.f32 %v5168_v35, %v388_v24  ;;  %v531_v35 = vmul.f32 0.25972006, %v5745_v5 }
 0x1e6   :  { %v5170_v21 = vpop.eup %5169 }
 0x1e7   :  { %v5172_v23 = vpop.eup %5171  ;;  %v415_v41 = vmul.f32 %v5170_v21, %v391_v20 }
 0x1e8   :  { %v5174_v29 = vpop.eup %5173  ;;  %v414_v47 = vmul.f32 %v5172_v23, %v390_v31  ;;  %v529_v23 = vmul.f32 0.25972006, %v5727_v1  ;;  %v570_v1 = vmul.f32 0.7504325, %v5732_v2 }
 0x1e9   :  { %v413_v30 = vmul.f32 %v5174_v29, %v389_v28 }
 0x1ea   :  { %v421_v53 = vpack.c.bf16 %v415_v41, %v414_v47  ;;  %v530_v47 = vmul.f32 0.25972006, %v5732_v2 }
 0x1eb   :  { %v420_v26 = vpack.c.bf16 %v413_v30, %v412_v46 }
 0x1ec   :  { %v5176_v61 = vpop.eup %5175 }
 0x1ed   :  { %4786 = vmatprep.mubr.msk.bf16.mxu0 %vm262_vm2, %v420_v26  ;;  %v416_v37 = vmul.f32 %v5176_v61, %v392_v60 }
 0x1ee   :  { %v5178_v13 = vpop.eup %5177  ;;  %4787 = vmatmul.mubr.msk.bf16.vlgmr.msra.gmra.mxu0 %vm262_vm2, %v421_v53 }
 0x1ef   :  { %v5180_v25 = vpop.eup %5179  ;;  %4805 = vmatpush3.bf16.msra.mxu0 %v5786_v14  ;;  %v419_v59 = vmul.f32 %v5178_v13, %v395_v8 }
 0x1f0   :  { %v5182_v51 = vpop.eup %5181  ;;  %4806 = vmatprep.subr.bf16.mxu0 %v5793_v15  ;;  %v418_v18 = vmul.f32 %v5180_v25, %v394_v38  ;;  %v535_v25 = vmul.f32 0.25972006, %v5771_v11 }
 0x1f1   :  { %v417_v63 = vmul.f32 %v5182_v51, %v393_v10  ;;  %v572_v10 = vmul.f32 0.7504325, %v5750_v6 }
 0x1f2   :  { %v423_v32 = vpack.c.bf16 %v419_v59, %v418_v18 }
 0x1f3   :  { %v422_v19 = vpack.c.bf16 %v417_v63, %v416_v37  ;;  %4807 = vmatpush3.bf16.msra.mxu0 %v5793_v15  ;;  %v6018_v15 = vrot.slane %v5958_v57, %v426_v22  ;;  %v602_v57 = vpop.permute.xlu0 %601  ;;  %v533_v63 = vmul.f32 0.25972006, %v5755_v7 }
 0x1f4   :  { %4808 = vmatprep.subr.bf16.mxu0 %v5800_v16 }
 0x1f5   :  { %4790 = vmatprep.mubr.msk.bf16.mxu0 %vm262_vm2, %v422_v19 }
 0x1f6   :  { %4791 = vmatmul.mubr.msk.bf16.gmra.mxu0 %vm262_vm2, %v423_v32 }
 0x1f7   :  { %4809 = vmatpush3.bf16.msra.mxu0 %v5800_v16  ;;  %v604_v37 = vpop.permute.xlu0 %603 }
 0x1f8   :  { %4810 = vmatprep.subr.bf16.mxu0 %v5807_v17 }
 0x1fb   :  { %4811 = vmatpush3.bf16.msra.mxu0 %v5807_v17  ;;  %v606_v17 = vpop.permute.xlu1 %605 }
 0x1fc   :  { %5098 = vmatprep.subr.msk.bf16.mxu0 %vm81_vm0, %v5722_v0 }
 0x1ff   :  { %v608_v13 = vpop.permute.xlu1 %607 }
 0x2ae   :  { %v4788_v27 = vpop.f32.mrf.mxu0 }
 0x2af   :  { %v507_v42 = vadd.f32 %v4788_v27, %v6018_v15  ;;  %v536_v27 = vmul.f32 0.25972006, %v5776_v12 }
 0x2b0   :  { %v498_v21 = vpop.f32.mrf.mxu0 }
 0x2b1   :  { %v539_v20 = vmul.f32 0.07243713, %v507_v42  ;;  %v499_v16 = vadd.f32 %v498_v21, %v6018_v15 }
 0x2b2   :  { %v4789_v24 = vpop.f32.mrf.mxu0 }
 0x2b3   :  { %v537_v28 = vmul.f32 0.07243713, %v499_v16  ;;  %v510_v0 = vadd.f32 %v4789_v24, %v6018_v15  ;;  %v547_v29 = vsub.f32 %v531_v35, %v539_v20  ;;  %v534_v24 = vmul.f32 0.25972006, %v5763_v9 }
 0x2b4   :  { %v501_v31 = vpop.f32.mrf.mxu0 }
 0x2b5   :  { %v545_v41 = vsub.f32 %v529_v23, %v537_v28  ;;  %v540_v46 = vmul.f32 0.07243713, %v510_v0  ;;  %v502_v30 = vadd.f32 %v501_v31, %v6018_v15  ;;  %v4270_v8 = vclamps-f32 %v547_v29, 0.24941406  ;;  %v612_v28 = vpop.permute.xlu1 %611 }
 0x2b6   :  { %v4792_v26 = vpop.f32.mrf.mxu0  ;;  %v573_v29 = vmul.f32 0.7504325, %v5755_v7  ;;  %v576_v31 = vmul.f32 0.7504325, %v5776_v12  ;;  %v574_v12 = vmul.f32 0.7504325, %v5763_v9 }
 0x2b7   :  { %v4268_v62 = vclamps-f32 %v545_v41, 0.24941406  ;;  %v548_v53 = vsub.f32 %v532_v55, %v540_v46  ;;  %v538_v56 = vmul.f32 0.07243713, %v502_v30  ;;  %v523_v61 = vadd.f32 %v4792_v26, %v6018_v15 }
 0x2b8   :  { %v514_v60 = vpop.f32.mrf.mxu0  ;;  %v579_v35 = vadd.f32 %v4270_v8, %v571_v52 }
 0x2b9   :  { %v4271_v51 = vclamps-f32 %v548_v53, 0.24941406  ;;  %v546_v38 = vsub.f32 %v530_v47, %v538_v56  ;;  %v543_v59 = vmul.f32 0.07243713, %v523_v61  ;;  %v515_v5 = vadd.f32 %v514_v60, %v6018_v15  ;;  %v610_v47 = vpop.permute.xlu0 %609 }
 0x2ba   :  { %v4793_v18 = vpop.f32.mrf.mxu0  ;;  %v577_v19 = vadd.f32 %v4268_v62, %v569_v4  ;;  %v6048_v52 = vadd.f32 %v606_v17, %v579_v35  ;;  %v575_v53 = vmul.f32 0.7504325, %v5771_v11 }
 0x2bb   :  { %v4269_v32 = vclamps-f32 %v546_v38, 0.24941406  ;;  %v526_v22 = vadd.f32 %v4793_v18, %v6018_v15  ;;  %v551_v42 = vsub.f32 %v535_v25, %v543_v59  ;;  %v541_v6 = vmul.f32 0.07243713, %v515_v5  ;;  %v616_v25 = vpop.permute.xlu1 %615 }
 0x2bc   :  { %v580_v21 = vadd.f32 %v4271_v51, %v572_v10  ;;  %v517_v20 = vpop.f32.mrf.mxu0  ;;  %v6044_v41 = vadd.f32 %v602_v57, %v577_v19 }
 0x2bd   :  { %v578_v16 = vadd.f32 %v4269_v32, %v570_v1  ;;  %v544_v23 = vmul.f32 0.07243713, %v526_v22  ;;  %v518_v2 = vadd.f32 %v517_v20, %v6018_v15  ;;  %v549_v0 = vsub.f32 %v533_v63, %v541_v6  ;;  %v614_v10 = vpop.permute.xlu0 %613  ;;  %v4276_v63 = vld [vmem:[%s7573_s2 + $0x180] sm:$0xff]  ;;  %v4277_v22 = vld [vmem:[%s7573_s2 + $0x188] sm:$0xff] }
 0x2be   :  { %v6040_v55 = vadd.f32 %v608_v13, %v580_v21  ;;  %v4274_v26 = vclamps-f32 %v551_v42, 0.24941406  ;;  %v4282_v21 = vld [vmem:[%s7573_s2 + $0x1b0] sm:$0xff] }
 0x2bf   :  { %v6046_v46 = vadd.f32 %v604_v37, %v578_v16  ;;  %v552_v30 = vsub.f32 %v536_v27, %v544_v23  ;;  %v542_v4 = vmul.f32 0.07243713, %v518_v2  ;;  %v4272_v62 = vclamps-f32 %v549_v0, 0.24941406 }
 0x2c0   :  { %v643_v57 = vpack.c.bf16 %v6040_v55, %v6048_v52  ;;  %v583_v60 = vadd.f32 %v4274_v26, %v575_v53  ;;  %v4281_v53 = vld [vmem:[%s7573_s2 + $0x1a8] sm:$0xff] }
 0x2c1   :  { %v642_v56 = vpack.c.bf16 %v6046_v46, %v6044_v41  ;;  %v4275_v61 = vclamps-f32 %v552_v30, 0.24941406  ;;  %v550_v7 = vsub.f32 %v534_v24, %v542_v4  ;;  %v581_v13 = vadd.f32 %v4272_v62, %v573_v29  ;;  %v4280_v24 = vld [vmem:[%s7573_s2 + $0x1a0] sm:$0xff]  ;;  %v4283_v30 = vld [vmem:[%s7573_s2 + $0x1b8] sm:$0xff] }
 0x2c2   :  { %v6066_v59 = vadd.f32 %v614_v10, %v583_v60 }
 0x2c3   :  { %v4273_v8 = vclamps-f32 %v550_v7, 0.24941406  ;;  %4796 = vmatprep.mubr.msk.bf16.mxu1 %vm68_vm1, %v642_v56  ;;  %v584_v17 = vadd.f32 %v4275_v61, %v576_v31  ;;  %v6062_v9 = vadd.f32 %v610_v47, %v581_v13 }
 0x2c4   :  { %4797 = vmatmul.mubr.msk.bf16.vlgmr.msra.gmra.mxu1 %vm68_vm1, %v643_v57 }
 0x2c5   :  { %v582_v11 = vadd.f32 %v4273_v8, %v574_v12  ;;  %4821 = vmatpush3.bf16.msra.mxu1 %v5877_v45  ;;  %v6059_v51 = vadd.f32 %v616_v25, %v584_v17 }
 0x2c6   :  { %4822 = vmatprep.subr.bf16.mxu1 %v5885_v40 }
 0x2c7   :  { %v6064_v38 = vadd.f32 %v612_v28, %v582_v11  ;;  %v645_v1 = vpack.c.bf16 %v6059_v51, %v6066_v59 }
 0x2c9   :  { %v644_v37 = vpack.c.bf16 %v6064_v38, %v6062_v9  ;;  %4823 = vmatpush3.bf16.msra.mxu1 %v5885_v40  ;;  %v4278_v40 = vld [vmem:[%s7573_s2 + $0x190] sm:$0xff] }
 0x2ca   :  { %4824 = vmatprep.subr.bf16.mxu1 %v5892_v50 }
 0x2cb   :  { %4800 = vmatprep.mubr.msk.bf16.mxu1 %vm68_vm1, %v644_v37 }
 0x2cc   :  { %4801 = vmatmul.mubr.msk.bf16.gmra.mxu1 %vm68_vm1, %v645_v1 }
 0x2cd   :  { %4825 = vmatpush3.bf16.msra.mxu1 %v5892_v50  ;;  %v4279_v50 = vld [vmem:[%s7573_s2 + $0x198] sm:$0xff] }
 0x2ce   :  { %4826 = vmatprep.subr.bf16.mxu1 %v5899_v54 }
 0x2d1   :  { %4827 = vmatpush3.bf16.msra.mxu1 %v5899_v54 }
 0x2d2   :  { %4846 = vmatprep.subr.bf16.mxu1 %v5786_v14 }
 0x384   :  { %v4798_v5 = vpop.f32.mrf.mxu1 }
 0x385   :  { %v6086_v18 = vadd.f32 %v4798_v5, %v4278_v40 }
 0x386   :  { %v692_v19 = vpop.f32.mrf.mxu1 }
 0x387   :  { %v725_v54 = vmin.f32 %v6086_v18, 20.0  ;;  %v6092_v32 = vadd.f32 %v4276_v63, %v692_v19 }
 0x388   :  { %v4799_v14 = vpop.f32.mrf.mxu1 }
 0x389   :  { %v735_v27 = vmul.f32 1.442695, %v725_v54  ;;  %v723_v42 = vmin.f32 %v6092_v32, 20.0  ;;  %v6098_v35 = vadd.f32 %v4799_v14, %v4279_v50 }
 0x38a   :  { %v695_v6 = vpop.f32.mrf.mxu1 }
 0x38b   :  { %5183 = vpow2.f32 %v735_v27  ;;  %v731_v20 = vmul.f32 1.442695, %v723_v42  ;;  %v726_v16 = vmin.f32 %v6098_v35, 20.0  ;;  %v6104_v23 = vadd.f32 %v4277_v22, %v695_v6 }
 0x38c   :  { %v4802_v2 = vpop.f32.mrf.mxu1 }
 0x38d   :  { %5185 = vpow2.f32 %v731_v20  ;;  %v737_v28 = vmul.f32 1.442695, %v726_v16  ;;  %v724_v0 = vmin.f32 %v6104_v23, 20.0  ;;  %v6110_v29 = vadd.f32 %v4802_v2, %v4282_v21 }
 0x38e   :  { %v708_v31 = vpop.f32.mrf.mxu1 }
 0x38f   :  { %5187 = vpow2.f32 %v737_v28  ;;  %v733_v47 = vmul.f32 1.442695, %v724_v0  ;;  %v729_v4 = vmin.f32 %v6110_v29, 20.0  ;;  %v6116_v26 = vadd.f32 %v4280_v24, %v708_v31 }
 0x390   :  { %v4803_v62 = vpop.f32.mrf.mxu1 }
 0x391   :  { %5189 = vpow2.f32 %v733_v47  ;;  %v743_v56 = vmul.f32 1.442695, %v729_v4  ;;  %v727_v61 = vmin.f32 %v6116_v26, 20.0  ;;  %v6122_v7 = vadd.f32 %v4803_v62, %v4283_v30 }
 0x392   :  { %v711_v12 = vpop.f32.mrf.mxu1 }
 0x393   :  { %5191 = vpow2.f32 %v743_v56  ;;  %v739_v57 = vmul.f32 1.442695, %v727_v61  ;;  %v730_v13 = vmin.f32 %v6122_v7, 20.0  ;;  %v6125_v8 = vadd.f32 %v4281_v53, %v711_v12 }
 0x395   :  { %5193 = vpow2.f32 %v739_v57  ;;  %v745_v25 = vmul.f32 1.442695, %v730_v13  ;;  %v728_v17 = vmin.f32 %v6125_v8, 20.0 }
 0x397   :  { %5195 = vpow2.f32 %v745_v25  ;;  %v741_v60 = vmul.f32 1.442695, %v728_v17 }
 0x398   :  { %v5184_v11 = vpop.eup %5183 }
 0x399   :  { %v749_v10 = vadd.f32 1.0, %v5184_v11  ;;  %5197 = vpow2.f32 %v741_v60 }
 0x39a   :  { %v5186_v37 = vpop.eup %5185 }
 0x39b   :  { %v747_v1 = vadd.f32 1.0, %v5186_v37  ;;  %v757_v5 = vmul.f32 %v749_v10, %v749_v10 }
 0x39c   :  { %v5188_v40 = vpop.eup %5187 }
 0x39d   :  { %v755_v63 = vmul.f32 %v747_v1, %v747_v1  ;;  %v750_v19 = vadd.f32 1.0, %v5188_v40  ;;  %v781_v42 = vadd.f32 1.0, %v757_v5  ;;  %v4290_v60 = vadd.f32 -1.0, %v757_v5 }
 0x39e   :  { %v5190_v50 = vpop.eup %5189 }
 0x39f   :  { %v779_v54 = vadd.f32 1.0, %v755_v63  ;;  %v758_v22 = vmul.f32 %v750_v19, %v750_v19  ;;  %v748_v27 = vadd.f32 1.0, %v5190_v50  ;;  %v4288_v25 = vadd.f32 -1.0, %v755_v63 }
 0x3a0   :  { %v5192_v14 = vpop.eup %5191 }
 0x3a1   :  { %v753_v6 = vadd.f32 1.0, %v5192_v14  ;;  %v782_v20 = vadd.f32 1.0, %v758_v22  ;;  %v756_v16 = vmul.f32 %v748_v27, %v748_v27  ;;  %5199 = vrcp.f32 %v779_v54 }
 0x3a2   :  { %v5194_v21 = vpop.eup %5193  ;;  %v4291_v13 = vadd.f32 -1.0, %v758_v22  ;;  %v771_v40 = vmul.f32 %v4288_v25, %v6092_v32  ;;  %v773_v54 = vmul.f32 %v4290_v60, %v6086_v18 }
 0x3a3   :  { %v751_v2 = vadd.f32 1.0, %v5194_v21  ;;  %5201 = vrcp.f32 %v782_v20  ;;  %v780_v28 = vadd.f32 1.0, %v756_v16  ;;  %v761_v0 = vmul.f32 %v753_v6, %v753_v6 }
 0x3a4   :  { %v5196_v24 = vpop.eup %5195  ;;  %5203 = vrcp.f32 %v781_v42  ;;  %v4289_v17 = vadd.f32 -1.0, %v756_v16  ;;  %v774_v37 = vmul.f32 %v4291_v13, %v6098_v35 }
 0x3a5   :  { %v759_v31 = vmul.f32 %v751_v2, %v751_v2  ;;  %v754_v30 = vadd.f32 1.0, %v5196_v24  ;;  %5205 = vrcp.f32 %v780_v28  ;;  %v785_v56 = vadd.f32 1.0, %v761_v0 }
 0x3a6   :  { %v5198_v47 = vpop.eup %5197  ;;  %v772_v19 = vmul.f32 %v4289_v17, %v6104_v23  ;;  %v4294_v16 = vadd.f32 -1.0, %v761_v0 }
 0x3a7   :  { %v783_v4 = vadd.f32 1.0, %v759_v31  ;;  %v762_v62 = vmul.f32 %v754_v30, %v754_v30  ;;  %v752_v53 = vadd.f32 1.0, %v5198_v47  ;;  %v4292_v21 = vadd.f32 -1.0, %v759_v31 }
 0x3a8   :  { %v777_v31 = vmul.f32 %v4294_v16, %v6110_v29  ;;  %v1103_v29 = vmul.f32 0.11125396, %v5912_v34 }
 0x3a9   :  { %v786_v61 = vadd.f32 1.0, %v762_v62  ;;  %v760_v12 = vmul.f32 %v752_v53, %v752_v53  ;;  %5207 = vrcp.f32 %v783_v4  ;;  %v4295_v63 = vadd.f32 -1.0, %v762_v62 }
 0x3aa   :  { %v775_v18 = vmul.f32 %v4292_v21, %v6116_v26  ;;  %v1101_v26 = vmul.f32 0.11125396, %v5907_v33  ;;  %v1105_v53 = vmul.f32 0.11125396, %v5931_v43  ;;  %v1108_v33 = vmul.f32 0.11125396, %v5948_v49 }
 0x3ab   :  { %5209 = vrcp.f32 %v786_v61  ;;  %v784_v57 = vadd.f32 1.0, %v760_v12  ;;  %v4293_v5 = vadd.f32 -1.0, %v760_v12  ;;  %v778_v32 = vmul.f32 %v4295_v63, %v6122_v7 }
 0x3ac   :  { %5211 = vrcp.f32 %v785_v56  ;;  %1117 = vrot.lane.b32.xlu0 %v1101_v26, %s5683_s24  ;;  %v1106_v56 = vmul.f32 0.11125396, %v5936_v44  ;;  %v1107_v61 = vmul.f32 0.11125396, %v5943_v48 }
 0x3ad   :  { %5213 = vrcp.f32 %v784_v57  ;;  %v776_v24 = vmul.f32 %v4293_v5, %v6125_v8  ;;  %v1102_v8 = vmul.f32 0.11125396, %v5917_v36 }
 0x3ae   :  { %v5200_v11 = vpop.eup %5199 }
 0x3af   :  { %v795_v27 = vmul.f32 %v5200_v11, %v771_v40  ;;  %1119 = vrot.lane.b32.xlu1 %v1102_v8, %s5683_s24 }
 0x3b0   :  { %v5202_v10 = vpop.eup %5201  ;;  %1121 = vrot.lane.b32.xlu0 %v1103_v29, %s5683_s24 }
 0x3b1   :  { %v5204_v1 = vpop.eup %5203  ;;  %v798_v14 = vmul.f32 %v5202_v10, %v774_v37 }
 0x3b2   :  { %v5206_v50 = vpop.eup %5205  ;;  %v797_v42 = vmul.f32 %v5204_v1, %v773_v54 }
 0x3b3   :  { %v796_v22 = vmul.f32 %v5206_v50, %v772_v19 }
 0x3b4   :  { %v804_v20 = vpack.c.bf16 %v798_v14, %v797_v42  ;;  %1125 = vrot.lane.b32.xlu0 %v1105_v53, %s5683_s24 }
 0x3b5   :  { %v803_v6 = vpack.c.bf16 %v796_v22, %v795_v27 }
 0x3b6   :  { %v5208_v2 = vpop.eup %5207 }
 0x3b7   :  { %4812 = vmatprep.mubr.msk.bf16.mxu0 %vm262_vm2, %v803_v6  ;;  %v799_v0 = vmul.f32 %v5208_v2, %v775_v18 }
 0x3b8   :  { %v5210_v35 = vpop.eup %5209  ;;  %4813 = vmatmul.mubr.msk.bf16.vlgmr.msra.gmra.mxu0 %vm262_vm2, %v804_v20  ;;  %1129 = vrot.lane.b32.xlu0 %v1107_v61, %s5683_s24 }
 0x3b9   :  { %v5212_v23 = vpop.eup %5211  ;;  %4837 = vmatpush3.bf16.msra.mxu0 %v5738_v3  ;;  %v802_v30 = vmul.f32 %v5210_v35, %v778_v32 }
 0x3ba   :  { %v5214_v28 = vpop.eup %5213  ;;  %4862 = vmatprep.subr.bf16.mxu0 %v5877_v45  ;;  %v801_v4 = vmul.f32 %v5212_v23, %v777_v31  ;;  %v1104_v45 = vmul.f32 0.11125396, %v5924_v39 }
 0x3bb   :  { %v800_v47 = vmul.f32 %v5214_v28, %v776_v24 }
 0x3bc   :  { %v806_v7 = vpack.c.bf16 %v802_v30, %v801_v4  ;;  %1123 = vrot.lane.b32.xlu1 %v1104_v45, %s5683_s24 }
 0x3bd   :  { %v805_v62 = vpack.c.bf16 %v800_v47, %v799_v0 }
 0x3bf   :  { %4816 = vmatprep.mubr.msk.bf16.mxu0 %vm262_vm2, %v805_v62 }
 0x3c0   :  { %4817 = vmatmul.mubr.msk.bf16.gmra.mxu0 %vm262_vm2, %v806_v7  ;;  %1127 = vrot.lane.b32.xlu1 %v1106_v56, %s5683_s24 }
 0x3c4   :  { %1131 = vrot.lane.b32.xlu1 %v1108_v33, %s5683_s24 }
 0x478   :  { %v4814_v36 = vpop.f32.mrf.mxu0 }
 0x479   :  { %v6151_v12 = vadd.f32 %v4814_v36, %v5961_v58 }
 0x47a   :  { %v853_v34 = vpop.f32.mrf.mxu0 }
 0x47b   :  { %v886_v39 = vmin.f32 %v6151_v12, 20.0  ;;  %v6155_v57 = vadd.f32 %v853_v34, %v5961_v58 }
 0x47c   :  { %v4815_v43 = vpop.f32.mrf.mxu0 }
 0x47d   :  { %v896_v44 = vmul.f32 1.442695, %v886_v39  ;;  %v884_v13 = vmin.f32 %v6155_v57, 20.0  ;;  %v6159_v48 = vadd.f32 %v4815_v43, %v5961_v58 }
 0x47e   :  { %v856_v49 = vpop.f32.mrf.mxu0 }
 0x47f   :  { %5215 = vpow2.f32 %v896_v44  ;;  %v892_v25 = vmul.f32 1.442695, %v884_v13  ;;  %v887_v17 = vmin.f32 %v6159_v48, 20.0  ;;  %v6163_v60 = vadd.f32 %v856_v49, %v5961_v58 }
 0x480   :  { %v4818_v11 = vpop.f32.mrf.mxu0 }
 0x481   :  { %5217 = vpow2.f32 %v892_v25  ;;  %v898_v10 = vmul.f32 1.442695, %v887_v17  ;;  %v885_v37 = vmin.f32 %v6163_v60, 20.0  ;;  %v6167_v1 = vadd.f32 %v4818_v11, %v5961_v58 }
 0x482   :  { %v869_v40 = vpop.f32.mrf.mxu0 }
 0x483   :  { %5219 = vpow2.f32 %v898_v10  ;;  %v894_v19 = vmul.f32 1.442695, %v885_v37  ;;  %v890_v50 = vmin.f32 %v6167_v1, 20.0  ;;  %v6171_v54 = vadd.f32 %v869_v40, %v5961_v58 }
 0x484   :  { %v4819_v14 = vpop.f32.mrf.mxu0 }
 0x485   :  { %5221 = vpow2.f32 %v894_v19  ;;  %v904_v27 = vmul.f32 1.442695, %v890_v50  ;;  %v888_v22 = vmin.f32 %v6171_v54, 20.0  ;;  %v6175_v42 = vadd.f32 %v4819_v14, %v5961_v58 }
 0x486   :  { %v872_v63 = vpop.f32.mrf.mxu0 }
 0x487   :  { %5223 = vpow2.f32 %v904_v27  ;;  %v900_v6 = vmul.f32 1.442695, %v888_v22  ;;  %v891_v21 = vmin.f32 %v6175_v42, 20.0  ;;  %v6179_v5 = vadd.f32 %v872_v63, %v5961_v58 }
 0x489   :  { %5225 = vpow2.f32 %v900_v6  ;;  %v906_v20 = vmul.f32 1.442695, %v891_v21  ;;  %v889_v16 = vmin.f32 %v6179_v5, 20.0 }
 0x48b   :  { %5227 = vpow2.f32 %v906_v20  ;;  %v902_v2 = vmul.f32 1.442695, %v889_v16 }
 0x48c   :  { %v5216_v35 = vpop.eup %5215 }
 0x48d   :  { %v910_v32 = vadd.f32 1.0, %v5216_v35  ;;  %5229 = vpow2.f32 %v902_v2 }
 0x48e   :  { %v5218_v23 = vpop.eup %5217 }
 0x48f   :  { %v908_v18 = vadd.f32 1.0, %v5218_v23  ;;  %v918_v28 = vmul.f32 %v910_v32, %v910_v32 }
 0x490   :  { %v5220_v24 = vpop.eup %5219 }
 0x491   :  { %v916_v31 = vmul.f32 %v908_v18, %v908_v18  ;;  %v911_v30 = vadd.f32 1.0, %v5220_v24  ;;  %v942_v26 = vadd.f32 1.0, %v918_v28  ;;  %v4302_v50 = vadd.f32 -1.0, %v918_v28 }
 0x492   :  { %v5222_v0 = vpop.eup %5221 }
 0x493   :  { %v940_v47 = vadd.f32 1.0, %v916_v31  ;;  %v919_v62 = vmul.f32 %v911_v30, %v911_v30  ;;  %v909_v7 = vadd.f32 1.0, %v5222_v0  ;;  %v4300_v40 = vadd.f32 -1.0, %v916_v31 }
 0x494   :  { %v5224_v4 = vpop.eup %5223  ;;  %v934_v16 = vmul.f32 %v4302_v50, %v6151_v12  ;;  %v1048_v50 = vmul.f32 0.2934897, %v6040_v55 }
 0x495   :  { %v914_v8 = vadd.f32 1.0, %v5224_v4  ;;  %v943_v45 = vadd.f32 1.0, %v919_v62  ;;  %v917_v53 = vmul.f32 %v909_v7, %v909_v7  ;;  %5231 = vrcp.f32 %v940_v47 }
 0x496   :  { %v5226_v29 = vpop.eup %5225  ;;  %v4303_v37 = vadd.f32 -1.0, %v919_v62  ;;  %v932_v6 = vmul.f32 %v4300_v40, %v6155_v57  ;;  %v6194_v62 = vld [vmem:[%s7571_s3 + $0x18] sm:$0xff]  }
 0x497   :  { %v912_v56 = vadd.f32 1.0, %v5226_v29  ;;  %5233 = vrcp.f32 %v943_v45  ;;  %v941_v33 = vadd.f32 1.0, %v917_v53  ;;  %v922_v36 = vmul.f32 %v914_v8, %v914_v8 }
 0x498   :  { %v5228_v61 = vpop.eup %5227  ;;  %5235 = vrcp.f32 %v942_v26  ;;  %v4301_v19 = vadd.f32 -1.0, %v917_v53  ;;  %v935_v22 = vmul.f32 %v4303_v37, %v6159_v48 }
 0x499   :  { %v920_v34 = vmul.f32 %v912_v56, %v912_v56  ;;  %v915_v39 = vadd.f32 1.0, %v5228_v61  ;;  %5237 = vrcp.f32 %v941_v33  ;;  %v946_v25 = vadd.f32 1.0, %v922_v36  ;;  %v6208_v56 = vld [vmem:[%s7571_s3 + $0x8] sm:$0xff]   ;;  %v6224_v61 = vld [vmem:[%s7571_s3 + $0x40] sm:$0xf] }
 0x49a   :  { %v5230_v43 = vpop.eup %5229  ;;  %v933_v21 = vmul.f32 %v4301_v19, %v6163_v60  ;;  %v4306_v0 = vadd.f32 -1.0, %v922_v36 }
 0x49b   :  { %v944_v44 = vadd.f32 1.0, %v920_v34  ;;  %v923_v13 = vmul.f32 %v915_v39, %v915_v39  ;;  %v913_v49 = vadd.f32 1.0, %v5230_v43  ;;  %v4304_v31 = vadd.f32 -1.0, %v920_v34  ;;  %v1118_v34 = vpop.permute.xlu0 %1117  ;;  %v1120_v43 = vpop.permute.xlu1 %1119 }
 0x49c   :  { %v938_v26 = vmul.f32 %v4306_v0, %v6167_v1  ;;  %v6217_v1 = vld [vmem:[%s7571_s3] sm:$0xff]   ;;  %v1051_v0 = vmul.f32 0.2934897, %v6066_v59 }
 0x49d   :  { %v947_v17 = vadd.f32 1.0, %v923_v13  ;;  %v921_v11 = vmul.f32 %v913_v49, %v913_v49  ;;  %5239 = vrcp.f32 %v944_v44  ;;  %v4307_v18 = vadd.f32 -1.0, %v923_v13 }
 0x49e   :  { %v936_v12 = vmul.f32 %v4304_v31, %v6171_v54  ;;  %v1047_v44 = vmul.f32 0.2934897, %v6048_v52  ;;  %v1088_v31 = vmul.f32 0.71520084, %v6040_v55  ;;  %v1049_v55 = vmul.f32 0.2934897, %v6062_v9 }
 0x49f   :  { %5241 = vrcp.f32 %v947_v17  ;;  %v945_v10 = vadd.f32 1.0, %v921_v11  ;;  %v4305_v28 = vadd.f32 -1.0, %v921_v11  ;;  %v939_v57 = vmul.f32 %v4307_v18, %v6175_v42  ;;  %v6201_v42 = vld [vmem:[%s7571_s3 + $0x10] sm:$0xff]  }
 0x4a0   :  { %5243 = vrcp.f32 %v946_v25  ;;  %v1045_v11 = vmul.f32 0.2934897, %v6044_v41  ;;  %v1087_v18 = vmul.f32 0.71520084, %v6048_v52 }
 0x4a1   :  { %5245 = vrcp.f32 %v945_v10  ;;  %v937_v4 = vmul.f32 %v4305_v28, %v6179_v5 }
 0x4a2   :  { %v5232_v14 = vpop.eup %5231 }
 0x4a3   :  { %v956_v35 = vmul.f32 %v5232_v14, %v932_v6  ;;  %v1046_v6 = vmul.f32 0.2934897, %v6046_v46 }
 0x4a4   :  { %v5234_v27 = vpop.eup %5233 }
 0x4a5   :  { %v5236_v63 = vpop.eup %5235  ;;  %v959_v2 = vmul.f32 %v5234_v27, %v935_v22  ;;  %v1122_v22 = vpop.permute.xlu0 %1121 }
 0x4a6   :  { %v5238_v20 = vpop.eup %5237  ;;  %v958_v23 = vmul.f32 %v5236_v63, %v934_v16 }
 0x4a7   :  { %v957_v32 = vmul.f32 %v5238_v20, %v933_v21  ;;  %v1124_v20 = vpop.permute.xlu1 %1123 }
 0x4a8   :  { %v965_v30 = vpack.c.bf16 %v959_v2, %v958_v23  ;;  %v1085_v23 = vmul.f32 0.71520084, %v6044_v41 }
 0x4a9   :  { %v964_v24 = vpack.c.bf16 %v957_v32, %v956_v35 }
 0x4aa   :  { %v5240_v47 = vpop.eup %5239 }
 0x4ab   :  { %4828 = vmatprep.mubr.msk.bf16.mxu1 %vm262_vm2, %v964_v24  ;;  %v960_v54 = vmul.f32 %v5240_v47, %v936_v12 }
 0x4ac   :  { %v5242_v48 = vpop.eup %5241  ;;  %4829 = vmatmul.mubr.msk.bf16.vlgmr.msra.gmra.mxu1 %vm262_vm2, %v965_v30 }
 0x4ad   :  { %v5244_v60 = vpop.eup %5243  ;;  %4847 = vmatpush3.bf16.msra.mxu1 %v6194_v62  ;;  %v963_v8 = vmul.f32 %v5242_v48, %v939_v57  ;;  %v1086_v48 = vmul.f32 0.71520084, %v6046_v46  ;;  %v1128_v46 = vpop.permute.xlu1 %1127 }
 0x4ae   :  { %v5246_v7 = vpop.eup %5245  ;;  %4848 = vmatprep.subr.bf16.mxu1 %v6201_v42  ;;  %v962_v29 = vmul.f32 %v5244_v60, %v938_v26 }
 0x4af   :  { %v961_v5 = vmul.f32 %v5246_v7, %v937_v4  ;;  %v1091_v4 = vmul.f32 0.71520084, %v6066_v59 }
 0x4b0   :  { %v967_v53 = vpack.c.bf16 %v963_v8, %v962_v29  ;;  %v1126_v8 = vpop.permute.xlu0 %1125 }
 0x4b1   :  { %v966_v45 = vpack.c.bf16 %v961_v5, %v960_v54  ;;  %4849 = vmatpush3.bf16.msra.mxu1 %v6201_v42  ;;  %v1052_v5 = vmul.f32 0.2934897, %v6059_v51 }
 0x4b2   :  { %4850 = vmatprep.subr.bf16.mxu1 %v6208_v56 }
 0x4b3   :  { %4832 = vmatprep.mubr.msk.bf16.mxu1 %vm262_vm2, %v966_v45 }
 0x4b4   :  { %4833 = vmatmul.mubr.msk.bf16.gmra.mxu1 %vm262_vm2, %v967_v53 }
 0x4b5   :  { %4851 = vmatpush3.bf16.msra.mxu1 %v6208_v56 }
 0x4b6   :  { %4852 = vmatprep.subr.bf16.mxu1 %v6217_v1 }
 0x4b9   :  { %4853 = vmatpush3.bf16.msra.mxu1 %v6217_v1 }
 0x4ba   :  { %5099 = vmatprep.subr.msk.bf16.mxu1 %vm81_vm0, %v6224_v61 }
 0x56c   :  { %v4830_v33 = vpop.f32.mrf.mxu1 }
 0x56d   :  { %v1023_v36 = vadd.f32 %v4830_v33, %v6018_v15 }
 0x56e   :  { %v1014_v39 = vpop.f32.mrf.mxu1 }
 0x56f   :  { %v1055_v13 = vmul.f32 0.07126854, %v1023_v36  ;;  %v1015_v49 = vadd.f32 %v1014_v39, %v6018_v15 }
 0x570   :  { %v4831_v25 = vpop.f32.mrf.mxu1 }
 0x571   :  { %v1063_v17 = vsub.f32 %v1047_v44, %v1055_v13  ;;  %v1053_v10 = vmul.f32 0.07126854, %v1015_v49  ;;  %v1026_v37 = vadd.f32 %v4831_v25, %v6018_v15  ;;  %v1050_v49 = vmul.f32 0.2934897, %v6064_v38 }
 0x572   :  { %v1017_v40 = vpop.f32.mrf.mxu1 }
 0x573   :  { %v1061_v19 = vsub.f32 %v1045_v11, %v1053_v10  ;;  %v1056_v14 = vmul.f32 0.07126854, %v1026_v37  ;;  %v1018_v27 = vadd.f32 %v1017_v40, %v6018_v15  ;;  %v4314_v63 = vclamps-f32 %v1063_v17, 0.2847051 }
 0x574   :  { %v4834_v21 = vpop.f32.mrf.mxu1 }
 0x575   :  { %v4312_v16 = vclamps-f32 %v1061_v19, 0.2847051  ;;  %v1064_v2 = vsub.f32 %v1048_v50, %v1056_v14  ;;  %v1054_v35 = vmul.f32 0.07126854, %v1018_v27  ;;  %v1039_v32 = vadd.f32 %v4834_v21, %v6018_v15 }
 0x576   :  { %v1030_v24 = vpop.f32.mrf.mxu1  ;;  %v1095_v57 = vadd.f32 %v4314_v63, %v1087_v18  ;;  %v1089_v19 = vmul.f32 0.71520084, %v6062_v9  ;;  %v1092_v50 = vmul.f32 0.71520084, %v6059_v51 }
 0x577   :  { %v4315_v28 = vclamps-f32 %v1064_v2, 0.2847051  ;;  %v1062_v30 = vsub.f32 %v1046_v6, %v1054_v35  ;;  %v1059_v47 = vmul.f32 0.07126854, %v1039_v32  ;;  %v1031_v60 = vadd.f32 %v1030_v24, %v6018_v15  ;;  %v1132_v6 = vpop.permute.xlu1 %1131  ;;  %v6273_v35 = vld [vmem:[%s7571_s3 + $0x38] sm:$0xff]  }
 0x578   :  { %v4835_v12 = vpop.f32.mrf.mxu1  ;;  %v1093_v7 = vadd.f32 %v4312_v16, %v1085_v23  ;;  %v6248_v59 = vadd.f32 %v1122_v22, %v1095_v57 }
 0x579   :  { %v4313_v41 = vclamps-f32 %v1062_v30, 0.2847051  ;;  %v1067_v26 = vsub.f32 %v1051_v0, %v1059_v47  ;;  %v1042_v52 = vadd.f32 %v4835_v12, %v6018_v15  ;;  %v1057_v54 = vmul.f32 0.07126854, %v1031_v60  ;;  %v4322_v30 = vld [vmem:[%s7573_s2 + $0x150] sm:$0xff]  ;;  %v4320_v47 = vld [vmem:[%s7573_s2 + $0x140] sm:$0xff] }
 0x57a   :  { %v1096_v29 = vadd.f32 %v4315_v28, %v1088_v31  ;;  %v1033_v45 = vpop.f32.mrf.mxu1  ;;  %v6253_v25 = vadd.f32 %v1118_v34, %v1093_v7  ;;  %v1130_v34 = vpop.permute.xlu0 %1129  ;;  %v6294_v31 = vld [vmem:[%s7571_s3 + $0x28] sm:$0xff]   ;;  %v6303_v28 = vld [vmem:[%s7571_s3 + $0x20] sm:$0xff]   ;;  %v4323_v60 = vld [vmem:[%s7573_s2 + $0x158] sm:$0xff] }
 0x57b   :  { %v4318_v53 = vclamps-f32 %v1067_v26, 0.2847051  ;;  %v1094_v33 = vadd.f32 %v4313_v41, %v1086_v48  ;;  %v1060_v36 = vmul.f32 0.07126854, %v1042_v52  ;;  %v1034_v39 = vadd.f32 %v1033_v45, %v6018_v15  ;;  %v4321_v41 = vld [vmem:[%s7573_s2 + $0x148] sm:$0xff] }
 0x57c   :  { %v1065_v44 = vsub.f32 %v1049_v55, %v1057_v54  ;;  %v6250_v13 = vadd.f32 %v1124_v20, %v1096_v29  ;;  %v1090_v20 = vmul.f32 0.71520084, %v6064_v38  ;;  %v6279_v38 = vld [vmem:[%s7571_s3 + $0x30] sm:$0xff]  }
 0x57d   :  { %v6255_v17 = vadd.f32 %v1120_v43, %v1094_v33  ;;  %v1068_v11 = vsub.f32 %v1052_v5, %v1060_v36  ;;  %v1058_v10 = vmul.f32 0.07126854, %v1034_v39  ;;  %v1099_v63 = vadd.f32 %v4318_v53, %v1091_v4  ;;  %v4326_v54 = vld [vmem:[%s7573_s2 + $0x170] sm:$0xff]  ;;  %v4324_v53 = vld [vmem:[%s7573_s2 + $0x160] sm:$0xff] }
 0x57e   :  { %v4316_v37 = vclamps-f32 %v1065_v44, 0.2847051  ;;  %v1159_v40 = vpack.c.bf16 %v6250_v13, %v6248_v59 }
 0x57f   :  { %v1158_v14 = vpack.c.bf16 %v6255_v17, %v6253_v25  ;;  %v4319_v27 = vclamps-f32 %v1068_v11, 0.2847051  ;;  %v1066_v22 = vsub.f32 %v1050_v49, %v1058_v10  ;;  %v6266_v2 = vadd.f32 %v1130_v34, %v1099_v63  ;;  %v4327_v49 = vld [vmem:[%s7573_s2 + $0x178] sm:$0xff] }
 0x580   :  { %v1097_v43 = vadd.f32 %v4316_v37, %v1089_v19  ;;  %v4325_v19 = vld [vmem:[%s7573_s2 + $0x168] sm:$0xff] }
 0x581   :  { %v4317_v21 = vclamps-f32 %v1066_v22, 0.2847051  ;;  %4838 = vmatprep.mubr.msk.bf16.mxu0 %vm68_vm1, %v1158_v14  ;;  %v1100_v16 = vadd.f32 %v4319_v27, %v1092_v50 }
 0x582   :  { %4839 = vmatmul.mubr.msk.bf16.vlgmr.msra.gmra.mxu0 %vm68_vm1, %v1159_v40  ;;  %v6282_v32 = vadd.f32 %v1126_v8, %v1097_v43 }
 0x583   :  { %v1098_v9 = vadd.f32 %v4317_v21, %v1090_v20  ;;  %v6268_v51 = vadd.f32 %v1132_v6, %v1100_v16  ;;  %4863 = vmatpush3.bf16.msra.mxu0 %v6273_v35 }
 0x584   :  { %4864 = vmatprep.subr.bf16.mxu0 %v6279_v38 }
 0x585   :  { %v6284_v23 = vadd.f32 %v1128_v46, %v1098_v9  ;;  %v1161_v18 = vpack.c.bf16 %v6268_v51, %v6266_v2 }
 0x587   :  { %v1160_v24 = vpack.c.bf16 %v6284_v23, %v6282_v32  ;;  %4865 = vmatpush3.bf16.msra.mxu0 %v6279_v38 }
 0x588   :  { %4866 = vmatprep.subr.bf16.mxu0 %v6294_v31 }
 0x589   :  { %4842 = vmatprep.mubr.msk.bf16.mxu0 %vm68_vm1, %v1160_v24 }
 0x58a   :  { %4843 = vmatmul.mubr.msk.bf16.gmra.mxu0 %vm68_vm1, %v1161_v18 }
 0x58b   :  { %4867 = vmatpush3.bf16.msra.mxu0 %v6294_v31 }
 0x58c   :  { %4868 = vmatprep.subr.bf16.mxu0 %v6303_v28 }
 0x58f   :  { %4869 = vmatpush3.bf16.msra.mxu0 %v6303_v28 }
 0x590   :  { %4888 = vmatprep.subr.bf16.mxu0 %v6194_v62 }
 0x642   :  { %v4840_v0 = vpop.f32.mrf.mxu0 }
 0x643   :  { %v6314_v48 = vadd.f32 %v4840_v0, %v4322_v30 }
 0x644   :  { %v1208_v57 = vpop.f32.mrf.mxu0 }
 0x645   :  { %v1241_v12 = vmin.f32 %v6314_v48, 20.0  ;;  %v6320_v4 = vadd.f32 %v4320_v47, %v1208_v57 }
 0x646   :  { %v4841_v7 = vpop.f32.mrf.mxu0 }
 0x647   :  { %v1251_v26 = vmul.f32 1.442695, %v1241_v12  ;;  %v1239_v52 = vmin.f32 %v6320_v4, 20.0  ;;  %v6326_v8 = vadd.f32 %v4841_v7, %v4323_v60 }
 0x648   :  { %v1211_v55 = vpop.f32.mrf.mxu0 }
 0x649   :  { %5247 = vpow2.f32 %v1251_v26  ;;  %v1247_v5 = vmul.f32 1.442695, %v1239_v52  ;;  %v1242_v29 = vmin.f32 %v6326_v8, 20.0  ;;  %v6332_v45 = vadd.f32 %v4321_v41, %v1211_v55 }
 0x64a   :  { %v4844_v46 = vpop.f32.mrf.mxu0 }
 0x64b   :  { %5249 = vpow2.f32 %v1247_v5  ;;  %v1253_v33 = vmul.f32 1.442695, %v1242_v29  ;;  %v1240_v36 = vmin.f32 %v6332_v45, 20.0  ;;  %v6338_v39 = vadd.f32 %v4844_v46, %v4326_v54 }
 0x64c   :  { %v1224_v44 = vpop.f32.mrf.mxu0 }
 0x64d   :  { %5251 = vpow2.f32 %v1253_v33  ;;  %v1249_v11 = vmul.f32 1.442695, %v1240_v36  ;;  %v1245_v10 = vmin.f32 %v6338_v39, 20.0  ;;  %v6344_v37 = vadd.f32 %v4324_v53, %v1224_v44 }
 0x64e   :  { %v4845_v40 = vpop.f32.mrf.mxu0 }
 0x64f   :  { %5253 = vpow2.f32 %v1249_v11  ;;  %v1259_v50 = vmul.f32 1.442695, %v1245_v10  ;;  %v1243_v14 = vmin.f32 %v6344_v37, 20.0  ;;  %v6350_v27 = vadd.f32 %v4845_v40, %v4327_v49 }
 0x650   :  { %v1227_v22 = vpop.f32.mrf.mxu0 }
 0x651   :  { %5255 = vpow2.f32 %v1259_v50  ;;  %v1255_v63 = vmul.f32 1.442695, %v1243_v14  ;;  %v1246_v34 = vmin.f32 %v6350_v27, 20.0  ;;  %v6353_v6 = vadd.f32 %v4325_v19, %v1227_v22 }
 0x653   :  { %5257 = vpow2.f32 %v1255_v63  ;;  %v1261_v43 = vmul.f32 1.442695, %v1246_v34  ;;  %v1244_v21 = vmin.f32 %v6353_v6, 20.0 }
 0x655   :  { %5259 = vpow2.f32 %v1261_v43  ;;  %v1257_v20 = vmul.f32 1.442695, %v1244_v21 }
 0x656   :  { %v5248_v16 = vpop.eup %5247 }
 0x657   :  { %v1265_v9 = vadd.f32 1.0, %v5248_v16  ;;  %5261 = vpow2.f32 %v1257_v20 }
 0x658   :  { %v5250_v18 = vpop.eup %5249 }
 0x659   :  { %v1263_v24 = vadd.f32 1.0, %v5250_v18  ;;  %v1273_v0 = vmul.f32 %v1265_v9, %v1265_v9 }
 0x65a   :  { %v5252_v30 = vpop.eup %5251 }
 0x65b   :  { %v1271_v47 = vmul.f32 %v1263_v24, %v1263_v24  ;;  %v1266_v57 = vadd.f32 1.0, %v5252_v30  ;;  %v1297_v52 = vadd.f32 1.0, %v1273_v0  ;;  %v4334_v20 = vadd.f32 -1.0, %v1273_v0 }
 0x65c   :  { %v5254_v60 = vpop.eup %5253 }
 0x65d   :  { %v1295_v12 = vadd.f32 1.0, %v1271_v47  ;;  %v1274_v41 = vmul.f32 %v1266_v57, %v1266_v57  ;;  %v1264_v26 = vadd.f32 1.0, %v5254_v60  ;;  %v4332_v43 = vadd.f32 -1.0, %v1271_v47 }
 0x65e   :  { %v5256_v7 = vpop.eup %5255 }
 0x65f   :  { %v1269_v55 = vadd.f32 1.0, %v5256_v7  ;;  %v1298_v5 = vadd.f32 1.0, %v1274_v41  ;;  %v1272_v29 = vmul.f32 %v1264_v26, %v1264_v26  ;;  %5263 = vrcp.f32 %v1295_v12 }
 0x660   :  { %v5258_v54 = vpop.eup %5257  ;;  %v4335_v34 = vadd.f32 -1.0, %v1274_v41  ;;  %v1287_v30 = vmul.f32 %v4332_v43, %v6320_v4  ;;  %v1289_v12 = vmul.f32 %v4334_v20, %v6314_v48 }
 0x661   :  { %v1267_v46 = vadd.f32 1.0, %v5258_v54  ;;  %5265 = vrcp.f32 %v1298_v5  ;;  %v1296_v33 = vadd.f32 1.0, %v1272_v29  ;;  %v1277_v36 = vmul.f32 %v1269_v55, %v1269_v55 }
 0x662   :  { %v5260_v53 = vpop.eup %5259  ;;  %5267 = vrcp.f32 %v1297_v52  ;;  %v4333_v21 = vadd.f32 -1.0, %v1272_v29  ;;  %v1290_v18 = vmul.f32 %v4335_v34, %v6326_v8  ;;  %v6397_v34 = vld [vmem:[%s7574_s1 + $0x20] sm:$0xff] }
 0x663   :  { %v1275_v44 = vmul.f32 %v1267_v46, %v1267_v46  ;;  %v1270_v49 = vadd.f32 1.0, %v5260_v53  ;;  %5269 = vrcp.f32 %v1296_v33  ;;  %v1301_v50 = vadd.f32 1.0, %v1277_v36 }
 0x664   :  { %v5262_v11 = vpop.eup %5261  ;;  %v1288_v57 = vmul.f32 %v4333_v21, %v6332_v45  ;;  %v4338_v29 = vadd.f32 -1.0, %v1277_v36  ;;  %v1621_v43 = vmul.f32 0.098161, %v6397_v34  ;;  %v6403_v21 = vld [vmem:[%s7574_s1 + $0x28] sm:$0xff] }
 0x665   :  { %v1299_v10 = vadd.f32 1.0, %v1275_v44  ;;  %v1278_v40 = vmul.f32 %v1270_v49, %v1270_v49  ;;  %v1268_v19 = vadd.f32 1.0, %v5262_v11  ;;  %v4336_v54 = vadd.f32 -1.0, %v1275_v44 }
 0x666   :  { %v1293_v44 = vmul.f32 %v4338_v29, %v6338_v39  ;;  %v6379_v39 = vld [vmem:[%s7574_s1 + $0x8] sm:$0xff]  ;;  %v1622_v20 = vmul.f32 0.098161, %v6403_v21 }
 0x667   :  { %v1302_v14 = vadd.f32 1.0, %v1278_v40  ;;  %v1276_v22 = vmul.f32 %v1268_v19, %v1268_v19  ;;  %5271 = vrcp.f32 %v1299_v10  ;;  %v4339_v47 = vadd.f32 -1.0, %v1278_v40 }
 0x668   :  { %v1291_v48 = vmul.f32 %v4336_v54, %v6344_v37  ;;  %v6373_v37 = vld [vmem:[%s7574_s1] sm:$0xff]  ;;  %v1618_v19 = vmul.f32 0.098161, %v6379_v39 }
 0x669   :  { %5273 = vrcp.f32 %v1302_v14  ;;  %v1300_v63 = vadd.f32 1.0, %v1276_v22  ;;  %v4337_v0 = vadd.f32 -1.0, %v1276_v22  ;;  %v1294_v4 = vmul.f32 %v4339_v47, %v6350_v27  ;;  %v6391_v22 = vld [vmem:[%s7574_s1 + $0x18] sm:$0xff] }
 0x66a   :  { %5275 = vrcp.f32 %v1301_v50  ;;  %1635 = vrot.lane.b32.xlu1 %v1618_v19, %s5684_s10  ;;  %v6385_v50 = vld [vmem:[%s7574_s1 + $0x10] sm:$0xff] }
 0x66b   :  { %5277 = vrcp.f32 %v1300_v63  ;;  %v1292_v53 = vmul.f32 %v4337_v0, %v6353_v6  ;;  %v1617_v6 = vmul.f32 0.098161, %v6373_v37  ;;  %v1619_v14 = vmul.f32 0.098161, %v6385_v50 }
 0x66c   :  { %v5264_v16 = vpop.eup %5263  ;;  %v1620_v63 = vmul.f32 0.098161, %v6391_v22 }
 0x66d   :  { %v1311_v26 = vmul.f32 %v5264_v16, %v1287_v30  ;;  %1633 = vrot.lane.b32.xlu0 %v1617_v6, %s5684_s10  ;;  %v6409_v16 = vld [vmem:[%s7574_s1 + $0x30] sm:$0xff] }
 0x66e   :  { %v5266_v9 = vpop.eup %5265  ;;  %1639 = vrot.lane.b32.xlu1 %v1620_v63, %s5684_s10 }
 0x66f   :  { %v5268_v24 = vpop.eup %5267  ;;  %v1314_v7 = vmul.f32 %v5266_v9, %v1290_v18  ;;  %v1623_v9 = vmul.f32 0.098161, %v6409_v16  ;;  %v6415_v18 = vld [vmem:[%s7574_s1 + $0x38] sm:$0xff] }
 0x670   :  { %v5270_v60 = vpop.eup %5269  ;;  %v1313_v52 = vmul.f32 %v5268_v24, %v1289_v12  ;;  %v1624_v24 = vmul.f32 0.098161, %v6415_v18 }
 0x671   :  { %v1312_v41 = vmul.f32 %v5270_v60, %v1288_v57  ;;  %1637 = vrot.lane.b32.xlu0 %v1619_v14, %s5684_s10 }
 0x672   :  { %v1320_v5 = vpack.c.bf16 %v1314_v7, %v1313_v52  ;;  %1643 = vrot.lane.b32.xlu1 %v1622_v20, %s5684_s10 }
 0x673   :  { %v1319_v55 = vpack.c.bf16 %v1312_v41, %v1311_v26 }
 0x674   :  { %v5272_v46 = vpop.eup %5271 }
 0x675   :  { %4854 = vmatprep.mubr.msk.bf16.mxu1 %vm262_vm2, %v1319_v55  ;;  %v1315_v36 = vmul.f32 %v5272_v46, %v1291_v48  ;;  %1641 = vrot.lane.b32.xlu0 %v1621_v43, %s5684_s10 }
 0x676   :  { %v5274_v8 = vpop.eup %5273  ;;  %4855 = vmatmul.mubr.msk.bf16.vlgmr.msra.gmra.mxu1 %vm262_vm2, %v1320_v5  ;;  %1647 = vrot.lane.b32.xlu1 %v1624_v24, %s5684_s10 }
 0x677   :  { %v5276_v45 = vpop.eup %5275  ;;  %4879 = vmatpush3.bf16.msra.mxu1 %v5738_v3  ;;  %v1318_v49 = vmul.f32 %v5274_v8, %v1294_v4 }
 0x678   :  { %v5278_v33 = vpop.eup %5277  ;;  %4904 = vmatprep.subr.bf16.mxu1 %v6273_v35  ;;  %v1317_v10 = vmul.f32 %v5276_v45, %v1293_v44 }
 0x679   :  { %v1316_v11 = vmul.f32 %v5278_v33, %v1292_v53  ;;  %1645 = vrot.lane.b32.xlu0 %v1623_v9, %s5684_s10  ;;  %s5688_s10 = smov 120  }
 0x67a   :  { %v1322_v27 = vpack.c.bf16 %v1318_v49, %v1317_v10 }
 0x67b   :  { %v1321_v40 = vpack.c.bf16 %v1316_v11, %v1315_v36 }
 0x67d   :  { %4858 = vmatprep.mubr.msk.bf16.mxu1 %vm262_vm2, %v1321_v40 }
 0x67e   :  { %4859 = vmatmul.mubr.msk.bf16.gmra.mxu1 %vm262_vm2, %v1322_v27 }
 0x736   :  { %v4856_v30 = vpop.f32.mrf.mxu1 }
 0x737   :  { %v6419_v57 = vadd.f32 %v4856_v30, %v5961_v58 }
 0x738   :  { %v1369_v60 = vpop.f32.mrf.mxu1 }
 0x739   :  { %v1402_v12 = vmin.f32 %v6419_v57, 20.0  ;;  %v6423_v7 = vadd.f32 %v1369_v60, %v5961_v58 }
 0x73a   :  { %v4857_v26 = vpop.f32.mrf.mxu1 }
 0x73b   :  { %v1412_v41 = vmul.f32 1.442695, %v1402_v12  ;;  %v1400_v52 = vmin.f32 %v6423_v7, 20.0  ;;  %v6427_v47 = vadd.f32 %v4857_v26, %v5961_v58 }
 0x73c   :  { %v1372_v55 = vpop.f32.mrf.mxu1 }
 0x73d   :  { %5279 = vpow2.f32 %v1412_v41  ;;  %v1408_v54 = vmul.f32 1.442695, %v1400_v52  ;;  %v1403_v0 = vmin.f32 %v6427_v47, 20.0  ;;  %v6431_v5 = vadd.f32 %v1372_v55, %v5961_v58 }
 0x73e   :  { %v4860_v29 = vpop.f32.mrf.mxu1 }
 0x73f   :  { %5281 = vpow2.f32 %v1408_v54  ;;  %v1414_v46 = vmul.f32 1.442695, %v1403_v0  ;;  %v1401_v8 = vmin.f32 %v6431_v5, 20.0  ;;  %v6435_v4 = vadd.f32 %v4860_v29, %v5961_v58 }
 0x740   :  { %v1385_v45 = vpop.f32.mrf.mxu1 }
 0x741   :  { %5283 = vpow2.f32 %v1414_v46  ;;  %v1410_v48 = vmul.f32 1.442695, %v1401_v8  ;;  %v1406_v53 = vmin.f32 %v6435_v4, 20.0  ;;  %v6439_v33 = vadd.f32 %v1385_v45, %v5961_v58 }
 0x742   :  { %v4861_v44 = vpop.f32.mrf.mxu1 }
 0x743   :  { %5285 = vpow2.f32 %v1410_v48  ;;  %v1420_v49 = vmul.f32 1.442695, %v1406_v53  ;;  %v1404_v36 = vmin.f32 %v6439_v33, 20.0  ;;  %v6443_v11 = vadd.f32 %v4861_v44, %v5961_v58 }
 0x744   :  { %v1388_v10 = vpop.f32.mrf.mxu1 }
 0x745   :  { %5287 = vpow2.f32 %v1420_v49  ;;  %v1416_v40 = vmul.f32 1.442695, %v1404_v36  ;;  %v1407_v27 = vmin.f32 %v6443_v11, 20.0  ;;  %v6447_v6 = vadd.f32 %v1388_v10, %v5961_v58 }
 0x747   :  { %5289 = vpow2.f32 %v1416_v40  ;;  %v1422_v19 = vmul.f32 1.442695, %v1407_v27  ;;  %v1405_v14 = vmin.f32 %v6447_v6, 20.0 }
 0x749   :  { %5291 = vpow2.f32 %v1422_v19  ;;  %v1418_v63 = vmul.f32 1.442695, %v1405_v14 }
 0x74a   :  { %v5280_v43 = vpop.eup %5279 }
 0x74b   :  { %v1426_v20 = vadd.f32 1.0, %v5280_v43  ;;  %5293 = vpow2.f32 %v1418_v63 }
 0x74c   :  { %v5282_v9 = vpop.eup %5281 }
 0x74d   :  { %v1424_v24 = vadd.f32 1.0, %v5282_v9  ;;  %v1434_v60 = vmul.f32 %v1426_v20, %v1426_v20 }
 0x74e   :  { %v5284_v30 = vpop.eup %5283 }
 0x74f   :  { %v1432_v12 = vmul.f32 %v1424_v24, %v1424_v24  ;;  %v1427_v26 = vadd.f32 1.0, %v5284_v30  ;;  %v1458_v29 = vadd.f32 1.0, %v1434_v60 }
 0x750   :  { %v5286_v41 = vpop.eup %5285 }
 0x751   :  { %v1456_v52 = vadd.f32 1.0, %v1432_v12  ;;  %v1435_v54 = vmul.f32 %v1427_v26, %v1427_v26  ;;  %v1425_v0 = vadd.f32 1.0, %v5286_v41  ;;  %v4344_v26 = vadd.f32 -1.0, %v1432_v12 }
 0x752   :  { %v5288_v55 = vpop.eup %5287 }
 0x753   :  { %v1430_v46 = vadd.f32 1.0, %v5288_v55  ;;  %v1459_v45 = vadd.f32 1.0, %v1435_v54  ;;  %v1433_v48 = vmul.f32 %v1425_v0, %v1425_v0  ;;  %5295 = vrcp.f32 %v1456_v52 }
 0x754   :  { %v5290_v8 = vpop.eup %5289  ;;  %v4347_v30 = vadd.f32 -1.0, %v1435_v54  ;;  %v4346_v52 = vadd.f32 -1.0, %v1434_v60 }
 0x755   :  { %v1428_v53 = vadd.f32 1.0, %v5290_v8  ;;  %5297 = vrcp.f32 %v1459_v45  ;;  %v1457_v49 = vadd.f32 1.0, %v1433_v48  ;;  %v1438_v36 = vmul.f32 %v1430_v46, %v1430_v46 }
 0x756   :  { %v5292_v44 = vpop.eup %5291  ;;  %5299 = vrcp.f32 %v1458_v29  ;;  %v4345_v41 = vadd.f32 -1.0, %v1433_v48  ;;  %v1451_v29 = vmul.f32 %v4347_v30, %v6427_v47  ;;  %v1448_v8 = vmul.f32 %v4344_v26, %v6423_v7 }
 0x757   :  { %v1436_v10 = vmul.f32 %v1428_v53, %v1428_v53  ;;  %v1431_v40 = vadd.f32 1.0, %v5292_v44  ;;  %5301 = vrcp.f32 %v1457_v49  ;;  %v1462_v43 = vadd.f32 1.0, %v1438_v36 }
 0x758   :  { %v5294_v27 = vpop.eup %5293  ;;  %v1449_v45 = vmul.f32 %v4345_v41, %v6431_v5  ;;  %v1450_v44 = vmul.f32 %v4346_v52, %v6419_v57  ;;  %v1636_v52 = vpop.permute.xlu1 %1635 }
 0x759   :  { %v1460_v19 = vadd.f32 1.0, %v1436_v10  ;;  %v1439_v14 = vmul.f32 %v1431_v40, %v1431_v40  ;;  %v1429_v63 = vadd.f32 1.0, %v5294_v27 }
 0x75b   :  { %v1463_v20 = vadd.f32 1.0, %v1439_v14  ;;  %v1437_v9 = vmul.f32 %v1429_v63, %v1429_v63  ;;  %5303 = vrcp.f32 %v1460_v19  ;;  %v4351_v12 = vadd.f32 -1.0, %v1439_v14 }
 0x75c   :  { %v4348_v19 = vadd.f32 -1.0, %v1436_v10 }
 0x75d   :  { %5305 = vrcp.f32 %v1463_v20  ;;  %v1461_v24 = vadd.f32 1.0, %v1437_v9  ;;  %v4349_v60 = vadd.f32 -1.0, %v1437_v9  ;;  %v1455_v7 = vmul.f32 %v4351_v12, %v6443_v11 }
 0x75e   :  { %5307 = vrcp.f32 %v1462_v43  ;;  %v4350_v43 = vadd.f32 -1.0, %v1438_v36  ;;  %v1452_v57 = vmul.f32 %v4348_v19, %v6439_v33  ;;  %v1562_v12 = vmul.f32 0.33892563, %v6255_v17  ;;  %v1640_v19 = vpop.permute.xlu1 %1639 }
 0x75f   :  { %5309 = vrcp.f32 %v1461_v24  ;;  %v1453_v24 = vmul.f32 %v4349_v60, %v6447_v6 }
 0x760   :  { %v5296_v55 = vpop.eup %5295  ;;  %v1454_v10 = vmul.f32 %v4350_v43, %v6435_v4 }
 0x761   :  { %v1472_v40 = vmul.f32 %v5296_v55, %v1448_v8  ;;  %v1563_v55 = vmul.f32 0.33892563, %v6248_v59  ;;  %v1561_v8 = vmul.f32 0.33892563, %v6253_v25 }
 0x762   :  { %v5298_v0 = vpop.eup %5297 }
 0x763   :  { %v5300_v46 = vpop.eup %5299  ;;  %v1475_v49 = vmul.f32 %v5298_v0, %v1451_v29 }
 0x764   :  { %v5302_v53 = vpop.eup %5301  ;;  %v1474_v27 = vmul.f32 %v5300_v46, %v1450_v44  ;;  %v1564_v44 = vmul.f32 0.33892563, %v6250_v13 }
 0x765   :  { %v1473_v54 = vmul.f32 %v5302_v53, %v1449_v45 }
 0x766   :  { %v1481_v63 = vpack.c.bf16 %v1475_v49, %v1474_v27 }
 0x767   :  { %v1480_v48 = vpack.c.bf16 %v1473_v54, %v1472_v40 }
 0x768   :  { %v5304_v20 = vpop.eup %5303 }
 0x769   :  { %4870 = vmatprep.mubr.msk.bf16.mxu0 %vm262_vm2, %v1480_v48  ;;  %v1476_v36 = vmul.f32 %v5304_v20, %v1452_v57  ;;  %v1604_v57 = vmul.f32 0.6683093, %v6250_v13  ;;  %v1565_v13 = vmul.f32 0.33892563, %v6282_v32 }
 0x76a   :  { %v5306_v47 = vpop.eup %5305  ;;  %4871 = vmatmul.mubr.msk.bf16.vlgmr.msra.gmra.mxu0 %vm262_vm2, %v1481_v63 }
 0x76b   :  { %v5308_v5 = vpop.eup %5307  ;;  %4889 = vmatpush3.bf16.msra.mxu0 %v6194_v62  ;;  %v1479_v9 = vmul.f32 %v5306_v47, %v1455_v7  ;;  %v1601_v47 = vmul.f32 0.6683093, %v6253_v25  ;;  %v1603_v7 = vmul.f32 0.6683093, %v6248_v59 }
 0x76c   :  { %v5310_v14 = vpop.eup %5309  ;;  %4890 = vmatprep.subr.bf16.mxu0 %v6201_v42  ;;  %v1478_v26 = vmul.f32 %v5308_v5, %v1454_v10  ;;  %v1567_v10 = vmul.f32 0.33892563, %v6266_v2 }
 0x76d   :  { %v1477_v30 = vmul.f32 %v5310_v14, %v1453_v24 }
 0x76e   :  { %v1483_v11 = vpack.c.bf16 %v1479_v9, %v1478_v26 }
 0x76f   :  { %v1482_v41 = vpack.c.bf16 %v1477_v30, %v1476_v36  ;;  %4891 = vmatpush3.bf16.msra.mxu0 %v6201_v42  ;;  %v1634_v42 = vpop.permute.xlu0 %1633  ;;  %v1602_v36 = vmul.f32 0.6683093, %v6255_v17  ;;  %v1644_v17 = vpop.permute.xlu1 %1643 }
 0x770   :  { %4892 = vmatprep.subr.bf16.mxu0 %v6208_v56 }
 0x771   :  { %4874 = vmatprep.mubr.msk.bf16.mxu0 %vm262_vm2, %v1482_v41 }
 0x772   :  { %4875 = vmatmul.mubr.msk.bf16.gmra.mxu0 %vm262_vm2, %v1483_v11  ;;  %v1607_v11 = vmul.f32 0.6683093, %v6266_v2 }
 0x773   :  { %4893 = vmatpush3.bf16.msra.mxu0 %v6208_v56  ;;  %v1638_v54 = vpop.permute.xlu0 %1637 }
 0x774   :  { %4894 = vmatprep.subr.bf16.mxu0 %v6217_v1 }
 0x777   :  { %4895 = vmatpush3.bf16.msra.mxu0 %v6217_v1 }
 0x778   :  { %5100 = vmatprep.subr.msk.bf16.mxu0 %vm81_vm0, %v6224_v61 }
 0x82a   :  { %v4872_v4 = vpop.f32.mrf.mxu0 }
 0x82b   :  { %v1539_v33 = vadd.f32 %v4872_v4, %v6018_v15 }
 0x82c   :  { %v1530_v6 = vpop.f32.mrf.mxu0 }
 0x82d   :  { %v1571_v0 = vmul.f32 0.06990407, %v1539_v33  ;;  %v1531_v29 = vadd.f32 %v1530_v6, %v6018_v15  ;;  %v1642_v6 = vpop.permute.xlu0 %1641 }
 0x82e   :  { %v4873_v46 = vpop.f32.mrf.mxu0 }
 0x82f   :  { %v1579_v56 = vsub.f32 %v1563_v55, %v1571_v0  ;;  %v1569_v45 = vmul.f32 0.06990407, %v1531_v29  ;;  %v1542_v1 = vadd.f32 %v4873_v46, %v6018_v15  ;;  %v1568_v0 = vmul.f32 0.33892563, %v6268_v51 }
 0x830   :  { %v1533_v53 = vpop.f32.mrf.mxu0 }
 0x831   :  { %v1577_v61 = vsub.f32 %v1561_v8, %v1569_v45  ;;  %v1572_v49 = vmul.f32 0.06990407, %v1542_v1  ;;  %v1534_v40 = vadd.f32 %v1533_v53, %v6018_v15  ;;  %v4358_v27 = vclamps-f32 %v1579_v56, 0.33163837 }
 0x832   :  { %v4876_v48 = vpop.f32.mrf.mxu0 }
 0x833   :  { %v4356_v60 = vclamps-f32 %v1577_v61, 0.33163837  ;;  %v1580_v63 = vsub.f32 %v1564_v44, %v1572_v49  ;;  %v1570_v43 = vmul.f32 0.06990407, %v1534_v40  ;;  %v1555_v20 = vadd.f32 %v4876_v48, %v6018_v15 }
 0x834   :  { %v1546_v5 = vpop.f32.mrf.mxu0  ;;  %v1611_v30 = vadd.f32 %v4358_v27, %v1603_v7  ;;  %v1566_v44 = vmul.f32 0.33892563, %v6284_v23  ;;  %v1648_v7 = vpop.permute.xlu1 %1647 }
 0x835   :  { %v4359_v24 = vclamps-f32 %v1580_v63, 0.33163837  ;;  %v1578_v14 = vsub.f32 %v1562_v12, %v1570_v43  ;;  %v1575_v9 = vmul.f32 0.06990407, %v1555_v20  ;;  %v1547_v26 = vadd.f32 %v1546_v5, %v6018_v15 }
 0x836   :  { %v4877_v41 = vpop.f32.mrf.mxu0  ;;  %v1609_v4 = vadd.f32 %v4356_v60, %v1601_v47  ;;  %v6491_v2 = vadd.f32 %v1638_v54, %v1611_v30  ;;  %v1605_v63 = vmul.f32 0.6683093, %v6282_v32  ;;  %v1608_v54 = vmul.f32 0.6683093, %v6268_v51  ;;  %v4366_v30 = vld [vmem:[%s7573_s2 + $0x110] sm:$0xff] }
 0x837   :  { %v4357_v25 = vclamps-f32 %v1578_v14, 0.33163837  ;;  %v1583_v33 = vsub.f32 %v1567_v10, %v1575_v9  ;;  %v1558_v59 = vadd.f32 %v4877_v41, %v6018_v15  ;;  %v1573_v55 = vmul.f32 0.06990407, %v1547_v26 }
 0x838   :  { %v1612_v29 = vadd.f32 %v4359_v24, %v1604_v57  ;;  %v1549_v46 = vpop.f32.mrf.mxu0  ;;  %v6496_v49 = vadd.f32 %v1634_v42, %v1609_v4  ;;  %v1646_v42 = vpop.permute.xlu0 %1645  ;;  %v1606_v57 = vmul.f32 0.6683093, %v6284_v23 }
 0x839   :  { %v4362_v56 = vclamps-f32 %v1583_v33, 0.33163837  ;;  %v1610_v8 = vadd.f32 %v4357_v25, %v1602_v36  ;;  %v1576_v45 = vmul.f32 0.06990407, %v1558_v59  ;;  %v1550_v1 = vadd.f32 %v1549_v46, %v6018_v15  ;;  %v4365_v25 = vld [vmem:[%s7573_s2 + $0x108] sm:$0xff] }
 0x83a   :  { %v1581_v53 = vsub.f32 %v1565_v13, %v1573_v55  ;;  %v6493_v61 = vadd.f32 %v1640_v19, %v1612_v29  ;;  %v4370_v55 = vld [vmem:[%s7573_s2 + $0x130] sm:$0xff] }
 0x83b   :  { %v6498_v40 = vadd.f32 %v1636_v52, %v1610_v8  ;;  %v1584_v27 = vsub.f32 %v1568_v0, %v1576_v45  ;;  %v1574_v12 = vmul.f32 0.06990407, %v1550_v1  ;;  %v1615_v47 = vadd.f32 %v4362_v56, %v1607_v11  ;;  %v4368_v56 = vld [vmem:[%s7573_s2 + $0x120] sm:$0xff] }
 0x83c   :  { %v4360_v48 = vclamps-f32 %v1581_v53, 0.33163837  ;;  %v1675_v60 = vpack.c.bf16 %v6493_v61, %v6491_v2 }
 0x83d   :  { %v1674_v19 = vpack.c.bf16 %v6498_v40, %v6496_v49  ;;  %v4363_v43 = vclamps-f32 %v1584_v27, 0.33163837  ;;  %v1582_v20 = vsub.f32 %v1566_v44, %v1574_v12  ;;  %v6509_v14 = vadd.f32 %v1646_v42, %v1615_v47  ;;  %v4371_v44 = vld [vmem:[%s7573_s2 + $0x138] sm:$0xff] }
 0x83e   :  { %v1613_v52 = vadd.f32 %v4360_v48, %v1605_v63  ;;  %v4369_v63 = vld [vmem:[%s7573_s2 + $0x128] sm:$0xff] }
 0x83f   :  { %v4361_v5 = vclamps-f32 %v1582_v20, 0.33163837  ;;  %4880 = vmatprep.mubr.msk.bf16.mxu1 %vm68_vm1, %v1674_v19  ;;  %v1616_v24 = vadd.f32 %v4363_v43, %v1608_v54 }
 0x840   :  { %4881 = vmatmul.mubr.msk.bf16.vlgmr.msra.gmra.mxu1 %vm68_vm1, %v1675_v60  ;;  %v6515_v10 = vadd.f32 %v1642_v6, %v1613_v52 }
 0x841   :  { %v1614_v32 = vadd.f32 %v4361_v5, %v1606_v57  ;;  %v6511_v51 = vadd.f32 %v1648_v7, %v1616_v24  ;;  %4905 = vmatpush3.bf16.msra.mxu1 %v6273_v35 }
 0x842   :  { %4906 = vmatprep.subr.bf16.mxu1 %v6279_v38 }
 0x843   :  { %v6517_v9 = vadd.f32 %v1644_v17, %v1614_v32  ;;  %v1677_v23 = vpack.c.bf16 %v6511_v51, %v6509_v14 }
 0x845   :  { %v1676_v36 = vpack.c.bf16 %v6517_v9, %v6515_v10  ;;  %4907 = vmatpush3.bf16.msra.mxu1 %v6279_v38  ;;  %v4364_v38 = vld [vmem:[%s7573_s2 + $0x100] sm:$0xff] }
 0x846   :  { %4908 = vmatprep.subr.bf16.mxu1 %v6294_v31 }
 0x847   :  { %4884 = vmatprep.mubr.msk.bf16.mxu1 %vm68_vm1, %v1676_v36 }
 0x848   :  { %4885 = vmatmul.mubr.msk.bf16.gmra.mxu1 %vm68_vm1, %v1677_v23 }
 0x849   :  { %4909 = vmatpush3.bf16.msra.mxu1 %v6294_v31  ;;  %v4367_v31 = vld [vmem:[%s7573_s2 + $0x118] sm:$0xff] }
 0x84a   :  { %4910 = vmatprep.subr.bf16.mxu1 %v6303_v28 }
 0x84d   :  { %4911 = vmatpush3.bf16.msra.mxu1 %v6303_v28 }
 0x84e   :  { %4930 = vmatprep.subr.bf16.mxu1 %v6194_v62 }
 0x900   :  { %v4882_v26 = vpop.f32.mrf.mxu1 }
 0x901   :  { %v6537_v41 = vadd.f32 %v4882_v26, %v4366_v30 }
 0x902   :  { %v1724_v11 = vpop.f32.mrf.mxu1 }
 0x903   :  { %v1757_v28 = vmin.f32 %v6537_v41, 20.0  ;;  %v6543_v4 = vadd.f32 %v4364_v38, %v1724_v11 }
 0x904   :  { %v4883_v62 = vpop.f32.mrf.mxu1 }
 0x905   :  { %v1767_v33 = vmul.f32 1.442695, %v1757_v28  ;;  %v1755_v59 = vmin.f32 %v6543_v4, 20.0  ;;  %v6549_v6 = vadd.f32 %v4883_v62, %v4367_v31 }
 0x906   :  { %v1727_v13 = vpop.f32.mrf.mxu1 }
 0x907   :  { %5311 = vpow2.f32 %v1767_v33  ;;  %v1763_v0 = vmul.f32 1.442695, %v1755_v59  ;;  %v1758_v29 = vmin.f32 %v6549_v6, 20.0  ;;  %v6555_v46 = vadd.f32 %v4365_v25, %v1727_v13 }
 0x908   :  { %v4886_v17 = vpop.f32.mrf.mxu1 }
 0x909   :  { %5313 = vpow2.f32 %v1763_v0  ;;  %v1769_v8 = vmul.f32 1.442695, %v1758_v29  ;;  %v1756_v45 = vmin.f32 %v6555_v46, 20.0  ;;  %v6561_v1 = vadd.f32 %v4886_v17, %v4370_v55 }
 0x90a   :  { %v1740_v53 = vpop.f32.mrf.mxu1 }
 0x90b   :  { %5315 = vpow2.f32 %v1769_v8  ;;  %v1765_v27 = vmul.f32 1.442695, %v1756_v45  ;;  %v1761_v12 = vmin.f32 %v6561_v1, 20.0  ;;  %v6567_v48 = vadd.f32 %v4368_v56, %v1740_v53 }
 0x90c   :  { %v4887_v60 = vpop.f32.mrf.mxu1 }
 0x90d   :  { %5317 = vpow2.f32 %v1765_v27  ;;  %v1775_v54 = vmul.f32 1.442695, %v1761_v12  ;;  %v1759_v19 = vmin.f32 %v6567_v48, 20.0  ;;  %v6573_v43 = vadd.f32 %v4887_v60, %v4371_v44 }
 0x90e   :  { %v1743_v20 = vpop.f32.mrf.mxu1 }
 0x90f   :  { %5319 = vpow2.f32 %v1775_v54  ;;  %v1771_v47 = vmul.f32 1.442695, %v1759_v19  ;;  %v1762_v42 = vmin.f32 %v6573_v43, 20.0  ;;  %v6576_v7 = vadd.f32 %v4369_v63, %v1743_v20 }
 0x911   :  { %5321 = vpow2.f32 %v1771_v47  ;;  %v1777_v52 = vmul.f32 1.442695, %v1762_v42  ;;  %v1760_v5 = vmin.f32 %v6576_v7, 20.0 }
 0x913   :  { %5323 = vpow2.f32 %v1777_v52  ;;  %v1773_v57 = vmul.f32 1.442695, %v1760_v5 }
 0x914   :  { %v5312_v24 = vpop.eup %5311 }
 0x915   :  { %v1781_v32 = vadd.f32 1.0, %v5312_v24  ;;  %5325 = vpow2.f32 %v1773_v57 }
 0x916   :  { %v5314_v23 = vpop.eup %5313 }
 0x917   :  { %v1779_v36 = vadd.f32 1.0, %v5314_v23  ;;  %v1789_v26 = vmul.f32 %v1781_v32, %v1781_v32 }
 0x918   :  { %v5316_v30 = vpop.eup %5315 }
 0x919   :  { %v1787_v38 = vmul.f32 %v1779_v36, %v1779_v36  ;;  %v1782_v11 = vadd.f32 1.0, %v5316_v30  ;;  %v1813_v59 = vadd.f32 1.0, %v1789_v26  ;;  %v4378_v57 = vadd.f32 -1.0, %v1789_v26 }
 0x91a   :  { %v5318_v31 = vpop.eup %5317 }
 0x91b   :  { %v1811_v28 = vadd.f32 1.0, %v1787_v38  ;;  %v1790_v25 = vmul.f32 %v1782_v11, %v1782_v11  ;;  %v1780_v33 = vadd.f32 1.0, %v5318_v31  ;;  %v4376_v52 = vadd.f32 -1.0, %v1787_v38 }
 0x91c   :  { %v5320_v62 = vpop.eup %5319 }
 0x91d   :  { %v1785_v13 = vadd.f32 1.0, %v5320_v62  ;;  %v1814_v0 = vadd.f32 1.0, %v1790_v25  ;;  %v1788_v29 = vmul.f32 %v1780_v33, %v1780_v33  ;;  %5327 = vrcp.f32 %v1811_v28 }
 0x91e   :  { %v5322_v55 = vpop.eup %5321  ;;  %v4379_v42 = vadd.f32 -1.0, %v1790_v25  ;;  %v1803_v30 = vmul.f32 %v4376_v52, %v6543_v4  ;;  %v1805_v28 = vmul.f32 %v4378_v57, %v6537_v41 }
 0x91f   :  { %v1783_v17 = vadd.f32 1.0, %v5322_v55  ;;  %5329 = vrcp.f32 %v1814_v0  ;;  %v1812_v8 = vadd.f32 1.0, %v1788_v29  ;;  %v1793_v45 = vmul.f32 %v1785_v13, %v1785_v13 }
 0x920   :  { %v5324_v56 = vpop.eup %5323  ;;  %5331 = vrcp.f32 %v1813_v59  ;;  %v4377_v5 = vadd.f32 -1.0, %v1788_v29  ;;  %v1806_v23 = vmul.f32 %v4379_v42, %v6549_v6 }
 0x921   :  { %v1791_v53 = vmul.f32 %v1783_v17, %v1783_v17  ;;  %v1786_v44 = vadd.f32 1.0, %v5324_v56  ;;  %5333 = vrcp.f32 %v1812_v8  ;;  %v1817_v54 = vadd.f32 1.0, %v1793_v45 }
 0x922   :  { %v5326_v27 = vpop.eup %5325  ;;  %v1804_v11 = vmul.f32 %v4377_v5, %v6555_v46  ;;  %v4382_v29 = vadd.f32 -1.0, %v1793_v45 }
 0x923   :  { %v1815_v12 = vadd.f32 1.0, %v1791_v53  ;;  %v1794_v60 = vmul.f32 %v1786_v44, %v1786_v44  ;;  %v1784_v63 = vadd.f32 1.0, %v5326_v27  ;;  %v4380_v55 = vadd.f32 -1.0, %v1791_v53 }
 0x924   :  { %v1809_v53 = vmul.f32 %v4382_v29, %v6561_v1  ;;  %v2135_v1 = vmul.f32 0.0834011, %v6385_v50 }
 0x925   :  { %v1818_v19 = vadd.f32 1.0, %v1794_v60  ;;  %v1792_v20 = vmul.f32 %v1784_v63, %v1784_v63  ;;  %5335 = vrcp.f32 %v1815_v12  ;;  %v4383_v38 = vadd.f32 -1.0, %v1794_v60 }
 0x926   :  { %v1807_v41 = vmul.f32 %v4380_v55, %v6567_v48  ;;  %v2133_v48 = vmul.f32 0.0834011, %v6373_v37  ;;  %v2137_v63 = vmul.f32 0.0834011, %v6397_v34  ;;  %v2140_v37 = vmul.f32 0.0834011, %v6415_v18 }
 0x927   :  { %5337 = vrcp.f32 %v1818_v19  ;;  %v1816_v47 = vadd.f32 1.0, %v1792_v20  ;;  %v4381_v26 = vadd.f32 -1.0, %v1792_v20  ;;  %v1810_v4 = vmul.f32 %v4383_v38, %v6573_v43 }
 0x928   :  { %5339 = vrcp.f32 %v1817_v54  ;;  %2149 = vrot.lane.b32.xlu0 %v2133_v48, %s5685_s12  ;;  %v2138_v54 = vmul.f32 0.0834011, %v6403_v21  ;;  %v2139_v19 = vmul.f32 0.0834011, %v6409_v16 }
 0x929   :  { %5341 = vrcp.f32 %v1816_v47  ;;  %v1808_v56 = vmul.f32 %v4381_v26, %v6576_v7  ;;  %v2134_v7 = vmul.f32 0.0834011, %v6379_v39 }
 0x92a   :  { %v5328_v24 = vpop.eup %5327 }
 0x92b   :  { %v1827_v33 = vmul.f32 %v5328_v24, %v1803_v30  ;;  %2151 = vrot.lane.b32.xlu1 %v2134_v7, %s5685_s12 }
 0x92c   :  { %v5330_v32 = vpop.eup %5329  ;;  %2153 = vrot.lane.b32.xlu0 %v2135_v1, %s5685_s12 }
 0x92d   :  { %v5332_v36 = vpop.eup %5331  ;;  %v1830_v62 = vmul.f32 %v5330_v32, %v1806_v23 }
 0x92e   :  { %v5334_v31 = vpop.eup %5333  ;;  %v1829_v59 = vmul.f32 %v5332_v36, %v1805_v28 }
 0x92f   :  { %v1828_v25 = vmul.f32 %v5334_v31, %v1804_v11 }
 0x930   :  { %v1836_v0 = vpack.c.bf16 %v1830_v62, %v1829_v59  ;;  %2157 = vrot.lane.b32.xlu0 %v2137_v63, %s5685_s12 }
 0x931   :  { %v1835_v13 = vpack.c.bf16 %v1828_v25, %v1827_v33 }
 0x932   :  { %v5336_v17 = vpop.eup %5335 }
 0x933   :  { %4896 = vmatprep.mubr.msk.bf16.mxu0 %vm262_vm2, %v1835_v13  ;;  %v1831_v45 = vmul.f32 %v5336_v17, %v1807_v41 }
 0x934   :  { %v5338_v6 = vpop.eup %5337  ;;  %4897 = vmatmul.mubr.msk.bf16.vlgmr.msra.gmra.mxu0 %vm262_vm2, %v1836_v0  ;;  %2161 = vrot.lane.b32.xlu0 %v2139_v19, %s5685_s12 }
 0x935   :  { %v5340_v46 = vpop.eup %5339  ;;  %4921 = vmatpush3.bf16.msra.mxu0 %v5738_v3  ;;  %v1834_v44 = vmul.f32 %v5338_v6, %v1810_v4 }
 0x936   :  { %v5342_v8 = vpop.eup %5341  ;;  %4946 = vmatprep.subr.bf16.mxu0 %v6273_v35  ;;  %v1833_v12 = vmul.f32 %v5340_v46, %v1809_v53  ;;  %v2136_v35 = vmul.f32 0.0834011, %v6391_v22 }
 0x937   :  { %v1832_v27 = vmul.f32 %v5342_v8, %v1808_v56 }
 0x938   :  { %v1838_v43 = vpack.c.bf16 %v1834_v44, %v1833_v12  ;;  %2155 = vrot.lane.b32.xlu1 %v2136_v35, %s5685_s12 }
 0x939   :  { %v1837_v60 = vpack.c.bf16 %v1832_v27, %v1831_v45 }
 0x93b   :  { %4900 = vmatprep.mubr.msk.bf16.mxu0 %vm262_vm2, %v1837_v60 }
 0x93c   :  { %4901 = vmatmul.mubr.msk.bf16.gmra.mxu0 %vm262_vm2, %v1838_v43  ;;  %2159 = vrot.lane.b32.xlu1 %v2138_v54, %s5685_s12 }
 0x940   :  { %2163 = vrot.lane.b32.xlu1 %v2140_v37, %s5685_s12 }
 0x9f4   :  { %v4898_v39 = vpop.f32.mrf.mxu0 }
 0x9f5   :  { %v6602_v20 = vadd.f32 %v4898_v39, %v5961_v58 }
 0x9f6   :  { %v1885_v50 = vpop.f32.mrf.mxu0 }
 0x9f7   :  { %v1918_v22 = vmin.f32 %v6602_v20, 20.0  ;;  %v6606_v47 = vadd.f32 %v1885_v50, %v5961_v58 }
 0x9f8   :  { %v4899_v34 = vpop.f32.mrf.mxu0 }
 0x9f9   :  { %v1928_v21 = vmul.f32 1.442695, %v1918_v22  ;;  %v1916_v42 = vmin.f32 %v6606_v47, 20.0  ;;  %v6610_v16 = vadd.f32 %v4899_v34, %v5961_v58 }
 0x9fa   :  { %v1888_v18 = vpop.f32.mrf.mxu0 }
 0x9fb   :  { %5343 = vpow2.f32 %v1928_v21  ;;  %v1924_v52 = vmul.f32 1.442695, %v1916_v42  ;;  %v1919_v5 = vmin.f32 %v6610_v16, 20.0  ;;  %v6614_v57 = vadd.f32 %v1888_v18, %v5961_v58 }
 0x9fc   :  { %v4902_v24 = vpop.f32.mrf.mxu0 }
 0x9fd   :  { %5345 = vpow2.f32 %v1924_v52  ;;  %v1930_v32 = vmul.f32 1.442695, %v1919_v5  ;;  %v1917_v23 = vmin.f32 %v6614_v57, 20.0  ;;  %v6618_v36 = vadd.f32 %v4902_v24, %v5961_v58 }
 0x9fe   :  { %v1901_v30 = vpop.f32.mrf.mxu0 }
 0x9ff   :  { %5347 = vpow2.f32 %v1930_v32  ;;  %v1926_v11 = vmul.f32 1.442695, %v1917_v23  ;;  %v1922_v31 = vmin.f32 %v6618_v36, 20.0  ;;  %v6622_v28 = vadd.f32 %v1901_v30, %v5961_v58 }
 0xa00   :  { %v4903_v62 = vpop.f32.mrf.mxu0 }
 0xa01   :  { %5349 = vpow2.f32 %v1926_v11  ;;  %v1936_v33 = vmul.f32 1.442695, %v1922_v31  ;;  %v1920_v25 = vmin.f32 %v6622_v28, 20.0  ;;  %v6626_v59 = vadd.f32 %v4903_v62, %v5961_v58 }
 0xa02   :  { %v1904_v38 = vpop.f32.mrf.mxu0 }
 0xa03   :  { %5351 = vpow2.f32 %v1936_v33  ;;  %v1932_v13 = vmul.f32 1.442695, %v1920_v25  ;;  %v1923_v55 = vmin.f32 %v6626_v59, 20.0  ;;  %v6630_v26 = vadd.f32 %v1904_v38, %v5961_v58 }
 0xa05   :  { %5353 = vpow2.f32 %v1932_v13  ;;  %v1938_v0 = vmul.f32 1.442695, %v1923_v55  ;;  %v1921_v29 = vmin.f32 %v6630_v26, 20.0 }
 0xa07   :  { %5355 = vpow2.f32 %v1938_v0  ;;  %v1934_v17 = vmul.f32 1.442695, %v1921_v29 }
 0xa08   :  { %v5344_v6 = vpop.eup %5343 }
 0xa09   :  { %v1942_v4 = vadd.f32 1.0, %v5344_v6  ;;  %5357 = vpow2.f32 %v1934_v17 }
 0xa0a   :  { %v5346_v46 = vpop.eup %5345 }
 0xa0b   :  { %v1940_v41 = vadd.f32 1.0, %v5346_v46  ;;  %v1950_v8 = vmul.f32 %v1942_v4, %v1942_v4 }
 0xa0c   :  { %v5348_v56 = vpop.eup %5347 }
 0xa0d   :  { %v1948_v53 = vmul.f32 %v1940_v41, %v1940_v41  ;;  %v1943_v44 = vadd.f32 1.0, %v5348_v56  ;;  %v1974_v48 = vadd.f32 1.0, %v1950_v8  ;;  %v4390_v31 = vadd.f32 -1.0, %v1950_v8 }
 0xa0e   :  { %v5350_v45 = vpop.eup %5349 }
 0xa0f   :  { %v1972_v27 = vadd.f32 1.0, %v1948_v53  ;;  %v1951_v60 = vmul.f32 %v1943_v44, %v1943_v44  ;;  %v1941_v43 = vadd.f32 1.0, %v5350_v45  ;;  %v4388_v30 = vadd.f32 -1.0, %v1948_v53 }
 0xa10   :  { %v5352_v12 = vpop.eup %5351  ;;  %v1966_v29 = vmul.f32 %v4390_v31, %v6602_v20  ;;  %v2080_v31 = vmul.f32 0.40291977, %v6493_v61 }
 0xa11   :  { %v1946_v7 = vadd.f32 1.0, %v5352_v12  ;;  %v1975_v35 = vadd.f32 1.0, %v1951_v60  ;;  %v1949_v63 = vmul.f32 %v1941_v43, %v1941_v43  ;;  %5359 = vrcp.f32 %v1972_v27 }
 0xa12   :  { %v5354_v1 = vpop.eup %5353  ;;  %v4391_v23 = vadd.f32 -1.0, %v1951_v60  ;;  %v1964_v13 = vmul.f32 %v4388_v30, %v6606_v47  ;;  %v6645_v60 = vld [vmem:[%s7571_s3 + $0x18] sm:$0xff]  }
 0xa13   :  { %v1944_v54 = vadd.f32 1.0, %v5354_v1  ;;  %5361 = vrcp.f32 %v1975_v35  ;;  %v1973_v37 = vadd.f32 1.0, %v1949_v63  ;;  %v1954_v39 = vmul.f32 %v1946_v7, %v1946_v7 }
 0xa14   :  { %v5356_v19 = vpop.eup %5355  ;;  %5363 = vrcp.f32 %v1974_v48  ;;  %v4389_v11 = vadd.f32 -1.0, %v1949_v63  ;;  %v1967_v25 = vmul.f32 %v4391_v23, %v6610_v16 }
 0xa15   :  { %v1952_v50 = vmul.f32 %v1944_v54, %v1944_v54  ;;  %v1947_v22 = vadd.f32 1.0, %v5356_v19  ;;  %5365 = vrcp.f32 %v1973_v37  ;;  %v1978_v52 = vadd.f32 1.0, %v1954_v39  ;;  %v6659_v54 = vld [vmem:[%s7571_s3 + $0x8] sm:$0xff]   ;;  %v6675_v19 = vld [vmem:[%s7571_s3 + $0x40] sm:$0xf] }
 0xa16   :  { %v5358_v34 = vpop.eup %5357  ;;  %v1965_v55 = vmul.f32 %v4389_v11, %v6614_v57  ;;  %v4394_v45 = vadd.f32 -1.0, %v1954_v39 }
 0xa17   :  { %v1976_v21 = vadd.f32 1.0, %v1952_v50  ;;  %v1955_v42 = vmul.f32 %v1947_v22, %v1947_v22  ;;  %v1945_v18 = vadd.f32 1.0, %v5358_v34  ;;  %v4392_v53 = vadd.f32 -1.0, %v1952_v50  ;;  %v2150_v50 = vpop.permute.xlu0 %2149  ;;  %v2152_v34 = vpop.permute.xlu1 %2151 }
 0xa18   :  { %v1970_v48 = vmul.f32 %v4394_v45, %v6618_v36  ;;  %v6668_v36 = vld [vmem:[%s7571_s3] sm:$0xff]   ;;  %v2083_v45 = vmul.f32 0.40291977, %v6509_v14 }
 0xa19   :  { %v1979_v5 = vadd.f32 1.0, %v1955_v42  ;;  %v1953_v24 = vmul.f32 %v1945_v18, %v1945_v18  ;;  %5367 = vrcp.f32 %v1976_v21  ;;  %v4395_v41 = vadd.f32 -1.0, %v1955_v42 }
 0xa1a   :  { %v1968_v20 = vmul.f32 %v4392_v53, %v6622_v28  ;;  %v2079_v21 = vmul.f32 0.40291977, %v6491_v2  ;;  %v2120_v53 = vmul.f32 0.60286576, %v6493_v61  ;;  %v2081_v61 = vmul.f32 0.40291977, %v6515_v10 }
 0xa1b   :  { %5369 = vrcp.f32 %v1979_v5  ;;  %v1977_v32 = vadd.f32 1.0, %v1953_v24  ;;  %v4393_v8 = vadd.f32 -1.0, %v1953_v24  ;;  %v1971_v47 = vmul.f32 %v4395_v41, %v6626_v59  ;;  %v6652_v59 = vld [vmem:[%s7571_s3 + $0x10] sm:$0xff]  }
 0xa1c   :  { %5371 = vrcp.f32 %v1978_v52  ;;  %v2077_v24 = vmul.f32 0.40291977, %v6496_v49  ;;  %v2119_v41 = vmul.f32 0.60286576, %v6491_v2 }
 0xa1d   :  { %5373 = vrcp.f32 %v1977_v32  ;;  %v1969_v12 = vmul.f32 %v4393_v8, %v6630_v26 }
 0xa1e   :  { %v5360_v62 = vpop.eup %5359 }
 0xa1f   :  { %v1988_v6 = vmul.f32 %v5360_v62, %v1964_v13  ;;  %v2078_v13 = vmul.f32 0.40291977, %v6498_v40 }
 0xa20   :  { %v5362_v33 = vpop.eup %5361 }
 0xa21   :  { %v5364_v38 = vpop.eup %5363  ;;  %v1991_v17 = vmul.f32 %v5362_v33, %v1967_v25  ;;  %v2154_v25 = vpop.permute.xlu0 %2153 }
 0xa22   :  { %v5366_v0 = vpop.eup %5365  ;;  %v1990_v46 = vmul.f32 %v5364_v38, %v1966_v29 }
 0xa23   :  { %v1989_v4 = vmul.f32 %v5366_v0, %v1965_v55  ;;  %v2156_v0 = vpop.permute.xlu1 %2155 }
 0xa24   :  { %v1997_v44 = vpack.c.bf16 %v1991_v17, %v1990_v46  ;;  %v2117_v46 = vmul.f32 0.60286576, %v6496_v49 }
 0xa25   :  { %v1996_v56 = vpack.c.bf16 %v1989_v4, %v1988_v6 }
 0xa26   :  { %v5368_v27 = vpop.eup %5367 }
 0xa27   :  { %4912 = vmatprep.mubr.msk.bf16.mxu1 %vm262_vm2, %v1996_v56  ;;  %v1992_v28 = vmul.f32 %v5368_v27, %v1968_v20 }
 0xa28   :  { %v5370_v16 = vpop.eup %5369  ;;  %4913 = vmatmul.mubr.msk.bf16.vlgmr.msra.gmra.mxu1 %vm262_vm2, %v1997_v44 }
 0xa29   :  { %v5372_v57 = vpop.eup %5371  ;;  %4931 = vmatpush3.bf16.msra.mxu1 %v6645_v60  ;;  %v1995_v7 = vmul.f32 %v5370_v16, %v1971_v47  ;;  %v2118_v16 = vmul.f32 0.60286576, %v6498_v40  ;;  %v2160_v40 = vpop.permute.xlu1 %2159 }
 0xa2a   :  { %v5374_v43 = vpop.eup %5373  ;;  %4932 = vmatprep.subr.bf16.mxu1 %v6652_v59  ;;  %v1994_v1 = vmul.f32 %v5372_v57, %v1970_v48 }
 0xa2b   :  { %v1993_v26 = vmul.f32 %v5374_v43, %v1969_v12  ;;  %v2123_v12 = vmul.f32 0.60286576, %v6509_v14 }
 0xa2c   :  { %v1999_v63 = vpack.c.bf16 %v1995_v7, %v1994_v1  ;;  %v2158_v7 = vpop.permute.xlu0 %2157 }
 0xa2d   :  { %v1998_v35 = vpack.c.bf16 %v1993_v26, %v1992_v28  ;;  %4933 = vmatpush3.bf16.msra.mxu1 %v6652_v59  ;;  %v2084_v26 = vmul.f32 0.40291977, %v6511_v51 }
 0xa2e   :  { %4934 = vmatprep.subr.bf16.mxu1 %v6659_v54 }
 0xa2f   :  { %4916 = vmatprep.mubr.msk.bf16.mxu1 %vm262_vm2, %v1998_v35 }
 0xa30   :  { %4917 = vmatmul.mubr.msk.bf16.gmra.mxu1 %vm262_vm2, %v1999_v63 }
 0xa31   :  { %4935 = vmatpush3.bf16.msra.mxu1 %v6659_v54 }
 0xa32   :  { %4936 = vmatprep.subr.bf16.mxu1 %v6668_v36 }
 0xa35   :  { %4937 = vmatpush3.bf16.msra.mxu1 %v6668_v36 }
 0xa36   :  { %5101 = vmatprep.subr.msk.bf16.mxu1 %vm81_vm0, %v6675_v19 }
 0xae8   :  { %v4914_v37 = vpop.f32.mrf.mxu1 }
 0xae9   :  { %v2055_v39 = vadd.f32 %v4914_v37, %v6018_v15 }
 0xaea   :  { %v2046_v22 = vpop.f32.mrf.mxu1 }
 0xaeb   :  { %v2087_v42 = vmul.f32 0.068182155, %v2055_v39  ;;  %v2047_v18 = vadd.f32 %v2046_v22, %v6018_v15 }
 0xaec   :  { %v4915_v52 = vpop.f32.mrf.mxu1 }
 0xaed   :  { %v2095_v5 = vsub.f32 %v2079_v21, %v2087_v42  ;;  %v2085_v32 = vmul.f32 0.068182155, %v2047_v18  ;;  %v2058_v23 = vadd.f32 %v4915_v52, %v6018_v15  ;;  %v2082_v18 = vmul.f32 0.40291977, %v6517_v9 }
 0xaee   :  { %v2049_v30 = vpop.f32.mrf.mxu1 }
 0xaef   :  { %v2093_v11 = vsub.f32 %v2077_v24, %v2085_v32  ;;  %v2088_v62 = vmul.f32 0.068182155, %v2058_v23  ;;  %v2050_v33 = vadd.f32 %v2049_v30, %v6018_v15  ;;  %v4402_v38 = vclamps-f32 %v2095_v5, 0.39710897 }
 0xaf0   :  { %v4918_v55 = vpop.f32.mrf.mxu1 }
 0xaf1   :  { %v4400_v29 = vclamps-f32 %v2093_v11, 0.39710897  ;;  %v2096_v17 = vsub.f32 %v2080_v31, %v2088_v62  ;;  %v2086_v6 = vmul.f32 0.068182155, %v2050_v33  ;;  %v2071_v4 = vadd.f32 %v4918_v55, %v6018_v15 }
 0xaf2   :  { %v2062_v56 = vpop.f32.mrf.mxu1  ;;  %v2127_v47 = vadd.f32 %v4402_v38, %v2119_v41  ;;  %v2121_v11 = vmul.f32 0.60286576, %v6515_v10  ;;  %v2124_v31 = vmul.f32 0.60286576, %v6511_v51 }
 0xaf3   :  { %v4403_v8 = vclamps-f32 %v2096_v17, 0.39710897  ;;  %v2094_v44 = vsub.f32 %v2078_v13, %v2086_v6  ;;  %v2091_v27 = vmul.f32 0.068182155, %v2071_v4  ;;  %v2063_v57 = vadd.f32 %v2062_v56, %v6018_v15  ;;  %v2164_v13 = vpop.permute.xlu1 %2163  ;;  %v6724_v6 = vld [vmem:[%s7571_s3 + $0x38] sm:$0xff]  }
 0xaf4   :  { %v4919_v20 = vpop.f32.mrf.mxu1  ;;  %v2125_v43 = vadd.f32 %v4400_v29, %v2117_v46  ;;  %v6699_v14 = vadd.f32 %v2154_v25, %v2127_v47 }
 0xaf5   :  { %v4401_v49 = vclamps-f32 %v2094_v44, 0.39710897  ;;  %v2099_v48 = vsub.f32 %v2083_v45, %v2091_v27  ;;  %v2074_v2 = vadd.f32 %v4919_v20, %v6018_v15  ;;  %v2089_v28 = vmul.f32 0.068182155, %v2063_v57  ;;  %v4410_v44 = vld [vmem:[%s7573_s2 + $0xd0] sm:$0xff]  ;;  %v4408_v27 = vld [vmem:[%s7573_s2 + $0xc0] sm:$0xff] }
 0xaf6   :  { %v2128_v1 = vadd.f32 %v4403_v8, %v2120_v53  ;;  %v2065_v35 = vpop.f32.mrf.mxu1  ;;  %v6704_v52 = vadd.f32 %v2150_v50, %v2125_v43  ;;  %v2162_v50 = vpop.permute.xlu0 %2161  ;;  %v6745_v53 = vld [vmem:[%s7571_s3 + $0x28] sm:$0xff]   ;;  %v6754_v8 = vld [vmem:[%s7571_s3 + $0x20] sm:$0xff]   ;;  %v4411_v57 = vld [vmem:[%s7573_s2 + $0xd8] sm:$0xff] }
 0xaf7   :  { %v4406_v63 = vclamps-f32 %v2099_v48, 0.39710897  ;;  %v2126_v37 = vadd.f32 %v4401_v49, %v2118_v16  ;;  %v2092_v39 = vmul.f32 0.068182155, %v2074_v2  ;;  %v2066_v22 = vadd.f32 %v2065_v35, %v6018_v15  ;;  %v4409_v49 = vld [vmem:[%s7573_s2 + $0xc8] sm:$0xff] }
 0xaf8   :  { %v2097_v21 = vsub.f32 %v2081_v61, %v2089_v28  ;;  %v6701_v42 = vadd.f32 %v2156_v0, %v2128_v1  ;;  %v2122_v0 = vmul.f32 0.60286576, %v6517_v9  ;;  %v6730_v9 = vld [vmem:[%s7571_s3 + $0x30] sm:$0xff]  }
 0xaf9   :  { %v6706_v5 = vadd.f32 %v2152_v34, %v2126_v37  ;;  %v2100_v24 = vsub.f32 %v2084_v26, %v2092_v39  ;;  %v2090_v32 = vmul.f32 0.068182155, %v2066_v22  ;;  %v2131_v38 = vadd.f32 %v4406_v63, %v2123_v12  ;;  %v4414_v28 = vld [vmem:[%s7573_s2 + $0xf0] sm:$0xff]  ;;  %v4412_v63 = vld [vmem:[%s7573_s2 + $0xe0] sm:$0xff] }
 0xafa   :  { %v4404_v23 = vclamps-f32 %v2097_v21, 0.39710897  ;;  %v2191_v30 = vpack.c.bf16 %v6701_v42, %v6699_v14 }
 0xafb   :  { %v2190_v62 = vpack.c.bf16 %v6706_v5, %v6704_v52  ;;  %v4407_v33 = vclamps-f32 %v2100_v24, 0.39710897  ;;  %v2098_v25 = vsub.f32 %v2082_v18, %v2090_v32  ;;  %v6717_v17 = vadd.f32 %v2162_v50, %v2131_v38  ;;  %v4415_v18 = vld [vmem:[%s7573_s2 + $0xf8] sm:$0xff] }
 0xafc   :  { %v2129_v34 = vadd.f32 %v4404_v23, %v2121_v11  ;;  %v4413_v11 = vld [vmem:[%s7573_s2 + $0xe8] sm:$0xff] }
 0xafd   :  { %v4405_v55 = vclamps-f32 %v2098_v25, 0.39710897  ;;  %4922 = vmatprep.mubr.msk.bf16.mxu0 %vm68_vm1, %v2190_v62  ;;  %v2132_v29 = vadd.f32 %v4407_v33, %v2124_v31 }
 0xafe   :  { %4923 = vmatmul.mubr.msk.bf16.vlgmr.msra.gmra.mxu0 %vm68_vm1, %v2191_v30  ;;  %v6733_v4 = vadd.f32 %v2158_v7, %v2129_v34 }
 0xaff   :  { %v2130_v10 = vadd.f32 %v4405_v55, %v2122_v0  ;;  %v6719_v51 = vadd.f32 %v2164_v13, %v2132_v29  ;;  %4947 = vmatpush3.bf16.msra.mxu0 %v6724_v6 }
 0xb00   :  { %4948 = vmatprep.subr.bf16.mxu0 %v6730_v9 }
 0xb01   :  { %v6735_v46 = vadd.f32 %v2160_v40, %v2130_v10  ;;  %v2193_v41 = vpack.c.bf16 %v6719_v51, %v6717_v17 }
 0xb03   :  { %v2192_v56 = vpack.c.bf16 %v6735_v46, %v6733_v4  ;;  %4949 = vmatpush3.bf16.msra.mxu0 %v6730_v9 }
 0xb04   :  { %4950 = vmatprep.subr.bf16.mxu0 %v6745_v53 }
 0xb05   :  { %4926 = vmatprep.mubr.msk.bf16.mxu0 %vm68_vm1, %v2192_v56 }
 0xb06   :  { %4927 = vmatmul.mubr.msk.bf16.gmra.mxu0 %vm68_vm1, %v2193_v41 }
 0xb07   :  { %4951 = vmatpush3.bf16.msra.mxu0 %v6745_v53 }
 0xb08   :  { %4952 = vmatprep.subr.bf16.mxu0 %v6754_v8 }
 0xb0b   :  { %4953 = vmatpush3.bf16.msra.mxu0 %v6754_v8 }
 0xb0c   :  { %4972 = vmatprep.subr.bf16.mxu0 %v6645_v60 }
 0xbbe   :  { %v4924_v45 = vpop.f32.mrf.mxu0 }
 0xbbf   :  { %v6765_v16 = vadd.f32 %v4924_v45, %v4410_v44 }
 0xbc0   :  { %v2240_v47 = vpop.f32.mrf.mxu0 }
 0xbc1   :  { %v2273_v20 = vmin.f32 %v6765_v16, 20.0  ;;  %v6771_v12 = vadd.f32 %v4408_v27, %v2240_v47 }
 0xbc2   :  { %v4925_v43 = vpop.f32.mrf.mxu0 }
 0xbc3   :  { %v2283_v48 = vmul.f32 1.442695, %v2273_v20  ;;  %v2271_v2 = vmin.f32 %v6771_v12, 20.0  ;;  %v6777_v7 = vadd.f32 %v4925_v43, %v4411_v57 }
 0xbc4   :  { %v2243_v61 = vpop.f32.mrf.mxu0 }
 0xbc5   :  { %5375 = vpow2.f32 %v2283_v48  ;;  %v2279_v26 = vmul.f32 1.442695, %v2271_v2  ;;  %v2274_v1 = vmin.f32 %v6777_v7, 20.0  ;;  %v6783_v35 = vadd.f32 %v4409_v49, %v2243_v61 }
 0xbc6   :  { %v4928_v40 = vpop.f32.mrf.mxu0 }
 0xbc7   :  { %5377 = vpow2.f32 %v2279_v26  ;;  %v2285_v37 = vmul.f32 1.442695, %v2274_v1  ;;  %v2272_v39 = vmin.f32 %v6783_v35, 20.0  ;;  %v6789_v22 = vadd.f32 %v4928_v40, %v4414_v28 }
 0xbc8   :  { %v2256_v21 = vpop.f32.mrf.mxu0 }
 0xbc9   :  { %5379 = vpow2.f32 %v2285_v37  ;;  %v2281_v24 = vmul.f32 1.442695, %v2272_v39  ;;  %v2277_v32 = vmin.f32 %v6789_v22, 20.0  ;;  %v6795_v23 = vadd.f32 %v4412_v63, %v2256_v21 }
 0xbca   :  { %v4929_v30 = vpop.f32.mrf.mxu0 }
 0xbcb   :  { %5381 = vpow2.f32 %v2281_v24  ;;  %v2291_v31 = vmul.f32 1.442695, %v2277_v32  ;;  %v2275_v62 = vmin.f32 %v6795_v23, 20.0  ;;  %v6801_v33 = vadd.f32 %v4929_v30, %v4415_v18 }
 0xbcc   :  { %v2259_v25 = vpop.f32.mrf.mxu0 }
 0xbcd   :  { %5383 = vpow2.f32 %v2291_v31  ;;  %v2287_v38 = vmul.f32 1.442695, %v2275_v62  ;;  %v2278_v50 = vmin.f32 %v6801_v33, 20.0  ;;  %v6804_v13 = vadd.f32 %v4413_v11, %v2259_v25 }
 0xbcf   :  { %5385 = vpow2.f32 %v2287_v38  ;;  %v2293_v34 = vmul.f32 1.442695, %v2278_v50  ;;  %v2276_v55 = vmin.f32 %v6804_v13, 20.0 }
 0xbd1   :  { %5387 = vpow2.f32 %v2293_v34  ;;  %v2289_v0 = vmul.f32 1.442695, %v2276_v55 }
 0xbd2   :  { %v5376_v29 = vpop.eup %5375 }
 0xbd3   :  { %v2297_v10 = vadd.f32 1.0, %v5376_v29  ;;  %5389 = vpow2.f32 %v2289_v0 }
 0xbd4   :  { %v5378_v41 = vpop.eup %5377 }
 0xbd5   :  { %v2295_v56 = vadd.f32 1.0, %v5378_v41  ;;  %v2305_v45 = vmul.f32 %v2297_v10, %v2297_v10 }
 0xbd6   :  { %v5380_v44 = vpop.eup %5379 }
 0xbd7   :  { %v2303_v27 = vmul.f32 %v2295_v56, %v2295_v56  ;;  %v2298_v47 = vadd.f32 1.0, %v5380_v44  ;;  %v2329_v2 = vadd.f32 1.0, %v2305_v45  ;;  %v4422_v0 = vadd.f32 -1.0, %v2305_v45 }
 0xbd8   :  { %v5382_v57 = vpop.eup %5381 }
 0xbd9   :  { %v2327_v20 = vadd.f32 1.0, %v2303_v27  ;;  %v2306_v49 = vmul.f32 %v2298_v47, %v2298_v47  ;;  %v2296_v48 = vadd.f32 1.0, %v5382_v57  ;;  %v4420_v34 = vadd.f32 -1.0, %v2303_v27 }
 0xbda   :  { %v5384_v43 = vpop.eup %5383 }
 0xbdb   :  { %v2301_v61 = vadd.f32 1.0, %v5384_v43  ;;  %v2330_v26 = vadd.f32 1.0, %v2306_v49  ;;  %v2304_v1 = vmul.f32 %v2296_v48, %v2296_v48  ;;  %5391 = vrcp.f32 %v2327_v20 }
 0xbdc   :  { %v5386_v28 = vpop.eup %5385  ;;  %v4423_v50 = vadd.f32 -1.0, %v2306_v49  ;;  %v2319_v44 = vmul.f32 %v4420_v34, %v6771_v12  ;;  %v2321_v20 = vmul.f32 %v4422_v0, %v6765_v16 }
 0xbdd   :  { %v2299_v40 = vadd.f32 1.0, %v5386_v28  ;;  %5393 = vrcp.f32 %v2330_v26  ;;  %v2328_v37 = vadd.f32 1.0, %v2304_v1  ;;  %v2309_v39 = vmul.f32 %v2301_v61, %v2301_v61 }
 0xbde   :  { %v5388_v63 = vpop.eup %5387  ;;  %5395 = vrcp.f32 %v2329_v2  ;;  %v4421_v55 = vadd.f32 -1.0, %v2304_v1  ;;  %v2322_v41 = vmul.f32 %v4423_v50, %v6777_v7  ;;  %v6848_v50 = vld [vmem:[%s7574_s1 + $0x20] sm:$0xff] }
 0xbdf   :  { %v2307_v21 = vmul.f32 %v2299_v40, %v2299_v40  ;;  %v2302_v18 = vadd.f32 1.0, %v5388_v63  ;;  %5397 = vrcp.f32 %v2328_v37  ;;  %v2333_v31 = vadd.f32 1.0, %v2309_v39 }
 0xbe0   :  { %v5390_v24 = vpop.eup %5389  ;;  %v2320_v47 = vmul.f32 %v4421_v55, %v6783_v35  ;;  %v4426_v1 = vadd.f32 -1.0, %v2309_v39  ;;  %v2653_v34 = vmul.f32 0.06616965, %v6848_v50  ;;  %v6854_v55 = vld [vmem:[%s7574_s1 + $0x28] sm:$0xff] }
 0xbe1   :  { %v2331_v32 = vadd.f32 1.0, %v2307_v21  ;;  %v2310_v30 = vmul.f32 %v2302_v18, %v2302_v18  ;;  %v2300_v11 = vadd.f32 1.0, %v5390_v24  ;;  %v4424_v28 = vadd.f32 -1.0, %v2307_v21 }
 0xbe2   :  { %v2325_v21 = vmul.f32 %v4426_v1, %v6789_v22  ;;  %v6830_v22 = vld [vmem:[%s7574_s1 + $0x8] sm:$0xff]  ;;  %v2654_v0 = vmul.f32 0.06616965, %v6854_v55 }
 0xbe3   :  { %v2334_v62 = vadd.f32 1.0, %v2310_v30  ;;  %v2308_v25 = vmul.f32 %v2300_v11, %v2300_v11  ;;  %5399 = vrcp.f32 %v2331_v32  ;;  %v4427_v27 = vadd.f32 -1.0, %v2310_v30 }
 0xbe4   :  { %v2323_v16 = vmul.f32 %v4424_v28, %v6795_v23  ;;  %v6824_v23 = vld [vmem:[%s7574_s1] sm:$0xff]  ;;  %v2650_v11 = vmul.f32 0.06616965, %v6830_v22 }
 0xbe5   :  { %5401 = vrcp.f32 %v2334_v62  ;;  %v2332_v38 = vadd.f32 1.0, %v2308_v25  ;;  %v4425_v45 = vadd.f32 -1.0, %v2308_v25  ;;  %v2326_v12 = vmul.f32 %v4427_v27, %v6801_v33  ;;  %v6842_v25 = vld [vmem:[%s7574_s1 + $0x18] sm:$0xff] }
 0xbe6   :  { %5403 = vrcp.f32 %v2333_v31  ;;  %2667 = vrot.lane.b32.xlu1 %v2650_v11, %s5686_s23  ;;  %v6836_v31 = vld [vmem:[%s7574_s1 + $0x10] sm:$0xff] }
 0xbe7   :  { %5405 = vrcp.f32 %v2332_v38  ;;  %v2324_v63 = vmul.f32 %v4425_v45, %v6804_v13  ;;  %v2649_v13 = vmul.f32 0.06616965, %v6824_v23  ;;  %v2651_v62 = vmul.f32 0.06616965, %v6836_v31 }
 0xbe8   :  { %v5392_v29 = vpop.eup %5391  ;;  %v2652_v38 = vmul.f32 0.06616965, %v6842_v25 }
 0xbe9   :  { %v2343_v48 = vmul.f32 %v5392_v29, %v2319_v44  ;;  %2665 = vrot.lane.b32.xlu0 %v2649_v13, %s5686_s23  ;;  %v6860_v29 = vld [vmem:[%s7574_s1 + $0x30] sm:$0xff] }
 0xbea   :  { %v5394_v10 = vpop.eup %5393  ;;  %2671 = vrot.lane.b32.xlu1 %v2652_v38, %s5686_s23 }
 0xbeb   :  { %v5396_v56 = vpop.eup %5395  ;;  %v2346_v43 = vmul.f32 %v5394_v10, %v2322_v41  ;;  %v2655_v10 = vmul.f32 0.06616965, %v6860_v29  ;;  %v6866_v41 = vld [vmem:[%s7574_s1 + $0x38] sm:$0xff] }
 0xbec   :  { %v5398_v57 = vpop.eup %5397  ;;  %v2345_v2 = vmul.f32 %v5396_v56, %v2321_v20  ;;  %v2656_v56 = vmul.f32 0.06616965, %v6866_v41 }
 0xbed   :  { %v2344_v49 = vmul.f32 %v5398_v57, %v2320_v47  ;;  %2669 = vrot.lane.b32.xlu0 %v2651_v62, %s5686_s23 }
 0xbee   :  { %v2352_v26 = vpack.c.bf16 %v2346_v43, %v2345_v2  ;;  %2675 = vrot.lane.b32.xlu1 %v2654_v0, %s5686_s23 }
 0xbef   :  { %v2351_v61 = vpack.c.bf16 %v2344_v49, %v2343_v48 }
 0xbf0   :  { %v5400_v40 = vpop.eup %5399 }
 0xbf1   :  { %4938 = vmatprep.mubr.msk.bf16.mxu1 %vm262_vm2, %v2351_v61  ;;  %v2347_v39 = vmul.f32 %v5400_v40, %v2323_v16  ;;  %2673 = vrot.lane.b32.xlu0 %v2653_v34, %s5686_s23 }
 0xbf2   :  { %v5402_v7 = vpop.eup %5401  ;;  %4939 = vmatmul.mubr.msk.bf16.vlgmr.msra.gmra.mxu1 %vm262_vm2, %v2352_v26  ;;  %2679 = vrot.lane.b32.xlu1 %v2656_v56, %s5686_s23 }
 0xbf3   :  { %v5404_v35 = vpop.eup %5403  ;;  %4963 = vmatpush3.bf16.msra.mxu1 %v5738_v3  ;;  %v2350_v18 = vmul.f32 %v5402_v7, %v2326_v12 }
 0xbf4   :  { %v5406_v37 = vpop.eup %5405  ;;  %4988 = vmatprep.subr.bf16.mxu1 %v6724_v6  ;;  %v2349_v32 = vmul.f32 %v5404_v35, %v2325_v21 }
 0xbf5   :  { %v2348_v24 = vmul.f32 %v5406_v37, %v2324_v63  ;;  %2677 = vrot.lane.b32.xlu0 %v2655_v10, %s5686_s23 }
 0xbf6   :  { %v2354_v33 = vpack.c.bf16 %v2350_v18, %v2349_v32 }
 0xbf7   :  { %v2353_v30 = vpack.c.bf16 %v2348_v24, %v2347_v39 }
 0xbf9   :  { %4942 = vmatprep.mubr.msk.bf16.mxu1 %vm262_vm2, %v2353_v30 }
 0xbfa   :  { %4943 = vmatmul.mubr.msk.bf16.gmra.mxu1 %vm262_vm2, %v2354_v33 }
 0xcb2   :  { %v4940_v44 = vpop.f32.mrf.mxu1 }
 0xcb3   :  { %v6870_v47 = vadd.f32 %v4940_v44, %v5961_v58 }
 0xcb4   :  { %v2401_v57 = vpop.f32.mrf.mxu1 }
 0xcb5   :  { %v2434_v20 = vmin.f32 %v6870_v47, 20.0  ;;  %v6874_v43 = vadd.f32 %v2401_v57, %v5961_v58 }
 0xcb6   :  { %v4941_v48 = vpop.f32.mrf.mxu1 }
 0xcb7   :  { %v2444_v49 = vmul.f32 1.442695, %v2434_v20  ;;  %v2432_v2 = vmin.f32 %v6874_v43, 20.0  ;;  %v6878_v27 = vadd.f32 %v4941_v48, %v5961_v58 }
 0xcb8   :  { %v2404_v61 = vpop.f32.mrf.mxu1 }
 0xcb9   :  { %5407 = vpow2.f32 %v2444_v49  ;;  %v2440_v28 = vmul.f32 1.442695, %v2432_v2  ;;  %v2435_v45 = vmin.f32 %v6878_v27, 20.0  ;;  %v6882_v26 = vadd.f32 %v2404_v61, %v5961_v58 }
 0xcba   :  { %v4944_v1 = vpop.f32.mrf.mxu1 }
 0xcbb   :  { %5409 = vpow2.f32 %v2440_v28  ;;  %v2446_v40 = vmul.f32 1.442695, %v2435_v45  ;;  %v2433_v7 = vmin.f32 %v6882_v26, 20.0  ;;  %v6886_v12 = vadd.f32 %v4944_v1, %v5961_v58 }
 0xcbc   :  { %v2417_v35 = vpop.f32.mrf.mxu1 }
 0xcbd   :  { %5411 = vpow2.f32 %v2446_v40  ;;  %v2442_v16 = vmul.f32 1.442695, %v2433_v7  ;;  %v2438_v63 = vmin.f32 %v6886_v12, 20.0  ;;  %v6890_v37 = vadd.f32 %v2417_v35, %v5961_v58 }
 0xcbe   :  { %v4945_v21 = vpop.f32.mrf.mxu1 }
 0xcbf   :  { %5413 = vpow2.f32 %v2442_v16  ;;  %v2452_v18 = vmul.f32 1.442695, %v2438_v63  ;;  %v2436_v39 = vmin.f32 %v6890_v37, 20.0  ;;  %v6894_v24 = vadd.f32 %v4945_v21, %v5961_v58 }
 0xcc0   :  { %v2420_v32 = vpop.f32.mrf.mxu1 }
 0xcc1   :  { %5415 = vpow2.f32 %v2452_v18  ;;  %v2448_v30 = vmul.f32 1.442695, %v2436_v39  ;;  %v2439_v33 = vmin.f32 %v6894_v24, 20.0  ;;  %v6898_v13 = vadd.f32 %v2420_v32, %v5961_v58 }
 0xcc3   :  { %5417 = vpow2.f32 %v2448_v30  ;;  %v2454_v11 = vmul.f32 1.442695, %v2439_v33  ;;  %v2437_v62 = vmin.f32 %v6898_v13, 20.0 }
 0xcc5   :  { %5419 = vpow2.f32 %v2454_v11  ;;  %v2450_v38 = vmul.f32 1.442695, %v2437_v62 }
 0xcc6   :  { %v5408_v34 = vpop.eup %5407 }
 0xcc7   :  { %v2458_v0 = vadd.f32 1.0, %v5408_v34  ;;  %5421 = vpow2.f32 %v2450_v38 }
 0xcc8   :  { %v5410_v10 = vpop.eup %5409 }
 0xcc9   :  { %v2456_v56 = vadd.f32 1.0, %v5410_v10  ;;  %v2466_v57 = vmul.f32 %v2458_v0, %v2458_v0 }
 0xcca   :  { %v5412_v44 = vpop.eup %5411 }
 0xccb   :  { %v2464_v20 = vmul.f32 %v2456_v56, %v2456_v56  ;;  %v2459_v48 = vadd.f32 1.0, %v5412_v44  ;;  %v2490_v1 = vadd.f32 1.0, %v2466_v57 }
 0xccc   :  { %v5414_v49 = vpop.eup %5413 }
 0xccd   :  { %v2488_v2 = vadd.f32 1.0, %v2464_v20  ;;  %v2467_v28 = vmul.f32 %v2459_v48, %v2459_v48  ;;  %v2457_v45 = vadd.f32 1.0, %v5414_v49  ;;  %v4432_v48 = vadd.f32 -1.0, %v2464_v20 }
 0xcce   :  { %v5416_v61 = vpop.eup %5415 }
 0xccf   :  { %v2462_v40 = vadd.f32 1.0, %v5416_v61  ;;  %v2491_v35 = vadd.f32 1.0, %v2467_v28  ;;  %v2465_v16 = vmul.f32 %v2457_v45, %v2457_v45  ;;  %5423 = vrcp.f32 %v2488_v2 }
 0xcd0   :  { %v5418_v7 = vpop.eup %5417  ;;  %v4435_v44 = vadd.f32 -1.0, %v2467_v28  ;;  %v4434_v2 = vadd.f32 -1.0, %v2466_v57 }
 0xcd1   :  { %v2460_v63 = vadd.f32 1.0, %v5418_v7  ;;  %5425 = vrcp.f32 %v2491_v35  ;;  %v2489_v18 = vadd.f32 1.0, %v2465_v16  ;;  %v2470_v39 = vmul.f32 %v2462_v40, %v2462_v40 }
 0xcd2   :  { %v5420_v21 = vpop.eup %5419  ;;  %5427 = vrcp.f32 %v2490_v1  ;;  %v4433_v49 = vadd.f32 -1.0, %v2465_v16  ;;  %v2483_v1 = vmul.f32 %v4435_v44, %v6878_v27  ;;  %v2480_v7 = vmul.f32 %v4432_v48, %v6874_v43 }
 0xcd3   :  { %v2468_v32 = vmul.f32 %v2460_v63, %v2460_v63  ;;  %v2463_v30 = vadd.f32 1.0, %v5420_v21  ;;  %5429 = vrcp.f32 %v2489_v18  ;;  %v2494_v34 = vadd.f32 1.0, %v2470_v39 }
 0xcd4   :  { %v5422_v33 = vpop.eup %5421  ;;  %v2481_v35 = vmul.f32 %v4433_v49, %v6882_v26  ;;  %v2482_v21 = vmul.f32 %v4434_v2, %v6870_v47  ;;  %v2668_v2 = vpop.permute.xlu1 %2667 }
 0xcd5   :  { %v2492_v11 = vadd.f32 1.0, %v2468_v32  ;;  %v2471_v62 = vmul.f32 %v2463_v30, %v2463_v30  ;;  %v2461_v38 = vadd.f32 1.0, %v5422_v33 }
 0xcd7   :  { %v2495_v0 = vadd.f32 1.0, %v2471_v62  ;;  %v2469_v10 = vmul.f32 %v2461_v38, %v2461_v38  ;;  %5431 = vrcp.f32 %v2492_v11  ;;  %v4439_v20 = vadd.f32 -1.0, %v2471_v62 }
 0xcd8   :  { %v4436_v11 = vadd.f32 -1.0, %v2468_v32 }
 0xcd9   :  { %5433 = vrcp.f32 %v2495_v0  ;;  %v2493_v56 = vadd.f32 1.0, %v2469_v10  ;;  %v4437_v57 = vadd.f32 -1.0, %v2469_v10  ;;  %v2487_v43 = vmul.f32 %v4439_v20, %v6894_v24 }
 0xcda   :  { %5435 = vrcp.f32 %v2494_v34  ;;  %v4438_v34 = vadd.f32 -1.0, %v2470_v39  ;;  %v2484_v47 = vmul.f32 %v4436_v11, %v6890_v37  ;;  %v2594_v20 = vmul.f32 0.49910325, %v6706_v5  ;;  %v2672_v11 = vpop.permute.xlu1 %2671 }
 0xcdb   :  { %5437 = vrcp.f32 %v2493_v56  ;;  %v2485_v56 = vmul.f32 %v4437_v57, %v6898_v13 }
 0xcdc   :  { %v5424_v61 = vpop.eup %5423  ;;  %v2486_v32 = vmul.f32 %v4438_v34, %v6886_v12 }
 0xcdd   :  { %v2504_v30 = vmul.f32 %v5424_v61, %v2480_v7  ;;  %v2595_v61 = vmul.f32 0.49910325, %v6699_v14  ;;  %v2593_v7 = vmul.f32 0.49910325, %v6704_v52 }
 0xcde   :  { %v5426_v45 = vpop.eup %5425 }
 0xcdf   :  { %v5428_v40 = vpop.eup %5427  ;;  %v2507_v18 = vmul.f32 %v5426_v45, %v2483_v1 }
 0xce0   :  { %v5430_v63 = vpop.eup %5429  ;;  %v2506_v33 = vmul.f32 %v5428_v40, %v2482_v21  ;;  %v2596_v21 = vmul.f32 0.49910325, %v6701_v42 }
 0xce1   :  { %v2505_v28 = vmul.f32 %v5430_v63, %v2481_v35 }
 0xce2   :  { %v2513_v38 = vpack.c.bf16 %v2507_v18, %v2506_v33 }
 0xce3   :  { %v2512_v16 = vpack.c.bf16 %v2505_v28, %v2504_v30 }
 0xce4   :  { %v5432_v0 = vpop.eup %5431 }
 0xce5   :  { %4954 = vmatprep.mubr.msk.bf16.mxu0 %vm262_vm2, %v2512_v16  ;;  %v2508_v39 = vmul.f32 %v5432_v0, %v2484_v47  ;;  %v2636_v47 = vmul.f32 0.5052392, %v6701_v42  ;;  %v2597_v42 = vmul.f32 0.49910325, %v6733_v4 }
 0xce6   :  { %v5434_v27 = vpop.eup %5433  ;;  %4955 = vmatmul.mubr.msk.bf16.vlgmr.msra.gmra.mxu0 %vm262_vm2, %v2513_v38 }
 0xce7   :  { %v5436_v26 = vpop.eup %5435  ;;  %4973 = vmatpush3.bf16.msra.mxu0 %v6645_v60  ;;  %v2511_v10 = vmul.f32 %v5434_v27, %v2487_v43  ;;  %v2633_v27 = vmul.f32 0.5052392, %v6704_v52  ;;  %v2635_v43 = vmul.f32 0.5052392, %v6699_v14 }
 0xce8   :  { %v5438_v62 = vpop.eup %5437  ;;  %4974 = vmatprep.subr.bf16.mxu0 %v6652_v59  ;;  %v2510_v48 = vmul.f32 %v5436_v26, %v2486_v32  ;;  %v2599_v32 = vmul.f32 0.49910325, %v6717_v17 }
 0xce9   :  { %v2509_v44 = vmul.f32 %v5438_v62, %v2485_v56 }
 0xcea   :  { %v2515_v24 = vpack.c.bf16 %v2511_v10, %v2510_v48 }
 0xceb   :  { %v2514_v49 = vpack.c.bf16 %v2509_v44, %v2508_v39  ;;  %4975 = vmatpush3.bf16.msra.mxu0 %v6652_v59  ;;  %v2666_v59 = vpop.permute.xlu0 %2665  ;;  %v2634_v39 = vmul.f32 0.5052392, %v6706_v5  ;;  %v2676_v5 = vpop.permute.xlu1 %2675 }
 0xcec   :  { %4976 = vmatprep.subr.bf16.mxu0 %v6659_v54 }
 0xced   :  { %4958 = vmatprep.mubr.msk.bf16.mxu0 %vm262_vm2, %v2514_v49 }
 0xcee   :  { %4959 = vmatmul.mubr.msk.bf16.gmra.mxu0 %vm262_vm2, %v2515_v24  ;;  %v2639_v24 = vmul.f32 0.5052392, %v6717_v17 }
 0xcef   :  { %4977 = vmatpush3.bf16.msra.mxu0 %v6659_v54  ;;  %v2670_v28 = vpop.permute.xlu0 %2669 }
 0xcf0   :  { %4978 = vmatprep.subr.bf16.mxu0 %v6668_v36 }
 0xcf3   :  { %4979 = vmatpush3.bf16.msra.mxu0 %v6668_v36 }
 0xcf4   :  { %5102 = vmatprep.subr.msk.bf16.mxu0 %vm81_vm0, %v6675_v19 }
 0xda6   :  { %v4956_v12 = vpop.f32.mrf.mxu0 }
 0xda7   :  { %v2571_v37 = vadd.f32 %v4956_v12, %v6018_v15 }
 0xda8   :  { %v2562_v13 = vpop.f32.mrf.mxu0 }
 0xda9   :  { %v2603_v45 = vmul.f32 0.065766625, %v2571_v37  ;;  %v2563_v1 = vadd.f32 %v2562_v13, %v6018_v15  ;;  %v2674_v13 = vpop.permute.xlu0 %2673 }
 0xdaa   :  { %v4957_v40 = vpop.f32.mrf.mxu0 }
 0xdab   :  { %v2611_v54 = vsub.f32 %v2595_v61, %v2603_v45  ;;  %v2601_v35 = vmul.f32 0.065766625, %v2563_v1  ;;  %v2574_v36 = vadd.f32 %v4957_v40, %v6018_v15  ;;  %v2600_v45 = vmul.f32 0.49910325, %v6719_v51 }
 0xdac   :  { %v2565_v63 = vpop.f32.mrf.mxu0 }
 0xdad   :  { %v2609_v19 = vsub.f32 %v2593_v7, %v2601_v35  ;;  %v2604_v18 = vmul.f32 0.065766625, %v2574_v36  ;;  %v2566_v30 = vadd.f32 %v2565_v63, %v6018_v15  ;;  %v4446_v33 = vclamps-f32 %v2611_v54, 0.49475124 }
 0xdae   :  { %v4960_v16 = vpop.f32.mrf.mxu0 }
 0xdaf   :  { %v4444_v57 = vclamps-f32 %v2609_v19, 0.49475124  ;;  %v2612_v38 = vsub.f32 %v2596_v21, %v2604_v18  ;;  %v2602_v34 = vmul.f32 0.065766625, %v2566_v30  ;;  %v2587_v0 = vadd.f32 %v4960_v16, %v6018_v15 }
 0xdb0   :  { %v2578_v26 = vpop.f32.mrf.mxu0  ;;  %v2643_v44 = vadd.f32 %v4446_v33, %v2635_v43  ;;  %v2598_v21 = vmul.f32 0.49910325, %v6735_v46  ;;  %v2680_v43 = vpop.permute.xlu1 %2679 }
 0xdb1   :  { %v4447_v56 = vclamps-f32 %v2612_v38, 0.49475124  ;;  %v2610_v62 = vsub.f32 %v2594_v20, %v2602_v34  ;;  %v2607_v10 = vmul.f32 0.065766625, %v2587_v0  ;;  %v2579_v48 = vadd.f32 %v2578_v26, %v6018_v15 }
 0xdb2   :  { %v4961_v49 = vpop.f32.mrf.mxu0  ;;  %v2641_v12 = vadd.f32 %v4444_v57, %v2633_v27  ;;  %v6942_v17 = vadd.f32 %v2670_v28, %v2643_v44  ;;  %v2637_v38 = vmul.f32 0.5052392, %v6733_v4  ;;  %v2640_v28 = vmul.f32 0.5052392, %v6719_v51  ;;  %v4454_v44 = vld [vmem:[%s7573_s2 + $0x90] sm:$0xff] }
 0xdb3   :  { %v4445_v52 = vclamps-f32 %v2610_v62, 0.49475124  ;;  %v2615_v37 = vsub.f32 %v2599_v32, %v2607_v10  ;;  %v2590_v14 = vadd.f32 %v4961_v49, %v6018_v15  ;;  %v2605_v61 = vmul.f32 0.065766625, %v2579_v48 }
 0xdb4   :  { %v2644_v1 = vadd.f32 %v4447_v56, %v2636_v47  ;;  %v2581_v40 = vpop.f32.mrf.mxu0  ;;  %v6947_v18 = vadd.f32 %v2666_v59, %v2641_v12  ;;  %v2678_v59 = vpop.permute.xlu0 %2677  ;;  %v2638_v47 = vmul.f32 0.5052392, %v6735_v46 }
 0xdb5   :  { %v4450_v54 = vclamps-f32 %v2615_v37, 0.49475124  ;;  %v2642_v7 = vadd.f32 %v4445_v52, %v2634_v39  ;;  %v2608_v35 = vmul.f32 0.065766625, %v2590_v14  ;;  %v2582_v36 = vadd.f32 %v2581_v40, %v6018_v15  ;;  %v4453_v52 = vld [vmem:[%s7573_s2 + $0x88] sm:$0xff] }
 0xdb6   :  { %v2613_v63 = vsub.f32 %v2597_v42, %v2605_v61  ;;  %v6944_v19 = vadd.f32 %v2672_v11, %v2644_v1  ;;  %v4458_v61 = vld [vmem:[%s7573_s2 + $0xb0] sm:$0xff] }
 0xdb7   :  { %v6949_v30 = vadd.f32 %v2668_v2, %v2642_v7  ;;  %v2616_v33 = vsub.f32 %v2600_v45, %v2608_v35  ;;  %v2606_v20 = vmul.f32 0.065766625, %v2582_v36  ;;  %v2647_v27 = vadd.f32 %v4450_v54, %v2639_v24  ;;  %v4456_v54 = vld [vmem:[%s7573_s2 + $0xa0] sm:$0xff] }
 0xdb8   :  { %v4448_v16 = vclamps-f32 %v2613_v63, 0.49475124  ;;  %v2707_v57 = vpack.c.bf16 %v6944_v19, %v6942_v17 }
 0xdb9   :  { %v2706_v11 = vpack.c.bf16 %v6949_v30, %v6947_v18  ;;  %v4451_v34 = vclamps-f32 %v2616_v33, 0.49475124  ;;  %v2614_v0 = vsub.f32 %v2598_v21, %v2606_v20  ;;  %v6960_v62 = vadd.f32 %v2678_v59, %v2647_v27  ;;  %v4459_v21 = vld [vmem:[%s7573_s2 + $0xb8] sm:$0xff] }
 0xdba   :  { %v2645_v2 = vadd.f32 %v4448_v16, %v2637_v38  ;;  %v4457_v38 = vld [vmem:[%s7573_s2 + $0xa8] sm:$0xff] }
 0xdbb   :  { %v4449_v26 = vclamps-f32 %v2614_v0, 0.49475124  ;;  %4964 = vmatprep.mubr.msk.bf16.mxu1 %vm68_vm1, %v2706_v11  ;;  %v2648_v56 = vadd.f32 %v4451_v34, %v2640_v28 }
 0xdbc   :  { %4965 = vmatmul.mubr.msk.bf16.vlgmr.msra.gmra.mxu1 %vm68_vm1, %v2707_v57  ;;  %v6966_v32 = vadd.f32 %v2674_v13, %v2645_v2 }
 0xdbd   :  { %v2646_v4 = vadd.f32 %v4449_v26, %v2638_v47  ;;  %v6962_v51 = vadd.f32 %v2680_v43, %v2648_v56  ;;  %4989 = vmatpush3.bf16.msra.mxu1 %v6724_v6 }
 0xdbe   :  { %4990 = vmatprep.subr.bf16.mxu1 %v6730_v9 }
 0xdbf   :  { %v6968_v10 = vadd.f32 %v2676_v5, %v2646_v4  ;;  %v2709_v46 = vpack.c.bf16 %v6962_v51, %v6960_v62 }
 0xdc1   :  { %v2708_v39 = vpack.c.bf16 %v6968_v10, %v6966_v32  ;;  %4991 = vmatpush3.bf16.msra.mxu1 %v6730_v9  ;;  %v4452_v9 = vld [vmem:[%s7573_s2 + $0x80] sm:$0xff] }
 0xdc2   :  { %4992 = vmatprep.subr.bf16.mxu1 %v6745_v53 }
 0xdc3   :  { %4968 = vmatprep.mubr.msk.bf16.mxu1 %vm68_vm1, %v2708_v39 }
 0xdc4   :  { %4969 = vmatmul.mubr.msk.bf16.gmra.mxu1 %vm68_vm1, %v2709_v46 }
 0xdc5   :  { %4993 = vmatpush3.bf16.msra.mxu1 %v6745_v53  ;;  %v4455_v53 = vld [vmem:[%s7573_s2 + $0x98] sm:$0xff] }
 0xdc6   :  { %4994 = vmatprep.subr.bf16.mxu1 %v6754_v8 }
 0xdc9   :  { %4995 = vmatpush3.bf16.msra.mxu1 %v6754_v8 }
 0xdca   :  { %5014 = vmatprep.subr.bf16.mxu1 %v6645_v60 }
 0xe7c   :  { %v4966_v48 = vpop.f32.mrf.mxu1 }
 0xe7d   :  { %v6988_v49 = vadd.f32 %v4966_v48, %v4454_v44 }
 0xe7e   :  { %v2756_v24 = vpop.f32.mrf.mxu1 }
 0xe7f   :  { %v2789_v8 = vmin.f32 %v6988_v49, 20.0  ;;  %v6994_v12 = vadd.f32 %v4452_v9, %v2756_v24 }
 0xe80   :  { %v4967_v60 = vpop.f32.mrf.mxu1 }
 0xe81   :  { %v2799_v37 = vmul.f32 1.442695, %v2789_v8  ;;  %v2787_v14 = vmin.f32 %v6994_v12, 20.0  ;;  %v7000_v13 = vadd.f32 %v4967_v60, %v4455_v53 }
 0xe82   :  { %v2759_v42 = vpop.f32.mrf.mxu1 }
 0xe83   :  { %5439 = vpow2.f32 %v2799_v37  ;;  %v2795_v45 = vmul.f32 1.442695, %v2787_v14  ;;  %v2790_v1 = vmin.f32 %v7000_v13, 20.0  ;;  %v7006_v40 = vadd.f32 %v4453_v52, %v2759_v42 }
 0xe84   :  { %v4970_v5 = vpop.f32.mrf.mxu1 }
 0xe85   :  { %5441 = vpow2.f32 %v2795_v45  ;;  %v2801_v7 = vmul.f32 1.442695, %v2790_v1  ;;  %v2788_v35 = vmin.f32 %v7006_v40, 20.0  ;;  %v7012_v36 = vadd.f32 %v4970_v5, %v4458_v61 }
 0xe86   :  { %v2772_v63 = vpop.f32.mrf.mxu1 }
 0xe87   :  { %5443 = vpow2.f32 %v2801_v7  ;;  %v2797_v33 = vmul.f32 1.442695, %v2788_v35  ;;  %v2793_v20 = vmin.f32 %v7012_v36, 20.0  ;;  %v7018_v16 = vadd.f32 %v4456_v54, %v2772_v63 }
 0xe88   :  { %v4971_v57 = vpop.f32.mrf.mxu1 }
 0xe89   :  { %5445 = vpow2.f32 %v2797_v33  ;;  %v2807_v28 = vmul.f32 1.442695, %v2793_v20  ;;  %v2791_v11 = vmin.f32 %v7018_v16, 20.0  ;;  %v7024_v34 = vadd.f32 %v4971_v57, %v4459_v21 }
 0xe8a   :  { %v2775_v0 = vpop.f32.mrf.mxu1 }
 0xe8b   :  { %5447 = vpow2.f32 %v2807_v28  ;;  %v2803_v27 = vmul.f32 1.442695, %v2791_v11  ;;  %v2794_v59 = vmin.f32 %v7024_v34, 20.0  ;;  %v7027_v43 = vadd.f32 %v4457_v38, %v2775_v0 }
 0xe8d   :  { %5449 = vpow2.f32 %v2803_v27  ;;  %v2809_v2 = vmul.f32 1.442695, %v2794_v59  ;;  %v2792_v26 = vmin.f32 %v7027_v43, 20.0 }
 0xe8f   :  { %5451 = vpow2.f32 %v2809_v2  ;;  %v2805_v47 = vmul.f32 1.442695, %v2792_v26 }
 0xe90   :  { %v5440_v56 = vpop.eup %5439 }
 0xe91   :  { %v2813_v4 = vadd.f32 1.0, %v5440_v56  ;;  %5453 = vpow2.f32 %v2805_v47 }
 0xe92   :  { %v5442_v46 = vpop.eup %5441 }
 0xe93   :  { %v2811_v39 = vadd.f32 1.0, %v5442_v46  ;;  %v2821_v48 = vmul.f32 %v2813_v4, %v2813_v4 }
 0xe94   :  { %v5444_v44 = vpop.eup %5443 }
 0xe95   :  { %v2819_v9 = vmul.f32 %v2811_v39, %v2811_v39  ;;  %v2814_v24 = vadd.f32 1.0, %v5444_v44  ;;  %v2845_v14 = vadd.f32 1.0, %v2821_v48  ;;  %v4466_v47 = vadd.f32 -1.0, %v2821_v48 }
 0xe96   :  { %v5446_v53 = vpop.eup %5445 }
 0xe97   :  { %v2843_v8 = vadd.f32 1.0, %v2819_v9  ;;  %v2822_v52 = vmul.f32 %v2814_v24, %v2814_v24  ;;  %v2812_v37 = vadd.f32 1.0, %v5446_v53  ;;  %v4464_v2 = vadd.f32 -1.0, %v2819_v9 }
 0xe98   :  { %v5448_v60 = vpop.eup %5447 }
 0xe99   :  { %v2817_v42 = vadd.f32 1.0, %v5448_v60  ;;  %v2846_v45 = vadd.f32 1.0, %v2822_v52  ;;  %v2820_v1 = vmul.f32 %v2812_v37, %v2812_v37  ;;  %5455 = vrcp.f32 %v2843_v8 }
 0xe9a   :  { %v5450_v61 = vpop.eup %5449  ;;  %v4467_v59 = vadd.f32 -1.0, %v2822_v52  ;;  %v2835_v44 = vmul.f32 %v4464_v2, %v6994_v12  ;;  %v2837_v8 = vmul.f32 %v4466_v47, %v6988_v49 }
 0xe9b   :  { %v2815_v5 = vadd.f32 1.0, %v5450_v61  ;;  %5457 = vrcp.f32 %v2846_v45  ;;  %v2844_v7 = vadd.f32 1.0, %v2820_v1  ;;  %v2825_v35 = vmul.f32 %v2817_v42, %v2817_v42 }
 0xe9c   :  { %v5452_v54 = vpop.eup %5451  ;;  %5459 = vrcp.f32 %v2845_v14  ;;  %v4465_v26 = vadd.f32 -1.0, %v2820_v1  ;;  %v2838_v46 = vmul.f32 %v4467_v59, %v7000_v13 }
 0xe9d   :  { %v2823_v63 = vmul.f32 %v2815_v5, %v2815_v5  ;;  %v2818_v21 = vadd.f32 1.0, %v5452_v54  ;;  %5461 = vrcp.f32 %v2844_v7  ;;  %v2849_v28 = vadd.f32 1.0, %v2825_v35 }
 0xe9e   :  { %v5454_v33 = vpop.eup %5453  ;;  %v2836_v24 = vmul.f32 %v4465_v26, %v7006_v40  ;;  %v4470_v1 = vadd.f32 -1.0, %v2825_v35 }
 0xe9f   :  { %v2847_v20 = vadd.f32 1.0, %v2823_v63  ;;  %v2826_v57 = vmul.f32 %v2818_v21, %v2818_v21  ;;  %v2816_v38 = vadd.f32 1.0, %v5454_v33  ;;  %v4468_v61 = vadd.f32 -1.0, %v2823_v63 }
 0xea0   :  { %v2841_v63 = vmul.f32 %v4470_v1, %v7012_v36  ;;  %v3167_v36 = vmul.f32 0.044698577, %v6836_v31 }
 0xea1   :  { %v2850_v11 = vadd.f32 1.0, %v2826_v57  ;;  %v2824_v0 = vmul.f32 %v2816_v38, %v2816_v38  ;;  %5463 = vrcp.f32 %v2847_v20  ;;  %v4471_v9 = vadd.f32 -1.0, %v2826_v57 }
 0xea2   :  { %v2839_v49 = vmul.f32 %v4468_v61, %v7018_v16  ;;  %v3165_v16 = vmul.f32 0.044698577, %v6824_v23  ;;  %v3169_v38 = vmul.f32 0.044698577, %v6848_v50  ;;  %v3172_v23 = vmul.f32 0.044698577, %v6866_v41 }
 0xea3   :  { %5465 = vrcp.f32 %v2850_v11  ;;  %v2848_v27 = vadd.f32 1.0, %v2824_v0  ;;  %v4469_v48 = vadd.f32 -1.0, %v2824_v0  ;;  %v2842_v12 = vmul.f32 %v4471_v9, %v7024_v34 }
 0xea4   :  { %5467 = vrcp.f32 %v2849_v28  ;;  %3181 = vrot.lane.b32.xlu0 %v3165_v16, %s5687_s25  ;;  %v3170_v28 = vmul.f32 0.044698577, %v6854_v55  ;;  %v3171_v11 = vmul.f32 0.044698577, %v6860_v29 }
 0xea5   :  { %5469 = vrcp.f32 %v2848_v27  ;;  %v2840_v54 = vmul.f32 %v4469_v48, %v7027_v43  ;;  %v3166_v43 = vmul.f32 0.044698577, %v6830_v22 }
 0xea6   :  { %v5456_v56 = vpop.eup %5455 }
 0xea7   :  { %v2859_v37 = vmul.f32 %v5456_v56, %v2835_v44  ;;  %3183 = vrot.lane.b32.xlu1 %v3166_v43, %s5687_s25 }
 0xea8   :  { %v5458_v4 = vpop.eup %5457  ;;  %3185 = vrot.lane.b32.xlu0 %v3167_v36, %s5687_s25 }
 0xea9   :  { %v5460_v39 = vpop.eup %5459  ;;  %v2862_v60 = vmul.f32 %v5458_v4, %v2838_v46 }
 0xeaa   :  { %v5462_v53 = vpop.eup %5461  ;;  %v2861_v14 = vmul.f32 %v5460_v39, %v2837_v8 }
 0xeab   :  { %v2860_v52 = vmul.f32 %v5462_v53, %v2836_v24 }
 0xeac   :  { %v2868_v45 = vpack.c.bf16 %v2862_v60, %v2861_v14  ;;  %3189 = vrot.lane.b32.xlu0 %v3169_v38, %s5687_s25 }
 0xead   :  { %v2867_v42 = vpack.c.bf16 %v2860_v52, %v2859_v37 }
 0xeae   :  { %v5464_v5 = vpop.eup %5463 }
 0xeaf   :  { %4980 = vmatprep.mubr.msk.bf16.mxu0 %vm262_vm2, %v2867_v42  ;;  %v2863_v35 = vmul.f32 %v5464_v5, %v2839_v49 }
 0xeb0   :  { %v5466_v13 = vpop.eup %5465  ;;  %4981 = vmatmul.mubr.msk.bf16.vlgmr.msra.gmra.mxu0 %vm262_vm2, %v2868_v45  ;;  %3193 = vrot.lane.b32.xlu0 %v3171_v11, %s5687_s25 }
 0xeb1   :  { %v5468_v40 = vpop.eup %5467  ;;  %5005 = vmatpush3.bf16.msra.mxu0 %v5738_v3  ;;  %v2866_v21 = vmul.f32 %v5466_v13, %v2842_v12 }
 0xeb2   :  { %v5470_v7 = vpop.eup %5469  ;;  %5030 = vmatprep.subr.bf16.mxu0 %v6724_v6  ;;  %v2865_v20 = vmul.f32 %v5468_v40, %v2841_v63  ;;  %v3168_v6 = vmul.f32 0.044698577, %v6842_v25 }
 0xeb3   :  { %v2864_v33 = vmul.f32 %v5470_v7, %v2840_v54 }
 0xeb4   :  { %v2870_v34 = vpack.c.bf16 %v2866_v21, %v2865_v20  ;;  %3187 = vrot.lane.b32.xlu1 %v3168_v6, %s5687_s25 }
 0xeb5   :  { %v2869_v57 = vpack.c.bf16 %v2864_v33, %v2863_v35 }
 0xeb7   :  { %4984 = vmatprep.mubr.msk.bf16.mxu0 %vm262_vm2, %v2869_v57 }
 0xeb8   :  { %4985 = vmatmul.mubr.msk.bf16.gmra.mxu0 %vm262_vm2, %v2870_v34  ;;  %3191 = vrot.lane.b32.xlu1 %v3170_v28, %s5687_s25 }
 0xebc   :  { %3195 = vrot.lane.b32.xlu1 %v3172_v23, %s5687_s25 }
 0xf70   :  { %v4982_v22 = vpop.f32.mrf.mxu0 }
 0xf71   :  { %v7053_v0 = vadd.f32 %v4982_v22, %v5961_v58 }
 0xf72   :  { %v2917_v31 = vpop.f32.mrf.mxu0 }
 0xf73   :  { %v2950_v25 = vmin.f32 %v7053_v0, 20.0  ;;  %v7057_v27 = vadd.f32 %v2917_v31, %v5961_v58 }
 0xf74   :  { %v4983_v50 = vpop.f32.mrf.mxu0 }
 0xf75   :  { %v2960_v55 = vmul.f32 1.442695, %v2950_v25  ;;  %v2948_v59 = vmin.f32 %v7057_v27, 20.0  ;;  %v7061_v29 = vadd.f32 %v4983_v50, %v5961_v58 }
 0xf76   :  { %v2920_v41 = vpop.f32.mrf.mxu0 }
 0xf77   :  { %5471 = vpow2.f32 %v2960_v55  ;;  %v2956_v2 = vmul.f32 1.442695, %v2948_v59  ;;  %v2951_v26 = vmin.f32 %v7061_v29, 20.0  ;;  %v7065_v47 = vadd.f32 %v2920_v41, %v5961_v58 }
 0xf78   :  { %v4986_v56 = vpop.f32.mrf.mxu0 }
 0xf79   :  { %5473 = vpow2.f32 %v2956_v2  ;;  %v2962_v4 = vmul.f32 1.442695, %v2951_v26  ;;  %v2949_v46 = vmin.f32 %v7065_v47, 20.0  ;;  %v7069_v39 = vadd.f32 %v4986_v56, %v5961_v58 }
 0xf7a   :  { %v2933_v44 = vpop.f32.mrf.mxu0 }
 0xf7b   :  { %5475 = vpow2.f32 %v2962_v4  ;;  %v2958_v24 = vmul.f32 1.442695, %v2949_v46  ;;  %v2954_v53 = vmin.f32 %v7069_v39, 20.0  ;;  %v7073_v8 = vadd.f32 %v2933_v44, %v5961_v58 }
 0xf7c   :  { %v4987_v60 = vpop.f32.mrf.mxu0 }
 0xf7d   :  { %5477 = vpow2.f32 %v2958_v24  ;;  %v2968_v37 = vmul.f32 1.442695, %v2954_v53  ;;  %v2952_v52 = vmin.f32 %v7073_v8, 20.0  ;;  %v7077_v14 = vadd.f32 %v4987_v60, %v5961_v58 }
 0xf7e   :  { %v2936_v9 = vpop.f32.mrf.mxu0 }
 0xf7f   :  { %5479 = vpow2.f32 %v2968_v37  ;;  %v2964_v42 = vmul.f32 1.442695, %v2952_v52  ;;  %v2955_v61 = vmin.f32 %v7077_v14, 20.0  ;;  %v7081_v48 = vadd.f32 %v2936_v9, %v5961_v58 }
 0xf81   :  { %5481 = vpow2.f32 %v2964_v42  ;;  %v2970_v45 = vmul.f32 1.442695, %v2955_v61  ;;  %v2953_v1 = vmin.f32 %v7081_v48, 20.0 }
 0xf83   :  { %5483 = vpow2.f32 %v2970_v45  ;;  %v2966_v5 = vmul.f32 1.442695, %v2953_v1 }
 0xf84   :  { %v5472_v13 = vpop.eup %5471 }
 0xf85   :  { %v2974_v12 = vadd.f32 1.0, %v5472_v13  ;;  %5485 = vpow2.f32 %v2966_v5 }
 0xf86   :  { %v5474_v40 = vpop.eup %5473 }
 0xf87   :  { %v2972_v49 = vadd.f32 1.0, %v5474_v40  ;;  %v2982_v7 = vmul.f32 %v2974_v12, %v2974_v12 }
 0xf88   :  { %v5476_v54 = vpop.eup %5475 }
 0xf89   :  { %v2980_v63 = vmul.f32 %v2972_v49, %v2972_v49  ;;  %v2975_v21 = vadd.f32 1.0, %v5476_v54  ;;  %v3006_v16 = vadd.f32 1.0, %v2982_v7  ;;  %v4478_v53 = vadd.f32 -1.0, %v2982_v7 }
 0xf8a   :  { %v5478_v35 = vpop.eup %5477 }
 0xf8b   :  { %v3004_v33 = vadd.f32 1.0, %v2980_v63  ;;  %v2983_v57 = vmul.f32 %v2975_v21, %v2975_v21  ;;  %v2973_v34 = vadd.f32 1.0, %v5478_v35  ;;  %v4476_v44 = vadd.f32 -1.0, %v2980_v63 }
 0xf8c   :  { %v5480_v20 = vpop.eup %5479  ;;  %v2998_v1 = vmul.f32 %v4478_v53, %v7053_v0  ;;  %v3112_v53 = vmul.f32 0.658579, %v6944_v19 }
 0xf8d   :  { %v2978_v43 = vadd.f32 1.0, %v5480_v20  ;;  %v3007_v6 = vadd.f32 1.0, %v2983_v57  ;;  %v2981_v38 = vmul.f32 %v2973_v34, %v2973_v34  ;;  %5487 = vrcp.f32 %v3004_v33 }
 0xf8e   :  { %v5482_v36 = vpop.eup %5481  ;;  %v4479_v46 = vadd.f32 -1.0, %v2983_v57  ;;  %v2996_v42 = vmul.f32 %v4476_v44, %v7057_v27  ;;  %v7096_v57 = vld [vmem:[%s7571_s3 + $0x18] sm:$0xff]  }
 0xf8f   :  { %v2976_v28 = vadd.f32 1.0, %v5482_v36  ;;  %5489 = vrcp.f32 %v3007_v6  ;;  %v3005_v23 = vadd.f32 1.0, %v2981_v38  ;;  %v2986_v22 = vmul.f32 %v2978_v43, %v2978_v43 }
 0xf90   :  { %v5484_v11 = vpop.eup %5483  ;;  %5491 = vrcp.f32 %v3006_v16  ;;  %v4477_v24 = vadd.f32 -1.0, %v2981_v38  ;;  %v2999_v52 = vmul.f32 %v4479_v46, %v7061_v29 }
 0xf91   :  { %v2984_v31 = vmul.f32 %v2976_v28, %v2976_v28  ;;  %v2979_v25 = vadd.f32 1.0, %v5484_v11  ;;  %5493 = vrcp.f32 %v3005_v23  ;;  %v3010_v2 = vadd.f32 1.0, %v2986_v22  ;;  %v7110_v28 = vld [vmem:[%s7571_s3 + $0x8] sm:$0xff]   ;;  %v5669_v11 = vld [vmem:[%s7571_s3 + $0x40] sm:$0xf] }
 0xf92   :  { %v5486_v50 = vpop.eup %5485  ;;  %v2997_v61 = vmul.f32 %v4477_v24, %v7065_v47  ;;  %v4482_v35 = vadd.f32 -1.0, %v2986_v22 }
 0xf93   :  { %v3008_v55 = vadd.f32 1.0, %v2984_v31  ;;  %v2987_v59 = vmul.f32 %v2979_v25, %v2979_v25  ;;  %v2977_v41 = vadd.f32 1.0, %v5486_v50  ;;  %v4480_v63 = vadd.f32 -1.0, %v2984_v31  ;;  %v3182_v31 = vpop.permute.xlu0 %3181  ;;  %v3184_v50 = vpop.permute.xlu1 %3183 }
 0xf94   :  { %v3002_v16 = vmul.f32 %v4482_v35, %v7069_v39  ;;  %v7119_v39 = vld [vmem:[%s7571_s3] sm:$0xff]   ;;  %v3115_v35 = vmul.f32 0.658579, %v6960_v62 }
 0xf95   :  { %v3011_v26 = vadd.f32 1.0, %v2987_v59  ;;  %v2985_v56 = vmul.f32 %v2977_v41, %v2977_v41  ;;  %5495 = vrcp.f32 %v3008_v55  ;;  %v4483_v49 = vadd.f32 -1.0, %v2987_v59 }
 0xf96   :  { %v3000_v0 = vmul.f32 %v4480_v63, %v7073_v8  ;;  %v3111_v55 = vmul.f32 0.658579, %v6942_v17  ;;  %v3152_v63 = vmul.f32 0.3443265, %v6944_v19  ;;  %v3113_v19 = vmul.f32 0.658579, %v6966_v32 }
 0xf97   :  { %5497 = vrcp.f32 %v3011_v26  ;;  %v3009_v4 = vadd.f32 1.0, %v2985_v56  ;;  %v4481_v7 = vadd.f32 -1.0, %v2985_v56  ;;  %v3003_v27 = vmul.f32 %v4483_v49, %v7077_v14  ;;  %v7103_v14 = vld [vmem:[%s7571_s3 + $0x10] sm:$0xff]  }
 0xf98   :  { %5499 = vrcp.f32 %v3010_v2  ;;  %v3109_v56 = vmul.f32 0.658579, %v6947_v18  ;;  %v3151_v49 = vmul.f32 0.3443265, %v6942_v17 }
 0xf99   :  { %5501 = vrcp.f32 %v3009_v4  ;;  %v3001_v20 = vmul.f32 %v4481_v7, %v7081_v48 }
 0xf9a   :  { %v5488_v60 = vpop.eup %5487 }
 0xf9b   :  { %v3020_v13 = vmul.f32 %v5488_v60, %v2996_v42  ;;  %v3110_v42 = vmul.f32 0.658579, %v6949_v30 }
 0xf9c   :  { %v5490_v37 = vpop.eup %5489 }
 0xf9d   :  { %v5492_v9 = vpop.eup %5491  ;;  %v3023_v5 = vmul.f32 %v5490_v37, %v2999_v52  ;;  %v3186_v52 = vpop.permute.xlu0 %3185 }
 0xf9e   :  { %v5494_v45 = vpop.eup %5493  ;;  %v3022_v40 = vmul.f32 %v5492_v9, %v2998_v1 }
 0xf9f   :  { %v3021_v12 = vmul.f32 %v5494_v45, %v2997_v61  ;;  %v3188_v45 = vpop.permute.xlu1 %3187 }
 0xfa0   :  { %v3029_v21 = vpack.c.bf16 %v3023_v5, %v3022_v40  ;;  %v3149_v40 = vmul.f32 0.3443265, %v6947_v18 }
 0xfa1   :  { %v3028_v54 = vpack.c.bf16 %v3021_v12, %v3020_v13 }
 0xfa2   :  { %v5496_v33 = vpop.eup %5495 }
 0xfa3   :  { %4996 = vmatprep.mubr.msk.bf16.mxu1 %vm262_vm2, %v3028_v54  ;;  %v3024_v8 = vmul.f32 %v5496_v33, %v3000_v0 }
 0xfa4   :  { %v5498_v29 = vpop.eup %5497  ;;  %4997 = vmatmul.mubr.msk.bf16.vlgmr.msra.gmra.mxu1 %vm262_vm2, %v3029_v21 }
 0xfa5   :  { %v5500_v47 = vpop.eup %5499  ;;  %5015 = vmatpush3.bf16.msra.mxu1 %v7096_v57  ;;  %v3027_v43 = vmul.f32 %v5498_v29, %v3003_v27  ;;  %v3150_v29 = vmul.f32 0.3443265, %v6949_v30  ;;  %v3192_v30 = vpop.permute.xlu1 %3191 }
 0xfa6   :  { %v5502_v34 = vpop.eup %5501  ;;  %5016 = vmatprep.subr.bf16.mxu1 %v7103_v14  ;;  %v3026_v36 = vmul.f32 %v5500_v47, %v3002_v16 }
 0xfa7   :  { %v3025_v48 = vmul.f32 %v5502_v34, %v3001_v20  ;;  %v3155_v20 = vmul.f32 0.3443265, %v6960_v62 }
 0xfa8   :  { %v3031_v38 = vpack.c.bf16 %v3027_v43, %v3026_v36  ;;  %v3190_v43 = vpop.permute.xlu0 %3189 }
 0xfa9   :  { %v3030_v6 = vpack.c.bf16 %v3025_v48, %v3024_v8  ;;  %5017 = vmatpush3.bf16.msra.mxu1 %v7103_v14  ;;  %v3116_v48 = vmul.f32 0.658579, %v6962_v51 }
 0xfaa   :  { %5018 = vmatprep.subr.bf16.mxu1 %v7110_v28 }
 0xfab   :  { %5000 = vmatprep.mubr.msk.bf16.mxu1 %vm262_vm2, %v3030_v6 }
 0xfac   :  { %5001 = vmatmul.mubr.msk.bf16.gmra.mxu1 %vm262_vm2, %v3031_v38 }
 0xfad   :  { %5019 = vmatpush3.bf16.msra.mxu1 %v7110_v28 }
 0xfae   :  { %5020 = vmatprep.subr.bf16.mxu1 %v7119_v39 }
 0xfb1   :  { %5021 = vmatpush3.bf16.msra.mxu1 %v7119_v39 }
 0xfb2   :  { %5103 = vmatprep.subr.msk.bf16.mxu1 %vm81_vm0, %v5669_v11 }
0x1064   :  { %v4998_v23 = vpop.f32.mrf.mxu1 }
0x1065   :  { %v3087_v22 = vadd.f32 %v4998_v23, %v6018_v15 }
0x1066   :  { %v3078_v25 = vpop.f32.mrf.mxu1 }
0x1067   :  { %v3119_v59 = vmul.f32 0.06181764, %v3087_v22  ;;  %v3079_v41 = vadd.f32 %v3078_v25, %v6018_v15 }
0x1068   :  { %v4999_v2 = vpop.f32.mrf.mxu1 }
0x1069   :  { %v3127_v26 = vsub.f32 %v3111_v55, %v3119_v59  ;;  %v3117_v4 = vmul.f32 0.06181764, %v3079_v41  ;;  %v3090_v46 = vadd.f32 %v4999_v2, %v6018_v15  ;;  %v3114_v59 = vmul.f32 0.658579, %v6968_v10 }
0x106a   :  { %v3081_v44 = vpop.f32.mrf.mxu1 }
0x106b   :  { %v3125_v24 = vsub.f32 %v3109_v56, %v3117_v4  ;;  %v3120_v60 = vmul.f32 0.06181764, %v3090_v46  ;;  %v3082_v37 = vadd.f32 %v3081_v44, %v6018_v15  ;;  %v4490_v9 = vclamps-f32 %v3127_v26, 0.6556713 }
0x106c   :  { %v5002_v61 = vpop.f32.mrf.mxu1  ;;  %v3153_v44 = vmul.f32 0.3443265, %v6966_v32 }
0x106d   :  { %v4488_v1 = vclamps-f32 %v3125_v24, 0.6556713  ;;  %v3128_v5 = vsub.f32 %v3112_v53, %v3120_v60  ;;  %v3118_v13 = vmul.f32 0.06181764, %v3082_v37  ;;  %v3103_v12 = vadd.f32 %v5002_v61, %v6018_v15 }
0x106e   :  { %v3094_v54 = vpop.f32.mrf.mxu1  ;;  %v3159_v27 = vadd.f32 %v4490_v9, %v3151_v49  ;;  %v3156_v24 = vmul.f32 0.3443265, %v6962_v51  ;;  %v3196_v9 = vpop.permute.xlu1 %3195  ;;  %v3154_v61 = vmul.f32 0.3443265, %v6968_v10  ;;  %v7178_v10 = vld [vmem:[%s7571_s3 + $0x30] sm:$0xff]  }
0x106f   :  { %v4491_v7 = vclamps-f32 %v3128_v5, 0.6556713  ;;  %v3126_v21 = vsub.f32 %v3110_v42, %v3118_v13  ;;  %v3123_v33 = vmul.f32 0.06181764, %v3103_v12  ;;  %v3095_v47 = vadd.f32 %v3094_v54, %v6018_v15  ;;  %v7172_v5 = vld [vmem:[%s7571_s3 + $0x38] sm:$0xff]   ;;  %v7193_v54 = vld [vmem:[%s7571_s3 + $0x28] sm:$0xff]  }
0x1070   :  { %v5003_v0 = vpop.f32.mrf.mxu1  ;;  %v3157_v34 = vadd.f32 %v4488_v1, %v3149_v40  ;;  %v7147_v62 = vadd.f32 %v3186_v52, %v3159_v27  ;;  %v4499_v27 = vld [vmem:[%s7573_s2 + $0x58] sm:$0xff] }
0x1071   :  { %v4489_v18 = vclamps-f32 %v3126_v21, 0.6556713  ;;  %v3131_v16 = vsub.f32 %v3115_v35, %v3123_v33  ;;  %v3106_v17 = vadd.f32 %v5003_v0, %v6018_v15  ;;  %v3121_v8 = vmul.f32 0.06181764, %v3095_v47  ;;  %v4496_v35 = vld [vmem:[%s7573_s2 + $0x40] sm:$0xff] }
0x1072   :  { %v3160_v36 = vadd.f32 %v4491_v7, %v3152_v63  ;;  %v3097_v6 = vpop.f32.mrf.mxu1  ;;  %v7152_v41 = vadd.f32 %v3182_v31, %v3157_v34  ;;  %v3194_v31 = vpop.permute.xlu0 %3193  ;;  %v7202_v63 = vld [vmem:[%s7571_s3 + $0x20] sm:$0xff]   ;;  %v4498_v7 = vld [vmem:[%s7573_s2 + $0x50] sm:$0xff]  ;;  %v4497_v34 = vld [vmem:[%s7573_s2 + $0x48] sm:$0xff] }
0x1073   :  { %v4494_v38 = vclamps-f32 %v3131_v16, 0.6556713  ;;  %v3158_v11 = vadd.f32 %v4489_v18, %v3150_v29  ;;  %v3124_v23 = vmul.f32 0.06181764, %v3106_v17  ;;  %v3098_v22 = vadd.f32 %v3097_v6, %v6018_v15 }
0x1074   :  { %v3129_v25 = vsub.f32 %v3113_v19, %v3121_v8  ;;  %v7149_v55 = vadd.f32 %v3188_v45, %v3160_v36  ;;  %v4502_v19 = vld [vmem:[%s7573_s2 + $0x70] sm:$0xff] }
0x1075   :  { %v7154_v2 = vadd.f32 %v3184_v50, %v3158_v11  ;;  %v3132_v26 = vsub.f32 %v3116_v48, %v3124_v23  ;;  %v3122_v56 = vmul.f32 0.06181764, %v3098_v22  ;;  %v3163_v52 = vadd.f32 %v4494_v38, %v3155_v20 }
0x1076   :  { %v4492_v4 = vclamps-f32 %v3129_v25, 0.6556713  ;;  %v3223_v46 = vpack.c.bf16 %v7149_v55, %v7147_v62  ;;  %v4503_v25 = vld [vmem:[%s7573_s2 + $0x78] sm:$0xff] }
0x1077   :  { %v3222_v53 = vpack.c.bf16 %v7154_v2, %v7152_v41  ;;  %v4495_v60 = vclamps-f32 %v3132_v26, 0.6556713  ;;  %v3130_v37 = vsub.f32 %v3114_v59, %v3122_v56  ;;  %v7165_v1 = vadd.f32 %v3194_v31, %v3163_v52 }
0x1078   :  { %v3161_v50 = vadd.f32 %v4492_v4, %v3153_v44 }
0x1079   :  { %v4493_v42 = vclamps-f32 %v3130_v37, 0.6556713  ;;  %5006 = vmatprep.mubr.msk.bf16.mxu0 %vm68_vm1, %v3222_v53  ;;  %v3164_v45 = vadd.f32 %v4495_v60, %v3156_v24 }
0x107a   :  { %5007 = vmatmul.mubr.msk.bf16.vlgmr.msra.gmra.mxu0 %vm68_vm1, %v3223_v46  ;;  %v7181_v13 = vadd.f32 %v3190_v43, %v3161_v50  ;;  %v4501_v46 = vld [vmem:[%s7573_s2 + $0x68] sm:$0xff] }
0x107b   :  { %v3162_v32 = vadd.f32 %v4493_v42, %v3154_v61  ;;  %v7167_v51 = vadd.f32 %v3196_v9, %v3164_v45  ;;  %5031 = vmatpush3.bf16.msra.mxu0 %v7172_v5 }
0x107c   :  { %5032 = vmatprep.subr.bf16.mxu0 %v7178_v10 }
0x107d   :  { %v7183_v12 = vadd.f32 %v3192_v30, %v3162_v32  ;;  %v3225_v40 = vpack.c.bf16 %v7167_v51, %v7165_v1  ;;  %v4500_v30 = vld [vmem:[%s7573_s2 + $0x60] sm:$0xff] }
0x107f   :  { %v3224_v49 = vpack.c.bf16 %v7183_v12, %v7181_v13  ;;  %5033 = vmatpush3.bf16.msra.mxu0 %v7178_v10 }
0x1080   :  { %5034 = vmatprep.subr.bf16.mxu0 %v7193_v54 }
0x1081   :  { %5010 = vmatprep.mubr.msk.bf16.mxu0 %vm68_vm1, %v3224_v49 }
0x1082   :  { %5011 = vmatmul.mubr.msk.bf16.gmra.mxu0 %vm68_vm1, %v3225_v40 }
0x1083   :  { %5035 = vmatpush3.bf16.msra.mxu0 %v7193_v54 }
0x1084   :  { %5036 = vmatprep.subr.bf16.mxu0 %v7202_v63 }
0x1087   :  { %5037 = vmatpush3.bf16.msra.mxu0 %v7202_v63 }
0x1088   :  { %5056 = vmatprep.subr.bf16.mxu0 %v7096_v57 }
0x113a   :  { %v5008_v21 = vpop.f32.mrf.mxu0 }
0x113b   :  { %v7213_v33 = vadd.f32 %v5008_v21, %v4498_v7 }
0x113c   :  { %v3272_v29 = vpop.f32.mrf.mxu0 }
0x113d   :  { %v3305_v47 = vmin.f32 %v7213_v33, 20.0  ;;  %v7219_v0 = vadd.f32 %v4496_v35, %v3272_v29 }
0x113e   :  { %v5009_v20 = vpop.f32.mrf.mxu0 }
0x113f   :  { %v3315_v18 = vmul.f32 1.442695, %v3305_v47  ;;  %v3303_v16 = vmin.f32 %v7219_v0, 20.0  ;;  %v7225_v17 = vadd.f32 %v5009_v20, %v4499_v27 }
0x1140   :  { %v3275_v43 = vpop.f32.mrf.mxu0 }
0x1141   :  { %5503 = vpow2.f32 %v3315_v18  ;;  %v3311_v8 = vmul.f32 1.442695, %v3303_v16  ;;  %v3306_v48 = vmin.f32 %v7225_v17, 20.0  ;;  %v7231_v36 = vadd.f32 %v4497_v34, %v3275_v43 }
0x1142   :  { %v5012_v6 = vpop.f32.mrf.mxu0 }
0x1143   :  { %5505 = vpow2.f32 %v3311_v8  ;;  %v3317_v38 = vmul.f32 1.442695, %v3306_v48  ;;  %v3304_v11 = vmin.f32 %v7231_v36, 20.0  ;;  %v7237_v23 = vadd.f32 %v5012_v6, %v4502_v19 }
0x1144   :  { %v3288_v22 = vpop.f32.mrf.mxu0 }
0x1145   :  { %5507 = vpow2.f32 %v3317_v38  ;;  %v3313_v59 = vmul.f32 1.442695, %v3304_v11  ;;  %v3309_v26 = vmin.f32 %v7237_v23, 20.0  ;;  %v7243_v56 = vadd.f32 %v4500_v30, %v3288_v22 }
0x1146   :  { %v5013_v4 = vpop.f32.mrf.mxu0 }
0x1147   :  { %5509 = vpow2.f32 %v3313_v59  ;;  %v3323_v44 = vmul.f32 1.442695, %v3309_v26  ;;  %v3307_v24 = vmin.f32 %v7243_v56, 20.0  ;;  %v7249_v53 = vadd.f32 %v5013_v4, %v4503_v25 }
0x1148   :  { %v3291_v60 = vpop.f32.mrf.mxu0 }
0x1149   :  { %5511 = vpow2.f32 %v3323_v44  ;;  %v3319_v37 = vmul.f32 1.442695, %v3307_v24  ;;  %v3310_v52 = vmin.f32 %v7249_v53, 20.0  ;;  %v7252_v31 = vadd.f32 %v4501_v46, %v3291_v60 }
0x114b   :  { %5513 = vpow2.f32 %v3319_v37  ;;  %v3325_v9 = vmul.f32 1.442695, %v3310_v52  ;;  %v3308_v50 = vmin.f32 %v7252_v31, 20.0 }
0x114d   :  { %5515 = vpow2.f32 %v3325_v9  ;;  %v3321_v42 = vmul.f32 1.442695, %v3308_v50 }
0x114e   :  { %v5504_v61 = vpop.eup %5503 }
0x114f   :  { %v3329_v45 = vadd.f32 1.0, %v5504_v61  ;;  %5517 = vpow2.f32 %v3321_v42 }
0x1150   :  { %v5506_v32 = vpop.eup %5505 }
0x1151   :  { %v3327_v40 = vadd.f32 1.0, %v5506_v32  ;;  %v3337_v7 = vmul.f32 %v3329_v45, %v3329_v45 }
0x1152   :  { %v5508_v49 = vpop.eup %5507 }
0x1153   :  { %v3335_v21 = vmul.f32 %v3327_v40, %v3327_v40  ;;  %v3330_v35 = vadd.f32 1.0, %v5508_v49  ;;  %v3361_v18 = vadd.f32 1.0, %v3337_v7  ;;  %v4510_v50 = vadd.f32 -1.0, %v3337_v7 }
0x1154   :  { %v5510_v29 = vpop.eup %5509 }
0x1155   :  { %v3359_v27 = vadd.f32 1.0, %v3335_v21  ;;  %v3338_v20 = vmul.f32 %v3330_v35, %v3330_v35  ;;  %v3328_v34 = vadd.f32 1.0, %v5510_v29  ;;  %v4508_v52 = vadd.f32 -1.0, %v3335_v21 }
0x1156   :  { %v5512_v47 = vpop.eup %5511  ;;  %v3353_v29 = vmul.f32 %v4510_v50, %v7213_v33 }
0x1157   :  { %v3333_v16 = vadd.f32 1.0, %v5512_v47  ;;  %v3362_v19 = vadd.f32 1.0, %v3338_v20  ;;  %v3336_v8 = vmul.f32 %v3328_v34, %v3328_v34  ;;  %5519 = vrcp.f32 %v3359_v27 }
0x1158   :  { %v5514_v43 = vpop.eup %5513  ;;  %v4511_v37 = vadd.f32 -1.0, %v3338_v20  ;;  %v3351_v40 = vmul.f32 %v4508_v52, %v7219_v0 }
0x1159   :  { %v3331_v48 = vadd.f32 1.0, %v5514_v43  ;;  %5521 = vrcp.f32 %v3362_v19  ;;  %v3360_v30 = vadd.f32 1.0, %v3336_v8  ;;  %v3341_v38 = vmul.f32 %v3333_v16, %v3333_v16 }
0x115a   :  { %v5516_v6 = vpop.eup %5515  ;;  %5523 = vrcp.f32 %v3361_v18  ;;  %v4509_v9 = vadd.f32 -1.0, %v3336_v8  ;;  %v3354_v45 = vmul.f32 %v4511_v37, %v7225_v17  ;;  %v5679_v37 = vld [vmem:[%s7574_s1 + $0x28] sm:$0xff] }
0x115b   :  { %v3339_v11 = vmul.f32 %v3331_v48, %v3331_v48  ;;  %v3334_v22 = vadd.f32 1.0, %v5516_v6  ;;  %5525 = vrcp.f32 %v3360_v30  ;;  %v3365_v46 = vadd.f32 1.0, %v3341_v38 }
0x115c   :  { %v5518_v25 = vpop.eup %5517  ;;  %v3352_v49 = vmul.f32 %v4509_v9, %v7231_v36  ;;  %v4514_v19 = vadd.f32 -1.0, %v3341_v38  ;;  %v3686_v52 = vmul.f32 0.009834784, %v5679_v37  ;;  %v5680_v9 = vld [vmem:[%s7574_s1 + $0x30] sm:$0xff] }
0x115d   :  { %v3363_v59 = vadd.f32 1.0, %v3339_v11  ;;  %v3342_v26 = vmul.f32 %v3334_v22, %v3334_v22  ;;  %v3332_v4 = vadd.f32 1.0, %v5518_v25  ;;  %v4512_v16 = vadd.f32 -1.0, %v3339_v11 }
0x115e   :  { %v3357_v30 = vmul.f32 %v4514_v19, %v7237_v23  ;;  %v5675_v23 = vld [vmem:[%s7574_s1 + $0x8] sm:$0xff]  ;;  %v3687_v50 = vmul.f32 0.009834784, %v5680_v9 }
0x115f   :  { %v3366_v44 = vadd.f32 1.0, %v3342_v26  ;;  %v3340_v24 = vmul.f32 %v3332_v4, %v3332_v4  ;;  %5527 = vrcp.f32 %v3363_v59  ;;  %v4515_v21 = vadd.f32 -1.0, %v3342_v26  ;;  %v5676_v26 = vld [vmem:[%s7574_s1 + $0x10] sm:$0xff] }
0x1160   :  { %v3355_v33 = vmul.f32 %v4512_v16, %v7243_v56  ;;  %v5674_v56 = vld [vmem:[%s7574_s1] sm:$0xff]  ;;  %v3683_v4 = vmul.f32 0.009834784, %v5676_v26 }
0x1161   :  { %5529 = vrcp.f32 %v3366_v44  ;;  %v3364_v60 = vadd.f32 1.0, %v3340_v24  ;;  %v4513_v7 = vadd.f32 -1.0, %v3340_v24  ;;  %v3358_v0 = vmul.f32 %v4515_v21, %v7249_v53  ;;  %v5678_v24 = vld [vmem:[%s7574_s1 + $0x20] sm:$0xff] }
0x1162   :  { %5531 = vrcp.f32 %v3365_v46  ;;  %v5677_v46 = vld [vmem:[%s7574_s1 + $0x18] sm:$0xff] }
0x1163   :  { %5533 = vrcp.f32 %v3364_v60  ;;  %v3356_v48 = vmul.f32 %v4513_v7, %v7252_v31  ;;  %v3682_v31 = vmul.f32 0.009834784, %v5675_v23  ;;  %v3684_v44 = vmul.f32 0.009834784, %v5677_v46 }
0x1164   :  { %v5520_v42 = vpop.eup %5519  ;;  %v3685_v60 = vmul.f32 0.009834784, %v5678_v24 }
0x1165   :  { %v3375_v47 = vmul.f32 %v5520_v42, %v3351_v40  ;;  %3699 = vrot.lane.b32.xlu1 %v3682_v31, %s5688_s10  ;;  %v5681_v42 = vld [vmem:[%s7574_s1 + $0x38] sm:$0xff] }
0x1166   :  { %v5522_v61 = vpop.eup %5521 }
0x1167   :  { %v5524_v32 = vpop.eup %5523  ;;  %v3378_v27 = vmul.f32 %v5522_v61, %v3354_v45  ;;  %v3688_v61 = vmul.f32 0.009834784, %v5681_v42 }
0x1168   :  { %v5526_v35 = vpop.eup %5525  ;;  %v3377_v34 = vmul.f32 %v5524_v32, %v3353_v29 }
0x1169   :  { %v3376_v20 = vmul.f32 %v5526_v35, %v3352_v49  ;;  %3703 = vrot.lane.b32.xlu1 %v3684_v44, %s5688_s10 }
0x116a   :  { %v3384_v43 = vpack.c.bf16 %v3378_v27, %v3377_v34 }
0x116b   :  { %v3383_v18 = vpack.c.bf16 %v3376_v20, %v3375_v47 }
0x116c   :  { %v5528_v8 = vpop.eup %5527 }
0x116d   :  { %5022 = vmatprep.mubr.msk.bf16.mxu1 %vm262_vm2, %v3383_v18  ;;  %v3379_v38 = vmul.f32 %v5528_v8, %v3355_v33  ;;  %3707 = vrot.lane.b32.xlu1 %v3686_v52, %s5688_s10 }
0x116e   :  { %v5530_v17 = vpop.eup %5529  ;;  %5023 = vmatmul.mubr.msk.bf16.vlgmr.msra.gmra.mxu1 %vm262_vm2, %v3384_v43 }
0x116f   :  { %v5532_v36 = vpop.eup %5531  ;;  %5047 = vmatpush3.bf16.msra.mxu1 %v5738_v3  ;;  %v3382_v11 = vmul.f32 %v5530_v17, %v3358_v0  ;;  %v3681_v3 = vmul.f32 0.009834784, %v5674_v56 }
0x1170   :  { %v5534_v6 = vpop.eup %5533  ;;  %5088 = vmatprep.subr.bf16.mxu1 %v7172_v5  ;;  %v3381_v25 = vmul.f32 %v5532_v36, %v3357_v30 }
0x1171   :  { %v3380_v22 = vmul.f32 %v5534_v6, %v3356_v48  ;;  %3697 = vrot.lane.b32.xlu0 %v3681_v3, %s5688_s10  ;;  %3711 = vrot.lane.b32.xlu1 %v3688_v61, %s5688_s10 }
0x1172   :  { %v3386_v53 = vpack.c.bf16 %v3382_v11, %v3381_v25 }
0x1173   :  { %v3385_v59 = vpack.c.bf16 %v3380_v22, %v3379_v38 }
0x1175   :  { %5026 = vmatprep.mubr.msk.bf16.mxu1 %vm262_vm2, %v3385_v59  ;;  %3701 = vrot.lane.b32.xlu0 %v3683_v4, %s5688_s10 }
0x1176   :  { %5027 = vmatmul.mubr.msk.bf16.gmra.mxu1 %vm262_vm2, %v3386_v53 }
0x1179   :  { %3705 = vrot.lane.b32.xlu0 %v3685_v60, %s5688_s10 }
0x117d   :  { %3709 = vrot.lane.b32.xlu0 %v3687_v50, %s5688_s10 }
0x122e   :  { %v5024_v45 = vpop.f32.mrf.mxu1 }
0x122f   :  { %v7294_v32 = vadd.f32 %v5024_v45, %v5961_v58 }
0x1230   :  { %v3433_v40 = vpop.f32.mrf.mxu1 }
0x1231   :  { %v3466_v49 = vmin.f32 %v7294_v32, 20.0  ;;  %v7298_v35 = vadd.f32 %v3433_v40, %v5961_v58 }
0x1232   :  { %v5025_v29 = vpop.f32.mrf.mxu1 }
0x1233   :  { %v3476_v27 = vmul.f32 1.442695, %v3466_v49  ;;  %v3464_v47 = vmin.f32 %v7298_v35, 20.0  ;;  %v7302_v20 = vadd.f32 %v5025_v29, %v5961_v58 }
0x1234   :  { %v3436_v34 = vpop.f32.mrf.mxu1 }
0x1235   :  { %5535 = vpow2.f32 %v3476_v27  ;;  %v3472_v21 = vmul.f32 1.442695, %v3464_v47  ;;  %v3467_v18 = vmin.f32 %v7302_v20, 20.0  ;;  %v7306_v16 = vadd.f32 %v3436_v34, %v5961_v58 }
0x1236   :  { %v5028_v7 = vpop.f32.mrf.mxu1 }
0x1237   :  { %5537 = vpow2.f32 %v3472_v21  ;;  %v3478_v43 = vmul.f32 1.442695, %v3467_v18  ;;  %v3465_v19 = vmin.f32 %v7306_v16, 20.0  ;;  %v7310_v8 = vadd.f32 %v5028_v7, %v5961_v58 }
0x1238   :  { %v3449_v17 = vpop.f32.mrf.mxu1 }
0x1239   :  { %5539 = vpow2.f32 %v3478_v43  ;;  %v3474_v0 = vmul.f32 1.442695, %v3465_v19  ;;  %v3470_v36 = vmin.f32 %v7310_v8, 20.0  ;;  %v7314_v33 = vadd.f32 %v3449_v17, %v5961_v58 }
0x123a   :  { %v5029_v48 = vpop.f32.mrf.mxu1 }
0x123b   :  { %5541 = vpow2.f32 %v3474_v0  ;;  %v3484_v6 = vmul.f32 1.442695, %v3470_v36  ;;  %v3468_v30 = vmin.f32 %v7314_v33, 20.0  ;;  %v7318_v11 = vadd.f32 %v5029_v48, %v5961_v58 }
0x123c   :  { %v3452_v38 = vpop.f32.mrf.mxu1 }
0x123d   :  { %5543 = vpow2.f32 %v3484_v6  ;;  %v3480_v22 = vmul.f32 1.442695, %v3468_v30  ;;  %v3471_v25 = vmin.f32 %v7318_v11, 20.0  ;;  %v7322_v59 = vadd.f32 %v3452_v38, %v5961_v58 }
0x123f   :  { %5545 = vpow2.f32 %v3480_v22  ;;  %v3486_v53 = vmul.f32 1.442695, %v3471_v25  ;;  %v3469_v56 = vmin.f32 %v7322_v59, 20.0 }
0x1241   :  { %5547 = vpow2.f32 %v3486_v53  ;;  %v3482_v3 = vmul.f32 1.442695, %v3469_v56 }
0x1242   :  { %v5536_v23 = vpop.eup %5535 }
0x1243   :  { %v3490_v31 = vadd.f32 1.0, %v5536_v23  ;;  %5549 = vpow2.f32 %v3482_v3 }
0x1244   :  { %v5538_v26 = vpop.eup %5537 }
0x1245   :  { %v3488_v4 = vadd.f32 1.0, %v5538_v26  ;;  %v3498_v44 = vmul.f32 %v3490_v31, %v3490_v31 }
0x1246   :  { %v5540_v46 = vpop.eup %5539 }
0x1247   :  { %v3496_v24 = vmul.f32 %v3488_v4, %v3488_v4  ;;  %v3491_v60 = vadd.f32 1.0, %v5540_v46  ;;  %v3522_v61 = vadd.f32 1.0, %v3498_v44  ;;  %v4522_v53 = vadd.f32 -1.0, %v3498_v44 }
0x1248   :  { %v5542_v37 = vpop.eup %5541 }
0x1249   :  { %v3520_v52 = vadd.f32 1.0, %v3496_v24  ;;  %v3499_v50 = vmul.f32 %v3491_v60, %v3491_v60  ;;  %v3489_v42 = vadd.f32 1.0, %v5542_v37  ;;  %v4520_v22 = vadd.f32 -1.0, %v3496_v24 }
0x124a   :  { %v5544_v9 = vpop.eup %5543  ;;  %v3514_v60 = vmul.f32 %v4522_v53, %v7294_v32 }
0x124b   :  { %v3494_v45 = vadd.f32 1.0, %v5544_v9  ;;  %v3523_v49 = vadd.f32 1.0, %v3499_v50  ;;  %v3497_v29 = vmul.f32 %v3489_v42, %v3489_v42  ;;  %5551 = vrcp.f32 %v3520_v52 }
0x124c   :  { %v5546_v40 = vpop.eup %5545  ;;  %v4523_v38 = vadd.f32 -1.0, %v3499_v50  ;;  %v3512_v26 = vmul.f32 %v4520_v22, %v7298_v35  ;;  %v3628_v22 = vmul.f32 0.96865606, %v7149_v55 }
0x124d   :  { %v3492_v27 = vadd.f32 1.0, %v5546_v40  ;;  %5553 = vrcp.f32 %v3523_v49  ;;  %v3521_v34 = vadd.f32 1.0, %v3497_v29  ;;  %v3502_v21 = vmul.f32 %v3494_v45, %v3494_v45 }
0x124e   :  { %v5548_v47 = vpop.eup %5547  ;;  %5555 = vrcp.f32 %v3522_v61  ;;  %v4521_v25 = vadd.f32 -1.0, %v3497_v29  ;;  %v3515_v23 = vmul.f32 %v4523_v38, %v7302_v20 }
0x124f   :  { %v3500_v18 = vmul.f32 %v3492_v27, %v3492_v27  ;;  %v3495_v7 = vadd.f32 1.0, %v5548_v47  ;;  %5557 = vrcp.f32 %v3521_v34  ;;  %v3526_v36 = vadd.f32 1.0, %v3502_v21 }
0x1250   :  { %v5550_v43 = vpop.eup %5549  ;;  %v3513_v4 = vmul.f32 %v4521_v25, %v7306_v16  ;;  %v4526_v40 = vadd.f32 -1.0, %v3502_v21 }
0x1251   :  { %v3524_v19 = vadd.f32 1.0, %v3500_v18  ;;  %v3503_v17 = vmul.f32 %v3495_v7, %v3495_v7  ;;  %v3493_v0 = vadd.f32 1.0, %v5550_v43  ;;  %v4524_v61 = vadd.f32 -1.0, %v3500_v18 }
0x1252   :  { %v3518_v47 = vmul.f32 %v4526_v40, %v7310_v8 }
0x1253   :  { %v3527_v48 = vadd.f32 1.0, %v3503_v17  ;;  %v3501_v6 = vmul.f32 %v3493_v0, %v3493_v0  ;;  %5559 = vrcp.f32 %v3524_v19  ;;  %v4527_v24 = vadd.f32 -1.0, %v3503_v17 }
0x1254   :  { %v3516_v32 = vmul.f32 %v4524_v61, %v7314_v33  ;;  %v3698_v33 = vpop.permute.xlu0 %3697  ;;  %v3627_v19 = vmul.f32 0.96865606, %v7147_v62  ;;  %v3631_v61 = vmul.f32 0.96865606, %v7165_v1 }
0x1255   :  { %5561 = vrcp.f32 %v3527_v48  ;;  %v3525_v30 = vadd.f32 1.0, %v3501_v6  ;;  %v4525_v44 = vadd.f32 -1.0, %v3501_v6  ;;  %v3519_v35 = vmul.f32 %v4527_v24, %v7318_v11 }
0x1256   :  { %5563 = vrcp.f32 %v3526_v36 }
0x1257   :  { %5565 = vrcp.f32 %v3525_v30  ;;  %v3517_v29 = vmul.f32 %v4525_v44, %v7322_v59  ;;  %v3700_v59 = vpop.permute.xlu1 %3699 }
0x1258   :  { %v5552_v56 = vpop.eup %5551 }
0x1259   :  { %v3536_v52 = vmul.f32 %v5552_v56, %v3512_v26  ;;  %v3702_v56 = vpop.permute.xlu0 %3701 }
0x125a   :  { %v5554_v3 = vpop.eup %5553 }
0x125b   :  { %v5556_v31 = vpop.eup %5555  ;;  %v3539_v37 = vmul.f32 %v5554_v3, %v3515_v23  ;;  %v3626_v23 = vmul.f32 0.96865606, %v7154_v2  ;;  %v3704_v26 = vpop.permute.xlu1 %3703 }
0x125c   :  { %v5558_v46 = vpop.eup %5557  ;;  %v3538_v50 = vmul.f32 %v5556_v31, %v3514_v60 }
0x125d   :  { %v3537_v9 = vmul.f32 %v5558_v46, %v3513_v4 }
0x125e   :  { %v3545_v45 = vpack.c.bf16 %v3539_v37, %v3538_v50 }
0x125f   :  { %v3544_v42 = vpack.c.bf16 %v3537_v9, %v3536_v52  ;;  %v3665_v52 = vmul.f32 0.03281863, %v7152_v41  ;;  %v3667_v9 = vmul.f32 0.03281863, %v7147_v62  ;;  %v3706_v62 = vpop.permute.xlu0 %3705 }
0x1260   :  { %v5560_v49 = vpop.eup %5559 }
0x1261   :  { %5038 = vmatprep.mubr.msk.bf16.mxu0 %vm262_vm2, %v3544_v42  ;;  %v3540_v21 = vmul.f32 %v5560_v49, %v3516_v32 }
0x1262   :  { %v5562_v20 = vpop.eup %5561  ;;  %5039 = vmatmul.mubr.msk.bf16.vlgmr.msra.gmra.mxu0 %vm262_vm2, %v3545_v45  ;;  %v3666_v45 = vmul.f32 0.03281863, %v7154_v2 }
0x1263   :  { %v5564_v16 = vpop.eup %5563  ;;  %5057 = vmatpush3.bf16.msra.mxu0 %v7096_v57  ;;  %v3543_v34 = vmul.f32 %v5562_v20, %v3519_v35  ;;  %v3668_v35 = vmul.f32 0.03281863, %v7149_v55 }
0x1264   :  { %v5566_v27 = vpop.eup %5565  ;;  %5058 = vmatprep.subr.bf16.mxu0 %v7103_v14  ;;  %v3542_v7 = vmul.f32 %v5564_v16, %v3518_v47 }
0x1265   :  { %v3541_v18 = vmul.f32 %v5566_v27, %v3517_v29  ;;  %v3629_v27 = vmul.f32 0.96865606, %v7181_v13 }
0x1266   :  { %v3547_v11 = vpack.c.bf16 %v3543_v34, %v3542_v7 }
0x1267   :  { %v3546_v43 = vpack.c.bf16 %v3541_v18, %v3540_v21  ;;  %5059 = vmatpush3.bf16.msra.mxu0 %v7103_v14  ;;  %v3708_v18 = vpop.permute.xlu1 %3707 }
0x1268   :  { %5060 = vmatprep.subr.bf16.mxu0 %v7110_v28 }
0x1269   :  { %5042 = vmatprep.mubr.msk.bf16.mxu0 %vm262_vm2, %v3546_v43  ;;  %v3632_v43 = vmul.f32 0.96865606, %v7167_v51 }
0x126a   :  { %5043 = vmatmul.mubr.msk.bf16.gmra.mxu0 %vm262_vm2, %v3547_v11 }
0x126b   :  { %5061 = vmatpush3.bf16.msra.mxu0 %v7110_v28  ;;  %v3625_v28 = vmul.f32 0.96865606, %v7152_v41 }
0x126c   :  { %5062 = vmatprep.subr.bf16.mxu0 %v7119_v39 }
0x126f   :  { %5063 = vmatpush3.bf16.msra.mxu0 %v7119_v39 }
0x1270   :  { %5072 = vmatprep.subr.bf16.mxu0 %v7172_v5 }
0x1322   :  { %v5040_v57 = vpop.f32.mrf.mxu0 }
0x1323   :  { %v3603_v8 = vadd.f32 %v5040_v57, %v6018_v15 }
0x1324   :  { %v3594_v14 = vpop.f32.mrf.mxu0 }
0x1325   :  { %v3635_v17 = vmul.f32 0.053430516, %v3603_v8  ;;  %v3595_v0 = vadd.f32 %v3594_v14, %v6018_v15 }
0x1326   :  { %v5041_v36 = vpop.f32.mrf.mxu0 }
0x1327   :  { %v3643_v48 = vsub.f32 %v3627_v19, %v3635_v17  ;;  %v3633_v6 = vmul.f32 0.053430516, %v3595_v0  ;;  %v3606_v39 = vadd.f32 %v5041_v36, %v6018_v15  ;;  %v3671_v36 = vmul.f32 0.03281863, %v7165_v1 }
0x1328   :  { %v3597_v30 = vpop.f32.mrf.mxu0 }
0x1329   :  { %v3641_v38 = vsub.f32 %v3625_v28, %v3633_v6  ;;  %v3636_v25 = vmul.f32 0.053430516, %v3606_v39  ;;  %v3598_v53 = vadd.f32 %v3597_v30, %v6018_v15  ;;  %v4534_v3 = vclamps-f32 %v3643_v48, 0.9671813 }
0x132a   :  { %v5044_v31 = vpop.f32.mrf.mxu0  ;;  %v3630_v6 = vmul.f32 0.96865606, %v7183_v12 }
0x132b   :  { %v4532_v4 = vclamps-f32 %v3641_v38, 0.9671813  ;;  %v3644_v46 = vsub.f32 %v3628_v22, %v3636_v25  ;;  %v3634_v60 = vmul.f32 0.053430516, %v3598_v53  ;;  %v3619_v37 = vadd.f32 %v5044_v31, %v6018_v15  ;;  %v3710_v53 = vpop.permute.xlu0 %3709 }
0x132c   :  { %v3610_v50 = vpop.f32.mrf.mxu0  ;;  %v3675_v40 = vadd.f32 %v4534_v3, %v3667_v9  ;;  %v3670_v31 = vmul.f32 0.03281863, %v7183_v12  ;;  %v3729_v9 = vld [vmem:[%s7573_s2] sm:$0xff] }
0x132d   :  { %v4535_v24 = vclamps-f32 %v3644_v46, 0.9671813  ;;  %v3642_v42 = vsub.f32 %v3626_v23, %v3634_v60  ;;  %v3639_v44 = vmul.f32 0.053430516, %v3619_v37  ;;  %v3611_v49 = vadd.f32 %v3610_v50, %v6018_v15  ;;  %v3731_v37 = vld [vmem:[%s7573_s2 + $0x10] sm:$0xff] }
0x132e   :  { %v5045_v20 = vpop.f32.mrf.mxu0  ;;  %v3673_v16 = vadd.f32 %v4532_v4, %v3665_v52  ;;  %v7363_v57 = vadd.f32 %v3702_v56, %v3675_v40  ;;  %v3712_v56 = vpop.permute.xlu1 %3711  ;;  %v3730_v40 = vld [vmem:[%s7573_s2 + $0x8] sm:$0xff] }
0x132f   :  { %v4533_v32 = vclamps-f32 %v3642_v42, 0.9671813  ;;  %v3647_v29 = vsub.f32 %v3631_v61, %v3639_v44  ;;  %v3622_v41 = vadd.f32 %v5045_v20, %v6018_v15  ;;  %v3637_v47 = vmul.f32 0.053430516, %v3611_v49  ;;  %v3732_v42 = vld [vmem:[%s7573_s2 + $0x18] sm:$0xff] }
0x1330   :  { %v3676_v34 = vadd.f32 %v4535_v24, %v3668_v35  ;;  %v3613_v21 = vpop.f32.mrf.mxu0  ;;  %v7368_v19 = vadd.f32 %v3698_v33, %v3673_v16  ;;  %v3672_v33 = vmul.f32 0.03281863, %v7167_v51 }
0x1331   :  { %v4538_v7 = vclamps-f32 %v3647_v29, 0.9671813  ;;  %v3674_v2 = vadd.f32 %v4533_v32, %v3666_v45  ;;  %v3640_v11 = vmul.f32 0.053430516, %v3622_v41  ;;  %v3645_v55 = vsub.f32 %v3629_v27, %v3637_v47 }
0x1332   :  { %v7365_v8 = vadd.f32 %v3704_v26, %v3676_v34  ;;  %v3614_v14 = vadd.f32 %v3613_v21, %v6018_v15  ;;  %v3733_v21 = vld [vmem:[%s7573_s2 + $0x20] sm:$0xff] }
0x1333   :  { %v7370_v17 = vadd.f32 %v3700_v59, %v3674_v2  ;;  %v3648_v0 = vsub.f32 %v3632_v43, %v3640_v11  ;;  %v4536_v48 = vclamps-f32 %v3645_v55, 0.9671813  ;;  %v3679_v22 = vadd.f32 %v4538_v7, %v3671_v36  ;;  %v3736_v43 = vld [vmem:[%s7573_s2 + $0x38] sm:$0xff] }
0x1334   :  { %v3738_v28 = vpack.c.bf16 %v7365_v8, %v7363_v57  ;;  %v3638_v39 = vmul.f32 0.053430516, %v3614_v14  ;;  %v3669_v59 = vmul.f32 0.03281863, %v7181_v13 }
0x1335   :  { %v3737_v30 = vpack.c.bf16 %v7370_v17, %v7368_v19  ;;  %v4539_v38 = vclamps-f32 %v3648_v0, 0.9671813  ;;  %v7383_v26 = vadd.f32 %v3710_v53, %v3679_v22  ;;  %v3734_v0 = vld [vmem:[%s7573_s2 + $0x28] sm:$0xff] }
0x1336   :  { %v3646_v25 = vsub.f32 %v3630_v6, %v3638_v39  ;;  %v3677_v3 = vadd.f32 %v4536_v48, %v3669_v59 }
0x1337   :  { %5048 = vmatprep.mubr.msk.bf16.mxu1 %vm68_vm1, %v3737_v30  ;;  %v3680_v1 = vadd.f32 %v4539_v38, %v3672_v33 }
0x1338   :  { %v4537_v23 = vclamps-f32 %v3646_v25, 0.9671813  ;;  %5049 = vmatmul.mubr.msk.bf16.vlgmr.msra.gmra.mxu1 %vm68_vm1, %v3738_v28  ;;  %v7391_v46 = vadd.f32 %v3706_v62, %v3677_v3  ;;  %v3735_v62 = vld [vmem:[%s7573_s2 + $0x30] sm:$0xff] }
0x1339   :  { %v7385_v4 = vadd.f32 %v3712_v56, %v3680_v1  ;;  %5092 = vmatpush3.bf16.msra.mxu1 %v7172_v5 }
0x133a   :  { %v3678_v51 = vadd.f32 %v4537_v23, %v3670_v31  ;;  %5089 = vmatprep.subr.bf16.mxu1 %v7178_v10 }
0x133b   :  { %v3740_v13 = vpack.c.bf16 %v7385_v4, %v7383_v26 }
0x133c   :  { %v7393_v60 = vadd.f32 %v3708_v18, %v3678_v51 }
0x133d   :  { %5093 = vmatpush3.bf16.msra.mxu1 %v7178_v10 }
0x133e   :  { %v3739_v12 = vpack.c.bf16 %v7393_v60, %v7391_v46  ;;  %5090 = vmatprep.subr.bf16.mxu1 %v7193_v54 }
0x1340   :  { %5052 = vmatprep.mubr.msk.bf16.mxu1 %vm68_vm1, %v3739_v12 }
0x1341   :  { %5053 = vmatmul.mubr.msk.bf16.gmra.mxu1 %vm68_vm1, %v3740_v13 }
0x1342   :  { %5094 = vmatpush3.bf16.msra.mxu1 %v7193_v54 }
0x1343   :  { %5091 = vmatprep.subr.bf16.mxu1 %v7202_v63 }
0x1346   :  { %5095 = vmatpush3.bf16.msra.mxu1 %v7202_v63 }
0x13f8   :  { %v5050_v52 = vpop.f32.mrf.mxu1 }
0x13f9   :  { %v7410_v50 = vadd.f32 %v5050_v52, %v3731_v37 }
0x13fa   :  { %v3787_v24 = vpop.f32.mrf.mxu1 }
0x13fb   :  { %v3820_v61 = vmin.f32 %v7410_v50, 20.0  ;;  %v7416_v44 = vadd.f32 %v3787_v24, %v3729_v9 }
0x13fc   :  { %v5051_v45 = vpop.f32.mrf.mxu1 }
0x13fd   :  { %v3830_v49 = vmul.f32 1.442695, %v3820_v61  ;;  %v3818_v20 = vmin.f32 %v7416_v44, 20.0  ;;  %v7422_v35 = vadd.f32 %v5051_v45, %v3732_v42 }
0x13fe   :  { %v3790_v16 = vpop.f32.mrf.mxu1 }
0x13ff   :  { %5567 = vpow2.f32 %v3830_v49  ;;  %v3826_v32 = vmul.f32 1.442695, %v3818_v20  ;;  %v3821_v29 = vmin.f32 %v7422_v35, 20.0  ;;  %v7425_v41 = vadd.f32 %v3790_v16, %v3730_v40 }
0x1401   :  { %5569 = vpow2.f32 %v3826_v32  ;;  %v3832_v27 = vmul.f32 1.442695, %v3821_v29  ;;  %v3819_v47 = vmin.f32 %v7425_v41, 20.0  ;;  %v5054_v34 = vpop.f32.mrf.mxu1 }
0x1402   :  { %v7434_v18 = vadd.f32 %v5054_v34, %v3735_v62 }
0x1403   :  { %5571 = vpow2.f32 %v3832_v27  ;;  %v3828_v7 = vmul.f32 1.442695, %v3819_v47  ;;  %v3803_v2 = vpop.f32.mrf.mxu1 }
0x1404   :  { %v3824_v11 = vmin.f32 %v7434_v18, 20.0  ;;  %v7440_v55 = vadd.f32 %v3803_v2, %v3733_v21 }
0x1405   :  { %5573 = vpow2.f32 %v3828_v7  ;;  %v5055_v14 = vpop.f32.mrf.mxu1 }
0x1406   :  { %v3838_v36 = vmul.f32 1.442695, %v3824_v11  ;;  %v3822_v48 = vmin.f32 %v7440_v55, 20.0  ;;  %v7446_v28 = vadd.f32 %v5055_v14, %v3736_v43 }
0x1407   :  { %v3806_v6 = vpop.f32.mrf.mxu1 }
0x1408   :  { %5575 = vpow2.f32 %v3838_v36  ;;  %v3834_v39 = vmul.f32 1.442695, %v3822_v48  ;;  %v3825_v30 = vmin.f32 %v7446_v28, 20.0  ;;  %v7449_v38 = vadd.f32 %v3806_v6, %v3734_v0 }
0x140a   :  { %5577 = vpow2.f32 %v3834_v39  ;;  %v3840_v22 = vmul.f32 1.442695, %v3825_v30  ;;  %v3823_v33 = vmin.f32 %v7449_v38, 20.0 }
0x140c   :  { %v5568_v59 = vpop.eup %5567  ;;  %5579 = vpow2.f32 %v3840_v22  ;;  %v3836_v25 = vmul.f32 1.442695, %v3823_v33 }
0x140d   :  { %v3844_v53 = vadd.f32 1.0, %v5568_v59 }
0x140e   :  { %v5570_v56 = vpop.eup %5569  ;;  %5581 = vpow2.f32 %v3836_v25 }
0x140f   :  { %v3842_v1 = vadd.f32 1.0, %v5570_v56  ;;  %v3852_v23 = vmul.f32 %v3844_v53, %v3844_v53 }
0x1410   :  { %v5572_v3 = vpop.eup %5571 }
0x1411   :  { %v3850_v31 = vmul.f32 %v3842_v1, %v3842_v1  ;;  %v3845_v51 = vadd.f32 1.0, %v5572_v3  ;;  %v3876_v24 = vadd.f32 1.0, %v3852_v23  ;;  %v4546_v48 = vadd.f32 -1.0, %v3852_v23 }
0x1412   :  { %v5574_v13 = vpop.eup %5573 }
0x1413   :  { %v3874_v12 = vadd.f32 1.0, %v3850_v31  ;;  %v3853_v37 = vmul.f32 %v3845_v51, %v3845_v51  ;;  %v3843_v52 = vadd.f32 1.0, %v5574_v13  ;;  %v4544_v0 = vadd.f32 -1.0, %v3850_v31 }
0x1414   :  { %v3868_v53 = vmul.f32 %v4546_v48, %v7410_v50 }
0x1415   :  { %v5576_v9 = vpop.eup %5575  ;;  %v3877_v42 = vadd.f32 1.0, %v3853_v37  ;;  %v3851_v61 = vmul.f32 %v3843_v52, %v3843_v52  ;;  %5583 = vrcp.f32 %v3874_v12  ;;  %v4547_v14 = vadd.f32 -1.0, %v3853_v37 }
0x1416   :  { %v3848_v45 = vadd.f32 1.0, %v5576_v9  ;;  %v3866_v33 = vmul.f32 %v4544_v0, %v7416_v44 }
0x1417   :  { %v5578_v40 = vpop.eup %5577  ;;  %5585 = vrcp.f32 %v3877_v42  ;;  %v3875_v49 = vadd.f32 1.0, %v3851_v61  ;;  %v4545_v36 = vadd.f32 -1.0, %v3851_v61  ;;  %v3869_v30 = vmul.f32 %v4547_v14, %v7422_v35 }
0x1418   :  { %5587 = vrcp.f32 %v3876_v24  ;;  %v3856_v16 = vmul.f32 %v3848_v45, %v3848_v45  ;;  %v3846_v32 = vadd.f32 1.0, %v5578_v40 }
0x1419   :  { %v5580_v20 = vpop.eup %5579  ;;  %5589 = vrcp.f32 %v3875_v49  ;;  %v3867_v59 = vmul.f32 %v4545_v36, %v7425_v41 }
0x141a   :  { %v3849_v29 = vadd.f32 1.0, %v5580_v20  ;;  %v3854_v27 = vmul.f32 %v3846_v32, %v3846_v32  ;;  %v3880_v21 = vadd.f32 1.0, %v3856_v16  ;;  %v4550_v52 = vadd.f32 -1.0, %v3856_v16 }
0x141b   :  { %v5582_v62 = vpop.eup %5581 }
0x141c   :  { %v3857_v47 = vmul.f32 %v3849_v29, %v3849_v29  ;;  %v3847_v34 = vadd.f32 1.0, %v5582_v62  ;;  %v3878_v7 = vadd.f32 1.0, %v3854_v27  ;;  %v4548_v12 = vadd.f32 -1.0, %v3854_v27 }
0x141d   :  { %v3872_v61 = vmul.f32 %v4550_v52, %v7434_v18 }
0x141e   :  { %v3881_v2 = vadd.f32 1.0, %v3857_v47  ;;  %v3855_v43 = vmul.f32 %v3847_v34, %v3847_v34  ;;  %5591 = vrcp.f32 %v3878_v7  ;;  %v4551_v31 = vadd.f32 -1.0, %v3857_v47 }
0x141f   :  { %v3870_v50 = vmul.f32 %v4548_v12, %v7440_v55 }
0x1420   :  { %5593 = vrcp.f32 %v3881_v2  ;;  %v3879_v11 = vadd.f32 1.0, %v3855_v43  ;;  %v4549_v23 = vadd.f32 -1.0, %v3855_v43  ;;  %v3873_v44 = vmul.f32 %v4551_v31, %v7446_v28 }
0x1421   :  { %5595 = vrcp.f32 %v3880_v21 }
0x1422   :  { %5597 = vrcp.f32 %v3879_v11  ;;  %v5584_v6 = vpop.eup %5583  ;;  %v3871_v24 = vmul.f32 %v4549_v23, %v7449_v38 }
0x1423   :  { %v3890_v1 = vmul.f32 %v5584_v6, %v3866_v33 }
0x1424   :  { %v5586_v39 = vpop.eup %5585 }
0x1425   :  { %v5588_v22 = vpop.eup %5587  ;;  %v3893_v56 = vmul.f32 %v5586_v39, %v3869_v30 }
0x1426   :  { %v5590_v25 = vpop.eup %5589  ;;  %v3892_v51 = vmul.f32 %v5588_v22, %v3868_v53 }
0x1427   :  { %v3891_v3 = vmul.f32 %v5590_v25, %v3867_v59 }
0x1428   :  { %v3899_v37 = vpack.c.bf16 %v3893_v56, %v3892_v51 }
0x1429   :  { %v3898_v13 = vpack.c.bf16 %v3891_v3, %v3890_v1 }
0x142b   :  { %v5592_v9 = vpop.eup %5591  ;;  %5064 = vmatprep.mubr.msk.bf16.mxu0 %vm262_vm2, %v3898_v13 }
0x142c   :  { %5065 = vmatmul.mubr.msk.bf16.vlgmr.msra.gmra.mxu0 %vm262_vm2, %v3899_v37  ;;  %v3894_v40 = vmul.f32 %v5592_v9, %v3870_v50 }
0x142d   :  { %v5594_v35 = vpop.eup %5593  ;;  %5073 = vmatpush3.bf16.msra.mxu0 %v7172_v5 }
0x142e   :  { %v5596_v41 = vpop.eup %5595  ;;  %v3897_v45 = vmul.f32 %v5594_v35, %v3873_v44  ;;  %5074 = vmatprep.subr.bf16.mxu0 %v7178_v10 }
0x142f   :  { %v5598_v42 = vpop.eup %5597  ;;  %v3896_v20 = vmul.f32 %v5596_v41, %v3872_v61 }
0x1430   :  { %v3895_v49 = vmul.f32 %v5598_v42, %v3871_v24 }
0x1431   :  { %5075 = vmatpush3.bf16.msra.mxu0 %v7178_v10  ;;  %v3901_v28 = vpack.c.bf16 %v3897_v45, %v3896_v20 }
0x1432   :  { %v3900_v16 = vpack.c.bf16 %v3895_v49, %v3894_v40  ;;  %5076 = vmatprep.subr.bf16.mxu0 %v7193_v54 }
0x1434   :  { %5068 = vmatprep.mubr.msk.bf16.mxu0 %vm262_vm2, %v3900_v16 }
0x1435   :  { %5069 = vmatmul.mubr.msk.bf16.gmra.mxu0 %vm262_vm2, %v3901_v28 }
0x1436   :  { %5077 = vmatpush3.bf16.msra.mxu0 %v7193_v54 }
0x1437   :  { %5078 = vmatprep.subr.bf16.mxu0 %v7202_v63 }
0x143a   :  { %5079 = vmatpush3.bf16.msra.mxu0 %v7202_v63 }
0x14ec   :  { %v5066_v5 = vpop.f32.mrf.mxu0 }
0x14ed   :  { %v7472_v18 = vadd.f32 %v5066_v5, %v5961_v58 }
0x14ee   :  { %v3948_v55 = vpop.f32.mrf.mxu0 }
0x14ef   :  { %v3981_v10 = vmin.f32 %v7472_v18, 20.0  ;;  %v7476_v38 = vadd.f32 %v3948_v55, %v5961_v58 }
0x14f0   :  { %v5067_v32 = vpop.f32.mrf.mxu0 }
0x14f1   :  { %v3991_v29 = vmul.f32 1.442695, %v3981_v10  ;;  %v3979_v62 = vmin.f32 %v7476_v38, 20.0  ;;  %v7480_v54 = vadd.f32 %v5067_v32, %v5961_v58 }
0x14f2   :  { %v3951_v27 = vpop.f32.mrf.mxu0 }
0x14f3   :  { %5599 = vpow2.f32 %v3991_v29  ;;  %v3987_v63 = vmul.f32 1.442695, %v3979_v62  ;;  %v3982_v47 = vmin.f32 %v7480_v54, 20.0  ;;  %v7484_v34 = vadd.f32 %v3951_v27, %v5961_v58 }
0x14f5   :  { %v5070_v21 = vpop.f32.mrf.mxu0  ;;  %5601 = vpow2.f32 %v3987_v63  ;;  %v3993_v7 = vmul.f32 1.442695, %v3982_v47  ;;  %v3980_v2 = vmin.f32 %v7484_v34, 20.0 }
0x14f6   :  { %v7488_v43 = vadd.f32 %v5070_v21, %v5961_v58 }
0x14f7   :  { %v3964_v11 = vpop.f32.mrf.mxu0  ;;  %5603 = vpow2.f32 %v3993_v7  ;;  %v3989_v14 = vmul.f32 1.442695, %v3980_v2 }
0x14f8   :  { %v3985_v0 = vmin.f32 %v7488_v43, 20.0  ;;  %v7492_v36 = vadd.f32 %v3964_v11, %v5961_v58 }
0x14f9   :  { %v5071_v48 = vpop.f32.mrf.mxu0  ;;  %5605 = vpow2.f32 %v3989_v14 }
0x14fa   :  { %v3999_v6 = vmul.f32 1.442695, %v3985_v0  ;;  %v3983_v39 = vmin.f32 %v7492_v36, 20.0  ;;  %v7496_v30 = vadd.f32 %v5071_v48, %v5961_v58 }
0x14fb   :  { %v3967_v22 = vpop.f32.mrf.mxu0 }
0x14fc   :  { %5607 = vpow2.f32 %v3999_v6  ;;  %v3995_v33 = vmul.f32 1.442695, %v3983_v39  ;;  %v3986_v59 = vmin.f32 %v7496_v30, 20.0  ;;  %v7500_v25 = vadd.f32 %v3967_v22, %v5961_v58 }
0x14fe   :  { %5609 = vpow2.f32 %v3995_v33  ;;  %v4001_v53 = vmul.f32 1.442695, %v3986_v59  ;;  %v3984_v56 = vmin.f32 %v7500_v25, 20.0 }
0x1500   :  { %5611 = vpow2.f32 %v4001_v53  ;;  %v3997_v1 = vmul.f32 1.442695, %v3984_v56  ;;  %v5600_v3 = vpop.eup %5599 }
0x1501   :  { %v4005_v51 = vadd.f32 1.0, %v5600_v3 }
0x1502   :  { %5613 = vpow2.f32 %v3997_v1  ;;  %v5602_v31 = vpop.eup %5601 }
0x1503   :  { %v4003_v13 = vadd.f32 1.0, %v5602_v31  ;;  %v4013_v23 = vmul.f32 %v4005_v51, %v4005_v51 }
0x1504   :  { %v5604_v12 = vpop.eup %5603 }
0x1505   :  { %v4011_v37 = vmul.f32 %v4003_v13, %v4003_v13  ;;  %v4006_v52 = vadd.f32 1.0, %v5604_v12  ;;  %v4037_v50 = vadd.f32 1.0, %v4013_v23  ;;  %v4558_v11 = vadd.f32 -1.0, %v4013_v23 }
0x1506   :  { %v5606_v9 = vpop.eup %5605 }
0x1507   :  { %v4035_v35 = vadd.f32 1.0, %v4011_v37  ;;  %v4014_v58 = vmul.f32 %v4006_v52, %v4006_v52  ;;  %v4004_v41 = vadd.f32 1.0, %v5606_v9  ;;  %v4556_v7 = vadd.f32 -1.0, %v4011_v37 }
0x1508   :  { %v4029_v59 = vmul.f32 %v4558_v11, %v7472_v18 }
0x1509   :  { %v5608_v44 = vpop.eup %5607  ;;  %v4038_v61 = vadd.f32 1.0, %v4014_v58  ;;  %v4012_v45 = vmul.f32 %v4004_v41, %v4004_v41  ;;  %5615 = vrcp.f32 %v4035_v35  ;;  %v4559_v21 = vadd.f32 -1.0, %v4014_v58 }
0x150a   :  { %v4009_v24 = vadd.f32 1.0, %v5608_v44  ;;  %v4027_v39 = vmul.f32 %v4556_v7, %v7476_v38 }
0x150b   :  { %v5610_v42 = vpop.eup %5609  ;;  %5617 = vrcp.f32 %v4038_v61  ;;  %v4036_v20 = vadd.f32 1.0, %v4012_v45  ;;  %v4557_v2 = vadd.f32 -1.0, %v4012_v45  ;;  %v4030_v48 = vmul.f32 %v4559_v21, %v7480_v54 }
0x150c   :  { %v4007_v40 = vadd.f32 1.0, %v5610_v42  ;;  %5619 = vrcp.f32 %v4037_v50  ;;  %v4017_v16 = vmul.f32 %v4009_v24, %v4009_v24  ;;  %v4141_v21 = vmul.f32 1.00005, %v7370_v17 }
0x150d   :  { %v5612_v49 = vpop.eup %5611  ;;  %5621 = vrcp.f32 %v4036_v20  ;;  %v4028_v22 = vmul.f32 %v4557_v2, %v7484_v34 }
0x150e   :  { %v4015_v28 = vmul.f32 %v4007_v40, %v4007_v40  ;;  %v4010_v5 = vadd.f32 1.0, %v5612_v49  ;;  %v4041_v62 = vadd.f32 1.0, %v4017_v16  ;;  %v4562_v37 = vadd.f32 -1.0, %v4017_v16 }
0x150f   :  { %v5614_v55 = vpop.eup %5613  ;;  %v4140_v16 = vmul.f32 1.00005, %v7368_v19 }
0x1510   :  { %v4039_v10 = vadd.f32 1.0, %v4015_v28  ;;  %v4018_v32 = vmul.f32 %v4010_v5, %v4010_v5  ;;  %v4008_v29 = vadd.f32 1.0, %v5614_v55  ;;  %v4560_v13 = vadd.f32 -1.0, %v4015_v28 }
0x1511   :  { %v4033_v44 = vmul.f32 %v4562_v37, %v7488_v43  ;;  %v4182_v55 = vmul.f32 0.0, %v7363_v57  ;;  %v4147_v37 = vmul.f32 1.00005, %v7385_v4 }
0x1512   :  { %v4042_v27 = vadd.f32 1.0, %v4018_v32  ;;  %v4016_v63 = vmul.f32 %v4008_v29, %v4008_v29  ;;  %5623 = vrcp.f32 %v4039_v10  ;;  %v4563_v51 = vadd.f32 -1.0, %v4018_v32 }
0x1513   :  { %v4031_v18 = vmul.f32 %v4560_v13, %v7492_v36  ;;  %v4142_v36 = vmul.f32 1.00005, %v7363_v57  ;;  %v4143_v10 = vmul.f32 1.00005, %v7365_v8 }
0x1514   :  { %5625 = vrcp.f32 %v4042_v27  ;;  %v4040_v47 = vadd.f32 1.0, %v4016_v63  ;;  %v4561_v12 = vadd.f32 -1.0, %v4016_v63  ;;  %v4034_v38 = vmul.f32 %v4563_v51, %v7496_v30 }
0x1515   :  { %5627 = vrcp.f32 %v4041_v62 }
0x1516   :  { %5629 = vrcp.f32 %v4040_v47  ;;  %v5616_v14 = vpop.eup %5615  ;;  %v4032_v9 = vmul.f32 %v4561_v12, %v7500_v25  ;;  %v4180_v47 = vmul.f32 0.0, %v7368_v19  ;;  %v4146_v19 = vmul.f32 1.00005, %v7383_v26 }
0x1517   :  { %v4051_v56 = vmul.f32 %v5616_v14, %v4027_v39 }
0x1518   :  { %v5618_v0 = vpop.eup %5617 }
0x1519   :  { %v5620_v6 = vpop.eup %5619  ;;  %v4054_v53 = vmul.f32 %v5618_v0, %v4030_v48  ;;  %v4183_v48 = vmul.f32 0.0, %v7365_v8 }
0x151a   :  { %v5622_v33 = vpop.eup %5621  ;;  %v4053_v3 = vmul.f32 %v5620_v6, %v4029_v59 }
0x151b   :  { %v4052_v1 = vmul.f32 %v5622_v33, %v4028_v22 }
0x151c   :  { %v4060_v23 = vpack.c.bf16 %v4054_v53, %v4053_v3  ;;  %v4181_v53 = vmul.f32 0.0, %v7370_v17 }
0x151d   :  { %v4059_v31 = vpack.c.bf16 %v4052_v1, %v4051_v56 }
0x151f   :  { %v5624_v52 = vpop.eup %5623  ;;  %5080 = vmatprep.mubr.msk.bf16.mxu0 %vm262_vm2, %v4059_v31 }
0x1520   :  { %5081 = vmatmul.mubr.msk.bf16.vlgmr.msra.gmra.mxu0 %vm262_vm2, %v4060_v23  ;;  %v4055_v41 = vmul.f32 %v5624_v52, %v4031_v18  ;;  %v4144_v23 = vmul.f32 1.00005, %v7391_v46 }
0x1521   :  { %v5626_v54 = vpop.eup %5625 }
0x1522   :  { %v5628_v34 = vpop.eup %5627  ;;  %v4058_v58 = vmul.f32 %v5626_v54, %v4034_v38 }
0x1523   :  { %v5630_v35 = vpop.eup %5629  ;;  %v4057_v24 = vmul.f32 %v5628_v34, %v4033_v44 }
0x1524   :  { %v4056_v50 = vmul.f32 %v5630_v35, %v4032_v9  ;;  %v4186_v9 = vmul.f32 0.0, %v7383_v26 }
0x1525   :  { %v4062_v61 = vpack.c.bf16 %v4058_v58, %v4057_v24 }
0x1526   :  { %v4061_v42 = vpack.c.bf16 %v4056_v50, %v4055_v41  ;;  %v4145_v50 = vmul.f32 1.00005, %v7393_v60 }
0x1528   :  { %5084 = vmatprep.mubr.msk.bf16.mxu1 %vm262_vm2, %v4061_v42  ;;  %v4184_v42 = vmul.f32 0.0, %v7391_v46 }
0x1529   :  { %5085 = vmatmul.mubr.msk.bf16.vlgmr.msra.gmra.mxu1 %vm262_vm2, %v4062_v61 }
0x15e0   :  { %v5082_v30 = vpop.f32.mrf.mxu0 }
0x15e1   :  { %v4118_v45 = vadd.f32 %v5082_v30, %v6018_v15 }
0x15e2   :  { %v4109_v40 = vpop.f32.mrf.mxu0 }
0x15e3   :  { %v4150_v25 = vmul.f32 0.0100005, %v4118_v45  ;;  %v4110_v49 = vadd.f32 %v4109_v40, %v6018_v15 }
0x15e4   :  { %v5083_v43 = vpop.f32.mrf.mxu0 }
0x15e5   :  { %v4158_v20 = vsub.f32 %v4142_v36, %v4150_v25  ;;  %v4148_v28 = vmul.f32 0.0100005, %v4110_v49  ;;  %v4121_v5 = vadd.f32 %v5083_v43, %v6018_v15  ;;  %v4185_v25 = vmul.f32 0.0, %v7393_v60 }
0x15e6   :  { %v4112_v32 = vpop.f32.mrf.mxu0 }
0x15e7   :  { %v4570_v29 = vclamps-f32 %v4158_v20, 1.0  ;;  %v4156_v62 = vsub.f32 %v4140_v16, %v4148_v28  ;;  %v4151_v27 = vmul.f32 0.0100005, %v4121_v5  ;;  %v4113_v63 = vadd.f32 %v4112_v32, %v6018_v15 }
0x15e9   :  { %v5086_v7 = vpop.f32.mrf.mxu1  ;;  %v4190_v2 = vadd.f32 %v4570_v29, %v4182_v55  ;;  %v4568_v11 = vclamps-f32 %v4156_v62, 1.0  ;;  %v4159_v14 = vsub.f32 %v4143_v10, %v4151_v27  ;;  %v4149_v0 = vmul.f32 0.0100005, %v4113_v63 }
0x15ea   :  { %v4134_v57 = vadd.f32 %v5086_v7, %v6018_v15 }
0x15eb   :  { %v4125_v6 = vpop.f32.mrf.mxu1  ;;  %v4578_v39 = vclamps-f32 %v4190_v2, 1.0  ;;  %v4188_v22 = vadd.f32 %v4568_v11, %v4180_v47  ;;  %v4571_v33 = vclamps-f32 %v4159_v14, 1.0  ;;  %v4157_v59 = vsub.f32 %v4141_v21, %v4149_v0 }
0x15ec   :  { %v4154_v56 = vmul.f32 0.0100005, %v4134_v57  ;;  %v4126_v1 = vadd.f32 %v4125_v6, %v6018_v15 }
0x15ed   :  { %v5087_v3 = vpop.f32.mrf.mxu1  ;;  %4214 = vst.msk [vmem:[%s7576_s5 + $0x10] sm:$0xff] %vm68_vm1, %v4578_v39  ;;  %v4576_v8 = vclamps-f32 %v4188_v22, 1.0  ;;  %v4191_v51 = vadd.f32 %v4571_v33, %v4183_v48  ;;  %v4569_v31 = vclamps-f32 %v4157_v59, 1.0 }
0x15ee   :  { %v4137_v13 = vadd.f32 %v5087_v3, %v6018_v15  ;;  %v4162_v12 = vsub.f32 %v4146_v19, %v4154_v56  ;;  %v4152_v17 = vmul.f32 0.0100005, %v4126_v1 }
0x15ef   :  { %v4128_v52 = vpop.f32.mrf.mxu1  ;;  %4212 = vst.msk [vmem:[%s7576_s5] sm:$0xff] %vm68_vm1, %v4576_v8  ;;  %v4579_v54 = vclamps-f32 %v4191_v51, 1.0  ;;  %v4189_v38 = vadd.f32 %v4569_v31, %v4181_v53 }
0x15f0   :  { %v4155_v34 = vmul.f32 0.0100005, %v4137_v13  ;;  %v4129_v18 = vadd.f32 %v4128_v52, %v6018_v15  ;;  %v4574_v35 = vclamps-f32 %v4162_v12, 1.0  ;;  %v4160_v44 = vsub.f32 %v4144_v23, %v4152_v17 }
0x15f1   :  { %4215 = vst.msk [vmem:[%s7576_s5 + $0x18] sm:$0xff] %vm68_vm1, %v4579_v54  ;;  %v4577_v58 = vclamps-f32 %v4189_v38, 1.0  ;;  %v4187_v15 = vmul.f32 0.0, %v7385_v4 }
0x15f2   :  { %v4163_v41 = vsub.f32 %v4147_v37, %v4155_v34  ;;  %v4153_v24 = vmul.f32 0.0100005, %v4129_v18  ;;  %v4194_v61 = vadd.f32 %v4574_v35, %v4186_v9  ;;  %v4572_v30 = vclamps-f32 %v4160_v44, 1.0 }
0x15f3   :  { %4213 = vst.msk [vmem:[%s7576_s5 + $0x8] sm:$0xff] %vm68_vm1, %v4577_v58 }
0x15f4   :  { %v4575_v26 = vclamps-f32 %v4163_v41, 1.0  ;;  %v4161_v45 = vsub.f32 %v4145_v50, %v4153_v24  ;;  %v4582_v40 = vclamps-f32 %v4194_v61, 1.0  ;;  %v4192_v36 = vadd.f32 %v4572_v30, %v4184_v42 }
0x15f6   :  { %v4195_v49 = vadd.f32 %v4575_v26, %v4187_v15  ;;  %v4573_v43 = vclamps-f32 %v4161_v45, 1.0  ;;  %4218 = vst.msk [vmem:[%s7576_s5 + $0x30] sm:$0xff] %vm68_vm1, %v4582_v40  ;;  %v4580_v46 = vclamps-f32 %v4192_v36, 1.0 }
0x15f8   :  { %v4583_v4 = vclamps-f32 %v4195_v49, 1.0  ;;  %v4193_v20 = vadd.f32 %v4573_v43, %v4185_v25  ;;  %4216 = vst.msk [vmem:[%s7576_s5 + $0x20] sm:$0xff] %vm68_vm1, %v4580_v46 }
0x15fa   :  { %4219 = vst.msk [vmem:[%s7576_s5 + $0x38] sm:$0xff] %vm68_vm1, %v4583_v4  ;;  %v4581_v60 = vclamps-f32 %v4193_v20, 1.0 }
0x15fc   :  { %4217 = vst.msk [vmem:[%s7576_s5 + $0x28] sm:$0xff] %vm68_vm1, %v4581_v60 }

</bundles_post_ra>
